<compile_context>
chip_gen: v7x
topology: tpu7x:2x2x1
jax: 0.10.0
libtpu: 0.0.40
codegen_flags: <defaults>
</compile_context>

<pallas_src>
import functools

import jax
import jax.numpy as jnp
from jax import lax
from jax.experimental import pallas as pl
from jax.experimental.pallas import tpu as pltpu


def _round_up(x, m):
    return ((x + m - 1) // m) * m


def _vmem_budget_bytes():
    """Per-core VMEM budget with headroom (v7x: 64 MiB/core, v5e/v6e: 128 MiB)."""
    cap = 64 * 1024 * 1024          # conservative default = v7x per-core VMEM
    try:
        cap = int(getattr(pltpu.get_tpu_info(), "vmem_capacity_bytes", cap))
    except Exception:
        pass
    return max(16 * 1024 * 1024, min((cap * 3) // 4, 96 * 1024 * 1024))


def _largest_divisor_tile(n, step, cap):
    """Largest multiple-of-`step` divisor of n that is <= cap (n is a multiple of step)."""
    best = step
    cand = step
    top = min(n, cap)
    while cand <= top:
        if n % cand == 0:
            best = cand
        cand += step
    return best


# ----------------------------------------------------------------------------
# Kernel 1: fused input projection for both directions (hoisted out of recurrence)
# ----------------------------------------------------------------------------
def proj_kernel(x_ref, w_ref, gx_ref):
    # One MXU matmul against [W_ih_fwd | W_ih_bwd]; split the lane-aligned halves.
    res = jnp.dot(x_ref[...], w_ref[...], preferred_element_type=jnp.float32)
    g = gx_ref.shape[-1]                                 # 4*Hp
    gx_ref[0] = res[:, :g].astype(gx_ref.dtype)          # forward-direction gates_x (bf16)
    gx_ref[1] = res[:, g:].astype(gx_ref.dtype)          # backward-direction gates_x (bf16)


# ----------------------------------------------------------------------------
# Kernel 2: bidirectional LSTM recurrence; grid = (direction, time chunk)
# ----------------------------------------------------------------------------
def bilstm_kernel(lens_ref, gx_ref, whh_ref, b_ref, o_ref, h_s, c_s, *, t_chunk):
    d = pl.program_id(0)                 # 0 = forward, 1 = backward
    k = pl.program_id(1)                 # time-chunk index for this direction
    t_total = pl.num_programs(1) * t_chunk
    Bp, Hp = h_s.shape[1], h_s.shape[2]

    @pl.when(k == 0)
    def _init():
        h_s[d] = jnp.zeros((Bp, Hp), h_s.dtype)
        c_s[d] = jnp.zeros((Bp, Hp), c_s.dtype)

    whh = whh_ref[...]                                        # (Hp, 4Hp) bf16
    bias = b_ref[...]                                         # (1, 4Hp)  f32
    # hoist the lane-broadcast of the lengths out of the step loop
    lens_b = jnp.broadcast_to(lens_ref[...], (Bp, Hp))        # (Bp, Hp) int32

    def body(s, carry):
        h, c = carry                                          # h bf16, c f32
        local = s + d * (t_chunk - 1 - 2 * s)                 # fwd: s        bwd: TC-1-s
        t_fwd = k * t_chunk + s
        t_abs = t_fwd + d * (t_total - 1 - 2 * t_fwd)         # fwd: t_fwd    bwd: Tp-1-t_fwd
        # gx is bf16; bias add and h @ W_hh accumulation stay in f32.
        gates = (gx_ref[local] + bias
                 + jnp.dot(h, whh, preferred_element_type=jnp.float32))
        i = jax.nn.sigmoid(gates[:, 0 * Hp:1 * Hp])           # gate order i, f, g, o
        f = jax.nn.sigmoid(gates[:, 1 * Hp:2 * Hp])
        g = jnp.tanh(gates[:, 2 * Hp:3 * Hp])
        o = jax.nn.sigmoid(gates[:, 3 * Hp:4 * Hp])
        c_new = f * c + i * g
        h_new = (o * jnp.tanh(c_new)).astype(h.dtype)         # single f32->bf16 cast per step
        mask = lens_b > t_abs
        o_ref[local] = jnp.where(mask, h_new, jnp.zeros_like(h_new))  # pads -> zeros
        h_out = jnp.where(mask, h_new, h)                     # freeze state past seq end
        c_out = jnp.where(mask, c_new, c)
        return h_out, c_out

    h_v, c_v = lax.fori_loop(0, t_chunk, body, (h_s[d], c_s[d]), unroll=True)
    h_s[d] = h_v
    c_s[d] = c_v


# ----------------------------------------------------------------------------
# Kernel 3: fused tanh + lstm_out_linear + entity/emotion heads
# ----------------------------------------------------------------------------
def head_kernel(h_ref, wlo_ref, blo_ref, whead_ref, bhead_ref, out_ref):
    hf = jnp.tanh(h_ref[0].astype(jnp.float32)).astype(jnp.bfloat16)   # Tanh()
    hb = jnp.tanh(h_ref[1].astype(jnp.float32)).astype(jnp.bfloat16)
    h2 = jnp.concatenate([hf, hb], axis=-1)                            # (TR, 2*Hp) bf16
    wf = (jnp.dot(h2, wlo_ref[...], preferred_element_type=jnp.float32)
          + blo_ref[...])                                              # lstm_out_linear
    wft = jnp.tanh(wf).astype(jnp.bfloat16)                            # Tanh()
    out_ref[...] = (jnp.dot(wft, whead_ref[...], preferred_element_type=jnp.float32)
                    + bhead_ref[...])                                  # [entity | emotion]


# ----------------------------------------------------------------------------
# Wrapper
# ----------------------------------------------------------------------------
def bilstm_forward(params, xs_padded, xlens, *, t_chunk=None):
    """xs_padded: (B, T) int32 token ids (0 = pad); xlens: (B,) int32 lengths."""
    B, T = xs_padded.shape
    D = params["embed"].shape[1]
    H = D                                    # hidden_size == word_embed_dim
    n_ent = params["w_ent"].shape[1]
    n_emo = params["w_emo"].shape[1]

    f32, bf16 = jnp.float32, jnp.bfloat16

    # padded geometry: lanes multiple of 128, sublanes (batch) multiple of 8
    Bp = max(8, _round_up(B, 8))
    Hp = _round_up(H, 128)
    Dp = _round_up(D, 128)
    WFp = _round_up(2 * H, 128)              # lstm_out_linear width, lane padded
    NOUT = n_ent + n_emo
    NOUTp = _round_up(NOUT, 128)             # fused head output, lane padded

    budget = _vmem_budget_bytes()

    # ---- time-chunk size for the recurrence, sized to the per-generation VMEM budget
    per_t = 2 * (Bp * 4 * Hp * 2) + 2 * (Bp * Hp * 2)   # gx + out chunks, bf16, 2x buffered
    fixed2 = (2 * Hp * 4 * Hp * 2) + 2 * (4 * Hp * 4) + 2 * Bp * 4 \
             + 2 * Bp * Hp * (2 + 4)                    # W_hh, bias, lens, h/c scratch
    if t_chunk is not None:
        TC = max(1, min(T, int(t_chunk)))
    else:
        TC = max(1, min(32, T, (int(budget * 0.7) - fixed2) // max(per_t, 1)))
    Tp = _round_up(T, TC)
    n_chunks = Tp // TC
    rows = Tp * Bp

    # ---- row tile for kernels 1 & 3 (Bp*TC always divides rows, so TR >= 64 typically)
    per_row = max(4 * Dp + 32 * Hp, 8 * Hp + 8 * NOUTp)
    fixed13 = max(2 * (Dp * 8 * Hp * 2),
                  2 * (2 * Hp * WFp * 2 + WFp * NOUTp * 2) + 2 * (WFp + NOUTp) * 4)
    tr_cap = max(8, min(1024, ((int(budget * 0.7) - fixed13) // max(per_row, 1)) // 8 * 8))
    TR = _largest_divisor_tile(rows, 8, tr_cap)
    n_row_tiles = rows // TR

    # ---- pack weights: zero-pad each gate into a 128-aligned slot, bf16 MXU operands ----
    def pad_gate_cols(w, rows_to):
        out = jnp.zeros((rows_to, 4 * Hp), f32)
        for g in range(4):                   # gate order i, f, g, o (PyTorch)
            out = out.at[:w.shape[0], g * Hp:g * Hp + H].set(w[:, g * H:(g + 1) * H])
        return out

    # fused input-projection weight: [fwd gates | bwd gates] along N -> (Dp, 8*Hp)
    wih = jnp.concatenate([pad_gate_cols(params["wih_f"], Dp),
                           pad_gate_cols(params["wih_b"], Dp)], axis=1).astype(bf16)
    whh = jnp.stack([pad_gate_cols(params["whh_f"], Hp),
                     pad_gate_cols(params["whh_b"], Hp)], axis=0).astype(bf16)  # (2,Hp,4Hp)
    bias = jnp.stack([pad_gate_cols(params["b_f"], 1),
                      pad_gate_cols(params["b_b"], 1)], axis=0)                 # (2,1,4Hp) f32

    # lstm_out_linear packed for the concatenated [h_fwd | h_bwd] input (K = 2*Hp)
    w_lo = params["w_lo"]                                            # (2H, 2H)
    wlo2 = jnp.zeros((2 * Hp, WFp), f32)
    wlo2 = wlo2.at[:H, :2 * H].set(w_lo[:H])
    wlo2 = wlo2.at[Hp:Hp + H, :2 * H].set(w_lo[H:]).astype(bf16)
    b_lo = jnp.zeros((1, WFp), f32).at[:, :2 * H].set(params["b_lo"])

    w_head = jnp.zeros((WFp, NOUTp), f32)
    w_head = w_head.at[:2 * H, :n_ent].set(params["w_ent"])
    w_head = w_head.at[:2 * H, n_ent:NOUT].set(params["w_emo"]).astype(bf16)
    b_head = jnp.zeros((1, NOUTp), f32)
    b_head = b_head.at[:, :n_ent].set(params["b_ent"])
    b_head = b_head.at[:, n_ent:NOUT].set(params["b_emo"])

    embed = jnp.zeros((params["embed"].shape[0], Dp), f32)
    embed = embed.at[:, :D].set(params["embed"]).astype(bf16)        # padding_idx row 0 = 0

    # ---- glue: pad batch/time, gather embeddings directly in time-major order ----
    tok = jnp.zeros((Bp, Tp), jnp.int32).at[:B, :T].set(xs_padded.astype(jnp.int32))
    lens = jnp.zeros((Bp, 1), jnp.int32).at[:B, 0].set(xlens.astype(jnp.int32))
    x_flat = embed[tok.T].reshape(rows, Dp)          # (Tp*Bp, Dp) bf16 (dropout = identity)

    # ---- kernel 1: fused input projection, bf16 output stream ----
    gx = pl.pallas_call(
        proj_kernel,
        out_shape=jax.ShapeDtypeStruct((2, rows, 4 * Hp), bf16),
        grid=(n_row_tiles,),
        in_specs=[
            pl.BlockSpec((TR, Dp), lambda r: (r, 0)),
            pl.BlockSpec((Dp, 8 * Hp), lambda r: (0, 0)),
        ],
        out_specs=pl.BlockSpec((2, TR, 4 * Hp), lambda r: (0, r, 0)),
        compiler_params=pltpu.CompilerParams(
            dimension_semantics=("parallel",), vmem_limit_bytes=budget),
    )(x_flat, wih)
    gx = gx.reshape(2, Tp, Bp, 4 * Hp)

    # ---- kernel 2: recurrence; direction axis parallel (2nd TC on v7x), time arbitrary ----
    chunk_map = lambda d, k: (d, k + d * (n_chunks - 1 - 2 * k), 0, 0)
    hid = pl.pallas_call(
        functools.partial(bilstm_kernel, t_chunk=TC),
        out_shape=jax.ShapeDtypeStruct((2, Tp, Bp, Hp), bf16),
        grid=(2, n_chunks),
        in_specs=[
            pl.BlockSpec((Bp, 1), lambda d, k: (0, 0)),                   # lengths
            pl.BlockSpec((None, TC, Bp, 4 * Hp), chunk_map),              # gates_x (bf16)
            pl.BlockSpec((None, Hp, 4 * Hp), lambda d, k: (d, 0, 0)),     # W_hh (per dir)
            pl.BlockSpec((None, 1, 4 * Hp), lambda d, k: (d, 0, 0)),      # bias (f32)
        ],
        out_specs=pl.BlockSpec((None, TC, Bp, Hp), chunk_map),            # hidden (bf16)
        scratch_shapes=[pltpu.VMEM((2, Bp, Hp), bf16),                    # h state (per dir)
                        pltpu.VMEM((2, Bp, Hp), f32)],                    # c state (per dir)
        compiler_params=pltpu.CompilerParams(
            dimension_semantics=("parallel", "arbitrary"),
            vmem_limit_bytes=budget),
    )(lens, gx, whh, bias)

    # ---- kernel 3: fused heads, reading the stacked fwd/bwd slab (no (T,B,2H) concat) ----
    hid_flat = hid.reshape(2, rows, Hp)
    out = pl.pallas_call(
        head_kernel,
        out_shape=jax.ShapeDtypeStruct((rows, NOUTp), f32),
        grid=(n_row_tiles,),
        in_specs=[
            pl.BlockSpec((2, TR, Hp), lambda r: (0, r, 0)),
            pl.BlockSpec((2 * Hp, WFp), lambda r: (0, 0)),
            pl.BlockSpec((1, WFp), lambda r: (0, 0)),
            pl.BlockSpec((WFp, NOUTp), lambda r: (0, 0)),
            pl.BlockSpec((1, NOUTp), lambda r: (0, 0)),
        ],
        out_specs=pl.BlockSpec((TR, NOUTp), lambda r: (r, 0)),
        compiler_params=pltpu.CompilerParams(
            dimension_semantics=("parallel",), vmem_limit_bytes=budget),
    )(hid_flat, wlo2, b_lo, w_head, b_head)

    # transpose only the tiny per-token score tensors, then strip padding
    scores = jnp.transpose(out.reshape(Tp, Bp, NOUTp), (1, 0, 2))[:B, :T]
    entity_scores = scores[..., :n_ent]
    emotion_scores = scores[..., n_ent:NOUT]
    return entity_scores, emotion_scores


# ----------------------------------------------------------------------------
# Deterministic parameter init (shapes follow the nn.Module __init__)
# ----------------------------------------------------------------------------
def init_params(key, n_words, word_embed_dim, n_entities, n_emotions):
    D = word_embed_dim
    H = D
    ks = jax.random.split(key, 12)

    def rnd(k, shape, scale=0.1):
        return (scale * jax.random.normal(k, shape)).astype(jnp.float32)

    embed = rnd(ks[0], (n_words, D))
    embed = embed.at[0].set(0.0)             # padding_idx=0

    return {
        "embed": embed,
        # LSTM weights stored transposed for x @ W; gate order i,f,g,o (PyTorch)
        "wih_f": rnd(ks[1], (D, 4 * H)),
        "whh_f": rnd(ks[2], (H, 4 * H)),
        "b_f":   rnd(ks[3], (1, 4 * H)),     # b_ih + b_hh combined
        "wih_b": rnd(ks[4], (D, 4 * H)),
        "whh_b": rnd(ks[5], (H, 4 * H)),
        "b_b":   rnd(ks[6], (1, 4 * H)),
        # lstm_out_linear: Linear(2H, 2H)
        "w_lo":  rnd(ks[7], (2 * H, 2 * H)),
        "b_lo":  rnd(ks[8], (1, 2 * H)),
        # entity_linear: Linear(2H, n_entities)
        "w_ent": rnd(ks[9], (2 * H, n_entities)),
        "b_ent": rnd(ks[10], (1, n_entities)),
        # emotion_linear: Linear(2H, n_emotions)
        "w_emo": rnd(ks[11], (2 * H, n_emotions)),
        "b_emo": jnp.zeros((1, n_emotions), jnp.float32),
    }


if __name__ == "__main__":
    B = 2
    T = 16              # max sequence length
    D = 32              # word_embed_dim == LSTM hidden size
    n_words = 100
    n_entities = 8
    n_emotions = 4

    key = jax.random.PRNGKey(0)
    kp, kx = jax.random.split(key)

    params = init_params(kp, n_words, D, n_entities, n_emotions)

    # variable-length sequences, zero-padded to T (as the PyTorch forward does)
    xlens = jnp.array([16, 9], dtype=jnp.int32)
    tok = jax.random.randint(kx, (B, T), minval=1, maxval=n_words, dtype=jnp.int32)
    pos = jnp.arange(T)[None, :]
    xs_padded = jnp.where(pos < xlens[:, None], tok, 0)

    fwd = jax.jit(bilstm_forward)
    entity_scores, emotion_scores = fwd(params, xs_padded, xlens)
    jax.block_until_ready((entity_scores, emotion_scores))

    assert entity_scores.shape == (B, T, n_entities)
    assert emotion_scores.shape == (B, T, n_emotions)
    assert bool(jnp.all(jnp.isfinite(entity_scores)))
    assert bool(jnp.all(jnp.isfinite(emotion_scores)))
    print("KERNEL_OK")
</pallas_src>

<mosaic_0001>
module attributes {stable_mosaic.version = 11 : i64} {
  func.func @proj_kernel(%arg0: i32, %arg1: memref<128x128xbf16, #tpu.memory_space<vmem>>, %arg2: memref<128x1024xbf16, #tpu.memory_space<vmem>>, %arg3: memref<2x128x512xbf16, #tpu.memory_space<vmem>>) attributes {dimension_semantics = [#tpu.dimension_semantics<parallel>], iteration_bounds = array<i64: 1>, scalar_prefetch = 0 : i64, scratch_operands = 0 : i64, tpu.core_type = #tpu.core_type<tc>, window_params = [{transform_indices = @transform_0, window_bounds = array<i64: 128, 128>}, {pipeline_mode = #tpu.pipeline_mode<synchronous>, transform_indices = @transform_1, window_bounds = array<i64: 128, 1024>}, {transform_indices = @transform_2, window_bounds = array<i64: 2, 128, 512>}]} {
    %c0 = arith.constant 0 : index
    %c0_0 = arith.constant 0 : index
    %0 = vector.load %arg1[%c0, %c0_0] : memref<128x128xbf16, #tpu.memory_space<vmem>>, vector<128x128xbf16>
    %c0_1 = arith.constant 0 : index
    %c0_2 = arith.constant 0 : index
    %1 = vector.load %arg2[%c0_1, %c0_2] : memref<128x1024xbf16, #tpu.memory_space<vmem>>, vector<128x1024xbf16>
    %cst = arith.constant dense<0.000000e+00> : vector<128x1024xf32>
    %2 = tpu.matmul %0, %1, %cst {dimension_numbers = #tpu.dot_dimension_numbers<[1], [0], [0], [1], [0, 0, 1, 1], [], []>} : vector<128x128xbf16>, vector<128x1024xbf16>, vector<128x1024xf32> -> vector<128x1024xf32>
    %3 = vector.extract_strided_slice %2 {offsets = [0, 0], sizes = [128, 512], strides = [1, 1]} : vector<128x1024xf32> to vector<128x512xf32>
    %4 = arith.truncf %3 : vector<128x512xf32> to vector<128x512xbf16>
    %c0_3 = arith.constant 0 : index
    %c0_4 = arith.constant 0 : index
    %c0_5 = arith.constant 0 : index
    %5 = vector.load %arg3[%c0_3, %c0_4, %c0_5] : memref<2x128x512xbf16, #tpu.memory_space<vmem>>, vector<1x128x512xbf16>
    %6 = vector.shape_cast %5 : vector<1x128x512xbf16> to vector<128x512xbf16>
    %7 = vector.shape_cast %4 : vector<128x512xbf16> to vector<1x128x512xbf16>
    tpu.vector_store %arg3[%c0_3, %c0_4, %c0_5], %7 {strides = array<i32>} : memref<2x128x512xbf16, #tpu.memory_space<vmem>>, vector<1x128x512xbf16>,
    %8 = vector.extract_strided_slice %2 {offsets = [0, 512], sizes = [128, 512], strides = [1, 1]} : vector<128x1024xf32> to vector<128x512xf32>
    %9 = arith.truncf %8 : vector<128x512xf32> to vector<128x512xbf16>
    %c1 = arith.constant 1 : index
    %c0_6 = arith.constant 0 : index
    %c0_7 = arith.constant 0 : index
    %10 = vector.load %arg3[%c1, %c0_6, %c0_7] : memref<2x128x512xbf16, #tpu.memory_space<vmem>>, vector<1x128x512xbf16>
    %11 = vector.shape_cast %10 : vector<1x128x512xbf16> to vector<128x512xbf16>
    %12 = vector.shape_cast %9 : vector<128x512xbf16> to vector<1x128x512xbf16>
    tpu.vector_store %arg3[%c1, %c0_6, %c0_7], %12 {strides = array<i32>} : memref<2x128x512xbf16, #tpu.memory_space<vmem>>, vector<1x128x512xbf16>,
    return
  }
  func.func @transform_0(%arg0: i32) -> (i32, i32) {
    %c0_i32 = arith.constant 0 : i32
    %c0_i32_0 = arith.constant 0 : i32
    return %arg0, %c0_i32 : i32, i32
  }
  func.func @transform_1(%arg0: i32) -> (i32, i32) {
    %c0_i32 = arith.constant 0 : i32
    %c0_i32_0 = arith.constant 0 : i32
    %c0_i32_1 = arith.constant 0 : i32
    return %c0_i32, %c0_i32_0 : i32, i32
  }
  func.func @transform_2(%arg0: i32) -> (i32, i32, i32) {
    %c0_i32 = arith.constant 0 : i32
    %c0_i32_0 = arith.constant 0 : i32
    %c0_i32_1 = arith.constant 0 : i32
    return %c0_i32, %arg0, %c0_i32_0 : i32, i32, i32
  }
}

module attributes {stable_mosaic.version = 11 : i64} {
  func.func @bilstm_kernel(%arg0: i32, %arg1: i32, %arg2: memref<8x1xi32, #tpu.memory_space<vmem>>, %arg3: memref<1x16x8x512xbf16, #tpu.memory_space<vmem>>, %arg4: memref<1x128x512xbf16, #tpu.memory_space<vmem>>, %arg5: memref<1x1x512xf32, #tpu.memory_space<vmem>>, %arg6: memref<1x16x8x128xbf16, #tpu.memory_space<vmem>>, %arg7: memref<2x8x128xbf16, #tpu.memory_space<vmem>>, %arg8: memref<2x8x128xf32, #tpu.memory_space<vmem>>) attributes {dimension_semantics = [#tpu.dimension_semantics<parallel>, #tpu.dimension_semantics<arbitrary>], iteration_bounds = array<i64: 2, 1>, scalar_prefetch = 0 : i64, scratch_operands = 2 : i64, tpu.core_type = #tpu.core_type<tc>, window_params = [{pipeline_mode = #tpu.pipeline_mode<synchronous>, transform_indices = @transform_0, window_bounds = array<i64: 8, 1>}, {transform_indices = @transform_1, window_bounds = array<i64: 1, 16, 8, 512>}, {transform_indices = @transform_2, window_bounds = array<i64: 1, 128, 512>}, {transform_indices = @transform_3, window_bounds = array<i64: 1, 1, 512>}, {transform_indices = @transform_4, window_bounds = array<i64: 1, 16, 8, 128>}]} {
    %c0_i32 = arith.constant 0 : i32
    %0 = arith.cmpi eq, %arg1, %c0_i32 : i32
    %1 = arith.extui %0 : i1 to i32
    %c0_i32_0 = arith.constant 0 : i32
    %2 = arith.cmpi ne, %1, %c0_i32_0 : i32
    scf.if %2 {
      %cst_272 = arith.constant 0.000000e+00 : bf16
      %888 = vector.broadcast %cst_272 : bf16 to vector<8x128xbf16>
      %889 = arith.index_cast %arg0 : i32 to index
      %c0_273 = arith.constant 0 : index
      %c0_274 = arith.constant 0 : index
      %890 = vector.load %arg7[%889, %c0_273, %c0_274] : memref<2x8x128xbf16, #tpu.memory_space<vmem>>, vector<1x8x128xbf16>
      %891 = vector.shape_cast %890 : vector<1x8x128xbf16> to vector<8x128xbf16>
      %892 = vector.shape_cast %888 : vector<8x128xbf16> to vector<1x8x128xbf16>
      tpu.vector_store %arg7[%889, %c0_273, %c0_274], %892 {strides = array<i32>} : memref<2x8x128xbf16, #tpu.memory_space<vmem>>, vector<1x8x128xbf16>,
      %cst_275 = arith.constant 0.000000e+00 : f32
      %893 = vector.broadcast %cst_275 : f32 to vector<8x128xf32>
      %894 = arith.index_cast %arg0 : i32 to index
      %c0_276 = arith.constant 0 : index
      %c0_277 = arith.constant 0 : index
      %895 = vector.load %arg8[%894, %c0_276, %c0_277] : memref<2x8x128xf32, #tpu.memory_space<vmem>>, vector<1x8x128xf32>
      %896 = vector.shape_cast %895 : vector<1x8x128xf32> to vector<8x128xf32>
      %897 = vector.shape_cast %893 : vector<8x128xf32> to vector<1x8x128xf32>
      tpu.vector_store %arg8[%894, %c0_276, %c0_277], %897 {strides = array<i32>} : memref<2x8x128xf32, #tpu.memory_space<vmem>>, vector<1x8x128xf32>,
    } else {
    }
    %c0 = arith.constant 0 : index
    %c0_1 = arith.constant 0 : index
    %c0_2 = arith.constant 0 : index
    %3 = vector.load %arg4[%c0, %c0_1, %c0_2] : memref<1x128x512xbf16, #tpu.memory_space<vmem>>, vector<1x128x512xbf16>
    %4 = vector.shape_cast %3 : vector<1x128x512xbf16> to vector<128x512xbf16>
    %c0_3 = arith.constant 0 : index
    %c0_4 = arith.constant 0 : index
    %c0_5 = arith.constant 0 : index
    %5 = vector.load %arg5[%c0_3, %c0_4, %c0_5] : memref<1x1x512xf32, #tpu.memory_space<vmem>>, vector<1x1x512xf32>
    %6 = vector.shape_cast %5 : vector<1x1x512xf32> to vector<1x512xf32>
    %c0_6 = arith.constant 0 : index
    %c0_7 = arith.constant 0 : index
    %7 = vector.load %arg2[%c0_6, %c0_7] : memref<8x1xi32, #tpu.memory_space<vmem>>, vector<8x1xi32>
    %8 = vector.shape_cast %7 : vector<8x1xi32> to vector<8x1xi32>
    %9 = vector.broadcast %8 : vector<8x1xi32> to vector<8x128xi32>
    %10 = arith.index_cast %arg0 : i32 to index
    %c0_8 = arith.constant 0 : index
    %c0_9 = arith.constant 0 : index
    %11 = vector.load %arg7[%10, %c0_8, %c0_9] : memref<2x8x128xbf16, #tpu.memory_space<vmem>>, vector<1x8x128xbf16>
    %12 = vector.shape_cast %11 : vector<1x8x128xbf16> to vector<8x128xbf16>
    %13 = arith.index_cast %arg0 : i32 to index
    %c0_10 = arith.constant 0 : index
    %c0_11 = arith.constant 0 : index
    %14 = vector.load %arg8[%13, %c0_10, %c0_11] : memref<2x8x128xf32, #tpu.memory_space<vmem>>, vector<1x8x128xf32>
    %15 = vector.shape_cast %14 : vector<1x8x128xf32> to vector<8x128xf32>
    %c0_i32_12 = arith.constant 0 : i32
    %c2_i32 = arith.constant 2 : i32
    %16 = arith.muli %c2_i32, %c0_i32_12 : i32
    %c15_i32 = arith.constant 15 : i32
    %17 = arith.subi %c15_i32, %16 : i32
    %18 = arith.muli %arg0, %17 : i32
    %19 = arith.addi %c0_i32_12, %18 : i32
    %c16_i32 = arith.constant 16 : i32
    %20 = arith.muli %arg1, %c16_i32 : i32
    %21 = arith.addi %20, %c0_i32_12 : i32
    %c2_i32_13 = arith.constant 2 : i32
    %22 = arith.muli %c2_i32_13, %21 : i32
    %c15_i32_14 = arith.constant 15 : i32
    %23 = arith.subi %c15_i32_14, %22 : i32
    %24 = arith.muli %arg0, %23 : i32
    %25 = arith.addi %21, %24 : i32
    %c0_15 = arith.constant 0 : index
    %26 = arith.index_cast %19 : i32 to index
    %c0_16 = arith.constant 0 : index
    %c0_17 = arith.constant 0 : index
    %27 = vector.load %arg3[%c0_15, %26, %c0_16, %c0_17] : memref<1x16x8x512xbf16, #tpu.memory_space<vmem>>, vector<1x1x8x512xbf16>
    %28 = vector.shape_cast %27 : vector<1x1x8x512xbf16> to vector<8x512xbf16>
    %29 = arith.extf %28 : vector<8x512xbf16> to vector<8x512xf32>
    %30 = vector.broadcast %6 : vector<1x512xf32> to vector<8x512xf32>
    %31 = arith.addf %29, %30 : vector<8x512xf32>
    %cst = arith.constant dense<0.000000e+00> : vector<8x512xf32>
    %32 = tpu.matmul %12, %4, %cst {dimension_numbers = #tpu.dot_dimension_numbers<[1], [0], [0], [1], [0, 0, 1, 1], [], []>} : vector<8x128xbf16>, vector<128x512xbf16>, vector<8x512xf32> -> vector<8x512xf32>
    %33 = arith.addf %31, %32 : vector<8x512xf32>
    %34 = vector.extract_strided_slice %33 {offsets = [0, 0], sizes = [8, 128], strides = [1, 1]} : vector<8x512xf32> to vector<8x128xf32>
    %35 = arith.negf %34 : vector<8x128xf32>
    %36 = math.exp %35 : vector<8x128xf32>
    %cst_18 = arith.constant 1.000000e+00 : f32
    %37 = vector.broadcast %cst_18 : f32 to vector<8x128xf32>
    %38 = arith.addf %37, %36 : vector<8x128xf32>
    %39 = arith.divf %37, %38 : vector<8x128xf32>
    %40 = vector.extract_strided_slice %33 {offsets = [0, 128], sizes = [8, 128], strides = [1, 1]} : vector<8x512xf32> to vector<8x128xf32>
    %41 = arith.negf %40 : vector<8x128xf32>
    %42 = math.exp %41 : vector<8x128xf32>
    %cst_19 = arith.constant 1.000000e+00 : f32
    %43 = vector.broadcast %cst_19 : f32 to vector<8x128xf32>
    %44 = arith.addf %43, %42 : vector<8x128xf32>
    %45 = arith.divf %43, %44 : vector<8x128xf32>
    %46 = vector.extract_strided_slice %33 {offsets = [0, 256], sizes = [8, 128], strides = [1, 1]} : vector<8x512xf32> to vector<8x128xf32>
    %47 = math.tanh %46 : vector<8x128xf32>
    %48 = vector.extract_strided_slice %33 {offsets = [0, 384], sizes = [8, 128], strides = [1, 1]} : vector<8x512xf32> to vector<8x128xf32>
    %49 = arith.negf %48 : vector<8x128xf32>
    %50 = math.exp %49 : vector<8x128xf32>
    %cst_20 = arith.constant 1.000000e+00 : f32
    %51 = vector.broadcast %cst_20 : f32 to vector<8x128xf32>
    %52 = arith.addf %51, %50 : vector<8x128xf32>
    %53 = arith.divf %51, %52 : vector<8x128xf32>
    %54 = arith.mulf %45, %15 : vector<8x128xf32>
    %55 = arith.mulf %39, %47 : vector<8x128xf32>
    %56 = arith.addf %54, %55 : vector<8x128xf32>
    %57 = math.tanh %56 : vector<8x128xf32>
    %58 = arith.mulf %53, %57 : vector<8x128xf32>
    %59 = arith.truncf %58 : vector<8x128xf32> to vector<8x128xbf16>
    %60 = vector.broadcast %25 : i32 to vector<8x128xi32>
    %61 = arith.cmpi sgt, %9, %60 : vector<8x128xi32>
    %cst_21 = arith.constant 0.000000e+00 : bf16
    %62 = vector.broadcast %cst_21 : bf16 to vector<8x128xbf16>
    %63 = arith.select %61, %59, %62 : vector<8x128xi1>, vector<8x128xbf16>
    %c0_22 = arith.constant 0 : index
    %64 = arith.index_cast %19 : i32 to index
    %c0_23 = arith.constant 0 : index
    %c0_24 = arith.constant 0 : index
    %65 = vector.load %arg6[%c0_22, %64, %c0_23, %c0_24] : memref<1x16x8x128xbf16, #tpu.memory_space<vmem>>, vector<1x1x8x128xbf16>
    %66 = vector.shape_cast %65 : vector<1x1x8x128xbf16> to vector<8x128xbf16>
    %67 = vector.shape_cast %63 : vector<8x128xbf16> to vector<1x1x8x128xbf16>
    tpu.vector_store %arg6[%c0_22, %64, %c0_23, %c0_24], %67 {strides = array<i32>} : memref<1x16x8x128xbf16, #tpu.memory_space<vmem>>, vector<1x1x8x128xbf16>,
    %68 = arith.select %61, %59, %12 : vector<8x128xi1>, vector<8x128xbf16>
    %69 = arith.select %61, %56, %15 : vector<8x128xi1>, vector<8x128xf32>
    %c1_i32 = arith.constant 1 : i32
    %c2_i32_25 = arith.constant 2 : i32
    %70 = arith.muli %c2_i32_25, %c1_i32 : i32
    %c15_i32_26 = arith.constant 15 : i32
    %71 = arith.subi %c15_i32_26, %70 : i32
    %72 = arith.muli %arg0, %71 : i32
    %73 = arith.addi %c1_i32, %72 : i32
    %c16_i32_27 = arith.constant 16 : i32
    %74 = arith.muli %arg1, %c16_i32_27 : i32
    %75 = arith.addi %74, %c1_i32 : i32
    %c2_i32_28 = arith.constant 2 : i32
    %76 = arith.muli %c2_i32_28, %75 : i32
    %c15_i32_29 = arith.constant 15 : i32
    %77 = arith.subi %c15_i32_29, %76 : i32
    %78 = arith.muli %arg0, %77 : i32
    %79 = arith.addi %75, %78 : i32
    %c0_30 = arith.constant 0 : index
    %80 = arith.index_cast %73 : i32 to index
    %c0_31 = arith.constant 0 : index
    %c0_32 = arith.constant 0 : index
    %81 = vector.load %arg3[%c0_30, %80, %c0_31, %c0_32] : memref<1x16x8x512xbf16, #tpu.memory_space<vmem>>, vector<1x1x8x512xbf16>
    %82 = vector.shape_cast %81 : vector<1x1x8x512xbf16> to vector<8x512xbf16>
    %83 = arith.extf %82 : vector<8x512xbf16> to vector<8x512xf32>
    %84 = vector.broadcast %6 : vector<1x512xf32> to vector<8x512xf32>
    %85 = arith.addf %83, %84 : vector<8x512xf32>
    %cst_33 = arith.constant dense<0.000000e+00> : vector<8x512xf32>
    %86 = tpu.matmul %68, %4, %cst_33 {dimension_numbers = #tpu.dot_dimension_numbers<[1], [0], [0], [1], [0, 0, 1, 1], [], []>} : vector<8x128xbf16>, vector<128x512xbf16>, vector<8x512xf32> -> vector<8x512xf32>
    %87 = arith.addf %85, %86 : vector<8x512xf32>
    %88 = vector.extract_strided_slice %87 {offsets = [0, 0], sizes = [8, 128], strides = [1, 1]} : vector<8x512xf32> to vector<8x128xf32>
    %89 = arith.negf %88 : vector<8x128xf32>
    %90 = math.exp %89 : vector<8x128xf32>
    %cst_34 = arith.constant 1.000000e+00 : f32
    %91 = vector.broadcast %cst_34 : f32 to vector<8x128xf32>
    %92 = arith.addf %91, %90 : vector<8x128xf32>
    %93 = arith.divf %91, %92 : vector<8x128xf32>
    %94 = vector.extract_strided_slice %87 {offsets = [0, 128], sizes = [8, 128], strides = [1, 1]} : vector<8x512xf32> to vector<8x128xf32>
    %95 = arith.negf %94 : vector<8x128xf32>
    %96 = math.exp %95 : vector<8x128xf32>
    %cst_35 = arith.constant 1.000000e+00 : f32
    %97 = vector.broadcast %cst_35 : f32 to vector<8x128xf32>
    %98 = arith.addf %97, %96 : vector<8x128xf32>
    %99 = arith.divf %97, %98 : vector<8x128xf32>
    %100 = vector.extract_strided_slice %87 {offsets = [0, 256], sizes = [8, 128], strides = [1, 1]} : vector<8x512xf32> to vector<8x128xf32>
    %101 = math.tanh %100 : vector<8x128xf32>
    %102 = vector.extract_strided_slice %87 {offsets = [0, 384], sizes = [8, 128], strides = [1, 1]} : vector<8x512xf32> to vector<8x128xf32>
    %103 = arith.negf %102 : vector<8x128xf32>
    %104 = math.exp %103 : vector<8x128xf32>
    %cst_36 = arith.constant 1.000000e+00 : f32
    %105 = vector.broadcast %cst_36 : f32 to vector<8x128xf32>
    %106 = arith.addf %105, %104 : vector<8x128xf32>
    %107 = arith.divf %105, %106 : vector<8x128xf32>
    %108 = arith.mulf %99, %69 : vector<8x128xf32>
    %109 = arith.mulf %93, %101 : vector<8x128xf32>
    %110 = arith.addf %108, %109 : vector<8x128xf32>
    %111 = math.tanh %110 : vector<8x128xf32>
    %112 = arith.mulf %107, %111 : vector<8x128xf32>
    %113 = arith.truncf %112 : vector<8x128xf32> to vector<8x128xbf16>
    %114 = vector.broadcast %79 : i32 to vector<8x128xi32>
    %115 = arith.cmpi sgt, %9, %114 : vector<8x128xi32>
    %cst_37 = arith.constant 0.000000e+00 : bf16
    %116 = vector.broadcast %cst_37 : bf16 to vector<8x128xbf16>
    %117 = arith.select %115, %113, %116 : vector<8x128xi1>, vector<8x128xbf16>
    %c0_38 = arith.constant 0 : index
    %118 = arith.index_cast %73 : i32 to index
    %c0_39 = arith.constant 0 : index
    %c0_40 = arith.constant 0 : index
    %119 = vector.load %arg6[%c0_38, %118, %c0_39, %c0_40] : memref<1x16x8x128xbf16, #tpu.memory_space<vmem>>, vector<1x1x8x128xbf16>
    %120 = vector.shape_cast %119 : vector<1x1x8x128xbf16> to vector<8x128xbf16>
    %121 = vector.shape_cast %117 : vector<8x128xbf16> to vector<1x1x8x128xbf16>
    tpu.vector_store %arg6[%c0_38, %118, %c0_39, %c0_40], %121 {strides = array<i32>} : memref<1x16x8x128xbf16, #tpu.memory_space<vmem>>, vector<1x1x8x128xbf16>,
    %122 = arith.select %115, %113, %68 : vector<8x128xi1>, vector<8x128xbf16>
    %123 = arith.select %115, %110, %69 : vector<8x128xi1>, vector<8x128xf32>
    %c2_i32_41 = arith.constant 2 : i32
    %c2_i32_42 = arith.constant 2 : i32
    %124 = arith.muli %c2_i32_42, %c2_i32_41 : i32
    %c15_i32_43 = arith.constant 15 : i32
    %125 = arith.subi %c15_i32_43, %124 : i32
    %126 = arith.muli %arg0, %125 : i32
    %127 = arith.addi %c2_i32_41, %126 : i32
    %c16_i32_44 = arith.constant 16 : i32
    %128 = arith.muli %arg1, %c16_i32_44 : i32
    %129 = arith.addi %128, %c2_i32_41 : i32
    %c2_i32_45 = arith.constant 2 : i32
    %130 = arith.muli %c2_i32_45, %129 : i32
    %c15_i32_46 = arith.constant 15 : i32
    %131 = arith.subi %c15_i32_46, %130 : i32
    %132 = arith.muli %arg0, %131 : i32
    %133 = arith.addi %129, %132 : i32
    %c0_47 = arith.constant 0 : index
    %134 = arith.index_cast %127 : i32 to index
    %c0_48 = arith.constant 0 : index
    %c0_49 = arith.constant 0 : index
    %135 = vector.load %arg3[%c0_47, %134, %c0_48, %c0_49] : memref<1x16x8x512xbf16, #tpu.memory_space<vmem>>, vector<1x1x8x512xbf16>
    %136 = vector.shape_cast %135 : vector<1x1x8x512xbf16> to vector<8x512xbf16>
    %137 = arith.extf %136 : vector<8x512xbf16> to vector<8x512xf32>
    %138 = vector.broadcast %6 : vector<1x512xf32> to vector<8x512xf32>
    %139 = arith.addf %137, %138 : vector<8x512xf32>
    %cst_50 = arith.constant dense<0.000000e+00> : vector<8x512xf32>
    %140 = tpu.matmul %122, %4, %cst_50 {dimension_numbers = #tpu.dot_dimension_numbers<[1], [0], [0], [1], [0, 0, 1, 1], [], []>} : vector<8x128xbf16>, vector<128x512xbf16>, vector<8x512xf32> -> vector<8x512xf32>
    %141 = arith.addf %139, %140 : vector<8x512xf32>
    %142 = vector.extract_strided_slice %141 {offsets = [0, 0], sizes = [8, 128], strides = [1, 1]} : vector<8x512xf32> to vector<8x128xf32>
    %143 = arith.negf %142 : vector<8x128xf32>
    %144 = math.exp %143 : vector<8x128xf32>
    %cst_51 = arith.constant 1.000000e+00 : f32
    %145 = vector.broadcast %cst_51 : f32 to vector<8x128xf32>
    %146 = arith.addf %145, %144 : vector<8x128xf32>
    %147 = arith.divf %145, %146 : vector<8x128xf32>
    %148 = vector.extract_strided_slice %141 {offsets = [0, 128], sizes = [8, 128], strides = [1, 1]} : vector<8x512xf32> to vector<8x128xf32>
    %149 = arith.negf %148 : vector<8x128xf32>
    %150 = math.exp %149 : vector<8x128xf32>
    %cst_52 = arith.constant 1.000000e+00 : f32
    %151 = vector.broadcast %cst_52 : f32 to vector<8x128xf32>
    %152 = arith.addf %151, %150 : vector<8x128xf32>
    %153 = arith.divf %151, %152 : vector<8x128xf32>
    %154 = vector.extract_strided_slice %141 {offsets = [0, 256], sizes = [8, 128], strides = [1, 1]} : vector<8x512xf32> to vector<8x128xf32>
    %155 = math.tanh %154 : vector<8x128xf32>
    %156 = vector.extract_strided_slice %141 {offsets = [0, 384], sizes = [8, 128], strides = [1, 1]} : vector<8x512xf32> to vector<8x128xf32>
    %157 = arith.negf %156 : vector<8x128xf32>
    %158 = math.exp %157 : vector<8x128xf32>
    %cst_53 = arith.constant 1.000000e+00 : f32
    %159 = vector.broadcast %cst_53 : f32 to vector<8x128xf32>
    %160 = arith.addf %159, %158 : vector<8x128xf32>
    %161 = arith.divf %159, %160 : vector<8x128xf32>
    %162 = arith.mulf %153, %123 : vector<8x128xf32>
    %163 = arith.mulf %147, %155 : vector<8x128xf32>
    %164 = arith.addf %162, %163 : vector<8x128xf32>
    %165 = math.tanh %164 : vector<8x128xf32>
    %166 = arith.mulf %161, %165 : vector<8x128xf32>
    %167 = arith.truncf %166 : vector<8x128xf32> to vector<8x128xbf16>
    %168 = vector.broadcast %133 : i32 to vector<8x128xi32>
    %169 = arith.cmpi sgt, %9, %168 : vector<8x128xi32>
    %cst_54 = arith.constant 0.000000e+00 : bf16
    %170 = vector.broadcast %cst_54 : bf16 to vector<8x128xbf16>
    %171 = arith.select %169, %167, %170 : vector<8x128xi1>, vector<8x128xbf16>
    %c0_55 = arith.constant 0 : index
    %172 = arith.index_cast %127 : i32 to index
    %c0_56 = arith.constant 0 : index
    %c0_57 = arith.constant 0 : index
    %173 = vector.load %arg6[%c0_55, %172, %c0_56, %c0_57] : memref<1x16x8x128xbf16, #tpu.memory_space<vmem>>, vector<1x1x8x128xbf16>
    %174 = vector.shape_cast %173 : vector<1x1x8x128xbf16> to vector<8x128xbf16>
    %175 = vector.shape_cast %171 : vector<8x128xbf16> to vector<1x1x8x128xbf16>
    tpu.vector_store %arg6[%c0_55, %172, %c0_56, %c0_57], %175 {strides = array<i32>} : memref<1x16x8x128xbf16, #tpu.memory_space<vmem>>, vector<1x1x8x128xbf16>,
    %176 = arith.select %169, %167, %122 : vector<8x128xi1>, vector<8x128xbf16>
    %177 = arith.select %169, %164, %123 : vector<8x128xi1>, vector<8x128xf32>
    %c3_i32 = arith.constant 3 : i32
    %c2_i32_58 = arith.constant 2 : i32
    %178 = arith.muli %c2_i32_58, %c3_i32 : i32
    %c15_i32_59 = arith.constant 15 : i32
    %179 = arith.subi %c15_i32_59, %178 : i32
    %180 = arith.muli %arg0, %179 : i32
    %181 = arith.addi %c3_i32, %180 : i32
    %c16_i32_60 = arith.constant 16 : i32
    %182 = arith.muli %arg1, %c16_i32_60 : i32
    %183 = arith.addi %182, %c3_i32 : i32
    %c2_i32_61 = arith.constant 2 : i32
    %184 = arith.muli %c2_i32_61, %183 : i32
    %c15_i32_62 = arith.constant 15 : i32
    %185 = arith.subi %c15_i32_62, %184 : i32
    %186 = arith.muli %arg0, %185 : i32
    %187 = arith.addi %183, %186 : i32
    %c0_63 = arith.constant 0 : index
    %188 = arith.index_cast %181 : i32 to index
    %c0_64 = arith.constant 0 : index
    %c0_65 = arith.constant 0 : index
    %189 = vector.load %arg3[%c0_63, %188, %c0_64, %c0_65] : memref<1x16x8x512xbf16, #tpu.memory_space<vmem>>, vector<1x1x8x512xbf16>
    %190 = vector.shape_cast %189 : vector<1x1x8x512xbf16> to vector<8x512xbf16>
    %191 = arith.extf %190 : vector<8x512xbf16> to vector<8x512xf32>
    %192 = vector.broadcast %6 : vector<1x512xf32> to vector<8x512xf32>
    %193 = arith.addf %191, %192 : vector<8x512xf32>
    %cst_66 = arith.constant dense<0.000000e+00> : vector<8x512xf32>
    %194 = tpu.matmul %176, %4, %cst_66 {dimension_numbers = #tpu.dot_dimension_numbers<[1], [0], [0], [1], [0, 0, 1, 1], [], []>} : vector<8x128xbf16>, vector<128x512xbf16>, vector<8x512xf32> -> vector<8x512xf32>
    %195 = arith.addf %193, %194 : vector<8x512xf32>
    %196 = vector.extract_strided_slice %195 {offsets = [0, 0], sizes = [8, 128], strides = [1, 1]} : vector<8x512xf32> to vector<8x128xf32>
    %197 = arith.negf %196 : vector<8x128xf32>
    %198 = math.exp %197 : vector<8x128xf32>
    %cst_67 = arith.constant 1.000000e+00 : f32
    %199 = vector.broadcast %cst_67 : f32 to vector<8x128xf32>
    %200 = arith.addf %199, %198 : vector<8x128xf32>
    %201 = arith.divf %199, %200 : vector<8x128xf32>
    %202 = vector.extract_strided_slice %195 {offsets = [0, 128], sizes = [8, 128], strides = [1, 1]} : vector<8x512xf32> to vector<8x128xf32>
    %203 = arith.negf %202 : vector<8x128xf32>
    %204 = math.exp %203 : vector<8x128xf32>
    %cst_68 = arith.constant 1.000000e+00 : f32
    %205 = vector.broadcast %cst_68 : f32 to vector<8x128xf32>
    %206 = arith.addf %205, %204 : vector<8x128xf32>
    %207 = arith.divf %205, %206 : vector<8x128xf32>
    %208 = vector.extract_strided_slice %195 {offsets = [0, 256], sizes = [8, 128], strides = [1, 1]} : vector<8x512xf32> to vector<8x128xf32>
    %209 = math.tanh %208 : vector<8x128xf32>
    %210 = vector.extract_strided_slice %195 {offsets = [0, 384], sizes = [8, 128], strides = [1, 1]} : vector<8x512xf32> to vector<8x128xf32>
    %211 = arith.negf %210 : vector<8x128xf32>
    %212 = math.exp %211 : vector<8x128xf32>
    %cst_69 = arith.constant 1.000000e+00 : f32
    %213 = vector.broadcast %cst_69 : f32 to vector<8x128xf32>
    %214 = arith.addf %213, %212 : vector<8x128xf32>
    %215 = arith.divf %213, %214 : vector<8x128xf32>
    %216 = arith.mulf %207, %177 : vector<8x128xf32>
    %217 = arith.mulf %201, %209 : vector<8x128xf32>
    %218 = arith.addf %216, %217 : vector<8x128xf32>
    %219 = math.tanh %218 : vector<8x128xf32>
    %220 = arith.mulf %215, %219 : vector<8x128xf32>
    %221 = arith.truncf %220 : vector<8x128xf32> to vector<8x128xbf16>
    %222 = vector.broadcast %187 : i32 to vector<8x128xi32>
    %223 = arith.cmpi sgt, %9, %222 : vector<8x128xi32>
    %cst_70 = arith.constant 0.000000e+00 : bf16
    %224 = vector.broadcast %cst_70 : bf16 to vector<8x128xbf16>
    %225 = arith.select %223, %221, %224 : vector<8x128xi1>, vector<8x128xbf16>
    %c0_71 = arith.constant 0 : index
    %226 = arith.index_cast %181 : i32 to index
    %c0_72 = arith.constant 0 : index
    %c0_73 = arith.constant 0 : index
    %227 = vector.load %arg6[%c0_71, %226, %c0_72, %c0_73] : memref<1x16x8x128xbf16, #tpu.memory_space<vmem>>, vector<1x1x8x128xbf16>
    %228 = vector.shape_cast %227 : vector<1x1x8x128xbf16> to vector<8x128xbf16>
    %229 = vector.shape_cast %225 : vector<8x128xbf16> to vector<1x1x8x128xbf16>
    tpu.vector_store %arg6[%c0_71, %226, %c0_72, %c0_73], %229 {strides = array<i32>} : memref<1x16x8x128xbf16, #tpu.memory_space<vmem>>, vector<1x1x8x128xbf16>,
    %230 = arith.select %223, %221, %176 : vector<8x128xi1>, vector<8x128xbf16>
    %231 = arith.select %223, %218, %177 : vector<8x128xi1>, vector<8x128xf32>
    %c4_i32 = arith.constant 4 : i32
    %c2_i32_74 = arith.constant 2 : i32
    %232 = arith.muli %c2_i32_74, %c4_i32 : i32
    %c15_i32_75 = arith.constant 15 : i32
    %233 = arith.subi %c15_i32_75, %232 : i32
    %234 = arith.muli %arg0, %233 : i32
    %235 = arith.addi %c4_i32, %234 : i32
    %c16_i32_76 = arith.constant 16 : i32
    %236 = arith.muli %arg1, %c16_i32_76 : i32
    %237 = arith.addi %236, %c4_i32 : i32
    %c2_i32_77 = arith.constant 2 : i32
    %238 = arith.muli %c2_i32_77, %237 : i32
    %c15_i32_78 = arith.constant 15 : i32
    %239 = arith.subi %c15_i32_78, %238 : i32
    %240 = arith.muli %arg0, %239 : i32
    %241 = arith.addi %237, %240 : i32
    %c0_79 = arith.constant 0 : index
    %242 = arith.index_cast %235 : i32 to index
    %c0_80 = arith.constant 0 : index
    %c0_81 = arith.constant 0 : index
    %243 = vector.load %arg3[%c0_79, %242, %c0_80, %c0_81] : memref<1x16x8x512xbf16, #tpu.memory_space<vmem>>, vector<1x1x8x512xbf16>
    %244 = vector.shape_cast %243 : vector<1x1x8x512xbf16> to vector<8x512xbf16>
    %245 = arith.extf %244 : vector<8x512xbf16> to vector<8x512xf32>
    %246 = vector.broadcast %6 : vector<1x512xf32> to vector<8x512xf32>
    %247 = arith.addf %245, %246 : vector<8x512xf32>
    %cst_82 = arith.constant dense<0.000000e+00> : vector<8x512xf32>
    %248 = tpu.matmul %230, %4, %cst_82 {dimension_numbers = #tpu.dot_dimension_numbers<[1], [0], [0], [1], [0, 0, 1, 1], [], []>} : vector<8x128xbf16>, vector<128x512xbf16>, vector<8x512xf32> -> vector<8x512xf32>
    %249 = arith.addf %247, %248 : vector<8x512xf32>
    %250 = vector.extract_strided_slice %249 {offsets = [0, 0], sizes = [8, 128], strides = [1, 1]} : vector<8x512xf32> to vector<8x128xf32>
    %251 = arith.negf %250 : vector<8x128xf32>
    %252 = math.exp %251 : vector<8x128xf32>
    %cst_83 = arith.constant 1.000000e+00 : f32
    %253 = vector.broadcast %cst_83 : f32 to vector<8x128xf32>
    %254 = arith.addf %253, %252 : vector<8x128xf32>
    %255 = arith.divf %253, %254 : vector<8x128xf32>
    %256 = vector.extract_strided_slice %249 {offsets = [0, 128], sizes = [8, 128], strides = [1, 1]} : vector<8x512xf32> to vector<8x128xf32>
    %257 = arith.negf %256 : vector<8x128xf32>
    %258 = math.exp %257 : vector<8x128xf32>
    %cst_84 = arith.constant 1.000000e+00 : f32
    %259 = vector.broadcast %cst_84 : f32 to vector<8x128xf32>
    %260 = arith.addf %259, %258 : vector<8x128xf32>
    %261 = arith.divf %259, %260 : vector<8x128xf32>
    %262 = vector.extract_strided_slice %249 {offsets = [0, 256], sizes = [8, 128], strides = [1, 1]} : vector<8x512xf32> to vector<8x128xf32>
    %263 = math.tanh %262 : vector<8x128xf32>
    %264 = vector.extract_strided_slice %249 {offsets = [0, 384], sizes = [8, 128], strides = [1, 1]} : vector<8x512xf32> to vector<8x128xf32>
    %265 = arith.negf %264 : vector<8x128xf32>
    %266 = math.exp %265 : vector<8x128xf32>
    %cst_85 = arith.constant 1.000000e+00 : f32
    %267 = vector.broadcast %cst_85 : f32 to vector<8x128xf32>
    %268 = arith.addf %267, %266 : vector<8x128xf32>
    %269 = arith.divf %267, %268 : vector<8x128xf32>
    %270 = arith.mulf %261, %231 : vector<8x128xf32>
    %271 = arith.mulf %255, %263 : vector<8x128xf32>
    %272 = arith.addf %270, %271 : vector<8x128xf32>
    %273 = math.tanh %272 : vector<8x128xf32>
    %274 = arith.mulf %269, %273 : vector<8x128xf32>
    %275 = arith.truncf %274 : vector<8x128xf32> to vector<8x128xbf16>
    %276 = vector.broadcast %241 : i32 to vector<8x128xi32>
    %277 = arith.cmpi sgt, %9, %276 : vector<8x128xi32>
    %cst_86 = arith.constant 0.000000e+00 : bf16
    %278 = vector.broadcast %cst_86 : bf16 to vector<8x128xbf16>
    %279 = arith.select %277, %275, %278 : vector<8x128xi1>, vector<8x128xbf16>
    %c0_87 = arith.constant 0 : index
    %280 = arith.index_cast %235 : i32 to index
    %c0_88 = arith.constant 0 : index
    %c0_89 = arith.constant 0 : index
    %281 = vector.load %arg6[%c0_87, %280, %c0_88, %c0_89] : memref<1x16x8x128xbf16, #tpu.memory_space<vmem>>, vector<1x1x8x128xbf16>
    %282 = vector.shape_cast %281 : vector<1x1x8x128xbf16> to vector<8x128xbf16>
    %283 = vector.shape_cast %279 : vector<8x128xbf16> to vector<1x1x8x128xbf16>
    tpu.vector_store %arg6[%c0_87, %280, %c0_88, %c0_89], %283 {strides = array<i32>} : memref<1x16x8x128xbf16, #tpu.memory_space<vmem>>, vector<1x1x8x128xbf16>,
    %284 = arith.select %277, %275, %230 : vector<8x128xi1>, vector<8x128xbf16>
    %285 = arith.select %277, %272, %231 : vector<8x128xi1>, vector<8x128xf32>
    %c5_i32 = arith.constant 5 : i32
    %c2_i32_90 = arith.constant 2 : i32
    %286 = arith.muli %c2_i32_90, %c5_i32 : i32
    %c15_i32_91 = arith.constant 15 : i32
    %287 = arith.subi %c15_i32_91, %286 : i32
    %288 = arith.muli %arg0, %287 : i32
    %289 = arith.addi %c5_i32, %288 : i32
    %c16_i32_92 = arith.constant 16 : i32
    %290 = arith.muli %arg1, %c16_i32_92 : i32
    %291 = arith.addi %290, %c5_i32 : i32
    %c2_i32_93 = arith.constant 2 : i32
    %292 = arith.muli %c2_i32_93, %291 : i32
    %c15_i32_94 = arith.constant 15 : i32
    %293 = arith.subi %c15_i32_94, %292 : i32
    %294 = arith.muli %arg0, %293 : i32
    %295 = arith.addi %291, %294 : i32
    %c0_95 = arith.constant 0 : index
    %296 = arith.index_cast %289 : i32 to index
    %c0_96 = arith.constant 0 : index
    %c0_97 = arith.constant 0 : index
    %297 = vector.load %arg3[%c0_95, %296, %c0_96, %c0_97] : memref<1x16x8x512xbf16, #tpu.memory_space<vmem>>, vector<1x1x8x512xbf16>
    %298 = vector.shape_cast %297 : vector<1x1x8x512xbf16> to vector<8x512xbf16>
    %299 = arith.extf %298 : vector<8x512xbf16> to vector<8x512xf32>
    %300 = vector.broadcast %6 : vector<1x512xf32> to vector<8x512xf32>
    %301 = arith.addf %299, %300 : vector<8x512xf32>
    %cst_98 = arith.constant dense<0.000000e+00> : vector<8x512xf32>
    %302 = tpu.matmul %284, %4, %cst_98 {dimension_numbers = #tpu.dot_dimension_numbers<[1], [0], [0], [1], [0, 0, 1, 1], [], []>} : vector<8x128xbf16>, vector<128x512xbf16>, vector<8x512xf32> -> vector<8x512xf32>
    %303 = arith.addf %301, %302 : vector<8x512xf32>
    %304 = vector.extract_strided_slice %303 {offsets = [0, 0], sizes = [8, 128], strides = [1, 1]} : vector<8x512xf32> to vector<8x128xf32>
    %305 = arith.negf %304 : vector<8x128xf32>
    %306 = math.exp %305 : vector<8x128xf32>
    %cst_99 = arith.constant 1.000000e+00 : f32
    %307 = vector.broadcast %cst_99 : f32 to vector<8x128xf32>
    %308 = arith.addf %307, %306 : vector<8x128xf32>
    %309 = arith.divf %307, %308 : vector<8x128xf32>
    %310 = vector.extract_strided_slice %303 {offsets = [0, 128], sizes = [8, 128], strides = [1, 1]} : vector<8x512xf32> to vector<8x128xf32>
    %311 = arith.negf %310 : vector<8x128xf32>
    %312 = math.exp %311 : vector<8x128xf32>
    %cst_100 = arith.constant 1.000000e+00 : f32
    %313 = vector.broadcast %cst_100 : f32 to vector<8x128xf32>
    %314 = arith.addf %313, %312 : vector<8x128xf32>
    %315 = arith.divf %313, %314 : vector<8x128xf32>
    %316 = vector.extract_strided_slice %303 {offsets = [0, 256], sizes = [8, 128], strides = [1, 1]} : vector<8x512xf32> to vector<8x128xf32>
    %317 = math.tanh %316 : vector<8x128xf32>
    %318 = vector.extract_strided_slice %303 {offsets = [0, 384], sizes = [8, 128], strides = [1, 1]} : vector<8x512xf32> to vector<8x128xf32>
    %319 = arith.negf %318 : vector<8x128xf32>
    %320 = math.exp %319 : vector<8x128xf32>
    %cst_101 = arith.constant 1.000000e+00 : f32
    %321 = vector.broadcast %cst_101 : f32 to vector<8x128xf32>
    %322 = arith.addf %321, %320 : vector<8x128xf32>
    %323 = arith.divf %321, %322 : vector<8x128xf32>
    %324 = arith.mulf %315, %285 : vector<8x128xf32>
    %325 = arith.mulf %309, %317 : vector<8x128xf32>
    %326 = arith.addf %324, %325 : vector<8x128xf32>
    %327 = math.tanh %326 : vector<8x128xf32>
    %328 = arith.mulf %323, %327 : vector<8x128xf32>
    %329 = arith.truncf %328 : vector<8x128xf32> to vector<8x128xbf16>
    %330 = vector.broadcast %295 : i32 to vector<8x128xi32>
    %331 = arith.cmpi sgt, %9, %330 : vector<8x128xi32>
    %cst_102 = arith.constant 0.000000e+00 : bf16
    %332 = vector.broadcast %cst_102 : bf16 to vector<8x128xbf16>
    %333 = arith.select %331, %329, %332 : vector<8x128xi1>, vector<8x128xbf16>
    %c0_103 = arith.constant 0 : index
    %334 = arith.index_cast %289 : i32 to index
    %c0_104 = arith.constant 0 : index
    %c0_105 = arith.constant 0 : index
    %335 = vector.load %arg6[%c0_103, %334, %c0_104, %c0_105] : memref<1x16x8x128xbf16, #tpu.memory_space<vmem>>, vector<1x1x8x128xbf16>
    %336 = vector.shape_cast %335 : vector<1x1x8x128xbf16> to vector<8x128xbf16>
    %337 = vector.shape_cast %333 : vector<8x128xbf16> to vector<1x1x8x128xbf16>
    tpu.vector_store %arg6[%c0_103, %334, %c0_104, %c0_105], %337 {strides = array<i32>} : memref<1x16x8x128xbf16, #tpu.memory_space<vmem>>, vector<1x1x8x128xbf16>,
    %338 = arith.select %331, %329, %284 : vector<8x128xi1>, vector<8x128xbf16>
    %339 = arith.select %331, %326, %285 : vector<8x128xi1>, vector<8x128xf32>
    %c6_i32 = arith.constant 6 : i32
    %c2_i32_106 = arith.constant 2 : i32
    %340 = arith.muli %c2_i32_106, %c6_i32 : i32
    %c15_i32_107 = arith.constant 15 : i32
    %341 = arith.subi %c15_i32_107, %340 : i32
    %342 = arith.muli %arg0, %341 : i32
    %343 = arith.addi %c6_i32, %342 : i32
    %c16_i32_108 = arith.constant 16 : i32
    %344 = arith.muli %arg1, %c16_i32_108 : i32
    %345 = arith.addi %344, %c6_i32 : i32
    %c2_i32_109 = arith.constant 2 : i32
    %346 = arith.muli %c2_i32_109, %345 : i32
    %c15_i32_110 = arith.constant 15 : i32
    %347 = arith.subi %c15_i32_110, %346 : i32
    %348 = arith.muli %arg0, %347 : i32
    %349 = arith.addi %345, %348 : i32
    %c0_111 = arith.constant 0 : index
    %350 = arith.index_cast %343 : i32 to index
    %c0_112 = arith.constant 0 : index
    %c0_113 = arith.constant 0 : index
    %351 = vector.load %arg3[%c0_111, %350, %c0_112, %c0_113] : memref<1x16x8x512xbf16, #tpu.memory_space<vmem>>, vector<1x1x8x512xbf16>
    %352 = vector.shape_cast %351 : vector<1x1x8x512xbf16> to vector<8x512xbf16>
    %353 = arith.extf %352 : vector<8x512xbf16> to vector<8x512xf32>
    %354 = vector.broadcast %6 : vector<1x512xf32> to vector<8x512xf32>
    %355 = arith.addf %353, %354 : vector<8x512xf32>
    %cst_114 = arith.constant dense<0.000000e+00> : vector<8x512xf32>
    %356 = tpu.matmul %338, %4, %cst_114 {dimension_numbers = #tpu.dot_dimension_numbers<[1], [0], [0], [1], [0, 0, 1, 1], [], []>} : vector<8x128xbf16>, vector<128x512xbf16>, vector<8x512xf32> -> vector<8x512xf32>
    %357 = arith.addf %355, %356 : vector<8x512xf32>
    %358 = vector.extract_strided_slice %357 {offsets = [0, 0], sizes = [8, 128], strides = [1, 1]} : vector<8x512xf32> to vector<8x128xf32>
    %359 = arith.negf %358 : vector<8x128xf32>
    %360 = math.exp %359 : vector<8x128xf32>
    %cst_115 = arith.constant 1.000000e+00 : f32
    %361 = vector.broadcast %cst_115 : f32 to vector<8x128xf32>
    %362 = arith.addf %361, %360 : vector<8x128xf32>
    %363 = arith.divf %361, %362 : vector<8x128xf32>
    %364 = vector.extract_strided_slice %357 {offsets = [0, 128], sizes = [8, 128], strides = [1, 1]} : vector<8x512xf32> to vector<8x128xf32>
    %365 = arith.negf %364 : vector<8x128xf32>
    %366 = math.exp %365 : vector<8x128xf32>
    %cst_116 = arith.constant 1.000000e+00 : f32
    %367 = vector.broadcast %cst_116 : f32 to vector<8x128xf32>
    %368 = arith.addf %367, %366 : vector<8x128xf32>
    %369 = arith.divf %367, %368 : vector<8x128xf32>
    %370 = vector.extract_strided_slice %357 {offsets = [0, 256], sizes = [8, 128], strides = [1, 1]} : vector<8x512xf32> to vector<8x128xf32>
    %371 = math.tanh %370 : vector<8x128xf32>
    %372 = vector.extract_strided_slice %357 {offsets = [0, 384], sizes = [8, 128], strides = [1, 1]} : vector<8x512xf32> to vector<8x128xf32>
    %373 = arith.negf %372 : vector<8x128xf32>
    %374 = math.exp %373 : vector<8x128xf32>
    %cst_117 = arith.constant 1.000000e+00 : f32
    %375 = vector.broadcast %cst_117 : f32 to vector<8x128xf32>
    %376 = arith.addf %375, %374 : vector<8x128xf32>
    %377 = arith.divf %375, %376 : vector<8x128xf32>
    %378 = arith.mulf %369, %339 : vector<8x128xf32>
    %379 = arith.mulf %363, %371 : vector<8x128xf32>
    %380 = arith.addf %378, %379 : vector<8x128xf32>
    %381 = math.tanh %380 : vector<8x128xf32>
    %382 = arith.mulf %377, %381 : vector<8x128xf32>
    %383 = arith.truncf %382 : vector<8x128xf32> to vector<8x128xbf16>
    %384 = vector.broadcast %349 : i32 to vector<8x128xi32>
    %385 = arith.cmpi sgt, %9, %384 : vector<8x128xi32>
    %cst_118 = arith.constant 0.000000e+00 : bf16
    %386 = vector.broadcast %cst_118 : bf16 to vector<8x128xbf16>
    %387 = arith.select %385, %383, %386 : vector<8x128xi1>, vector<8x128xbf16>
    %c0_119 = arith.constant 0 : index
    %388 = arith.index_cast %343 : i32 to index
    %c0_120 = arith.constant 0 : index
    %c0_121 = arith.constant 0 : index
    %389 = vector.load %arg6[%c0_119, %388, %c0_120, %c0_121] : memref<1x16x8x128xbf16, #tpu.memory_space<vmem>>, vector<1x1x8x128xbf16>
    %390 = vector.shape_cast %389 : vector<1x1x8x128xbf16> to vector<8x128xbf16>
    %391 = vector.shape_cast %387 : vector<8x128xbf16> to vector<1x1x8x128xbf16>
    tpu.vector_store %arg6[%c0_119, %388, %c0_120, %c0_121], %391 {strides = array<i32>} : memref<1x16x8x128xbf16, #tpu.memory_space<vmem>>, vector<1x1x8x128xbf16>,
    %392 = arith.select %385, %383, %338 : vector<8x128xi1>, vector<8x128xbf16>
    %393 = arith.select %385, %380, %339 : vector<8x128xi1>, vector<8x128xf32>
    %c7_i32 = arith.constant 7 : i32
    %c2_i32_122 = arith.constant 2 : i32
    %394 = arith.muli %c2_i32_122, %c7_i32 : i32
    %c15_i32_123 = arith.constant 15 : i32
    %395 = arith.subi %c15_i32_123, %394 : i32
    %396 = arith.muli %arg0, %395 : i32
    %397 = arith.addi %c7_i32, %396 : i32
    %c16_i32_124 = arith.constant 16 : i32
    %398 = arith.muli %arg1, %c16_i32_124 : i32
    %399 = arith.addi %398, %c7_i32 : i32
    %c2_i32_125 = arith.constant 2 : i32
    %400 = arith.muli %c2_i32_125, %399 : i32
    %c15_i32_126 = arith.constant 15 : i32
    %401 = arith.subi %c15_i32_126, %400 : i32
    %402 = arith.muli %arg0, %401 : i32
    %403 = arith.addi %399, %402 : i32
    %c0_127 = arith.constant 0 : index
    %404 = arith.index_cast %397 : i32 to index
    %c0_128 = arith.constant 0 : index
    %c0_129 = arith.constant 0 : index
    %405 = vector.load %arg3[%c0_127, %404, %c0_128, %c0_129] : memref<1x16x8x512xbf16, #tpu.memory_space<vmem>>, vector<1x1x8x512xbf16>
    %406 = vector.shape_cast %405 : vector<1x1x8x512xbf16> to vector<8x512xbf16>
    %407 = arith.extf %406 : vector<8x512xbf16> to vector<8x512xf32>
    %408 = vector.broadcast %6 : vector<1x512xf32> to vector<8x512xf32>
    %409 = arith.addf %407, %408 : vector<8x512xf32>
    %cst_130 = arith.constant dense<0.000000e+00> : vector<8x512xf32>
    %410 = tpu.matmul %392, %4, %cst_130 {dimension_numbers = #tpu.dot_dimension_numbers<[1], [0], [0], [1], [0, 0, 1, 1], [], []>} : vector<8x128xbf16>, vector<128x512xbf16>, vector<8x512xf32> -> vector<8x512xf32>
    %411 = arith.addf %409, %410 : vector<8x512xf32>
    %412 = vector.extract_strided_slice %411 {offsets = [0, 0], sizes = [8, 128], strides = [1, 1]} : vector<8x512xf32> to vector<8x128xf32>
    %413 = arith.negf %412 : vector<8x128xf32>
    %414 = math.exp %413 : vector<8x128xf32>
    %cst_131 = arith.constant 1.000000e+00 : f32
    %415 = vector.broadcast %cst_131 : f32 to vector<8x128xf32>
    %416 = arith.addf %415, %414 : vector<8x128xf32>
    %417 = arith.divf %415, %416 : vector<8x128xf32>
    %418 = vector.extract_strided_slice %411 {offsets = [0, 128], sizes = [8, 128], strides = [1, 1]} : vector<8x512xf32> to vector<8x128xf32>
    %419 = arith.negf %418 : vector<8x128xf32>
    %420 = math.exp %419 : vector<8x128xf32>
    %cst_132 = arith.constant 1.000000e+00 : f32
    %421 = vector.broadcast %cst_132 : f32 to vector<8x128xf32>
    %422 = arith.addf %421, %420 : vector<8x128xf32>
    %423 = arith.divf %421, %422 : vector<8x128xf32>
    %424 = vector.extract_strided_slice %411 {offsets = [0, 256], sizes = [8, 128], strides = [1, 1]} : vector<8x512xf32> to vector<8x128xf32>
    %425 = math.tanh %424 : vector<8x128xf32>
    %426 = vector.extract_strided_slice %411 {offsets = [0, 384], sizes = [8, 128], strides = [1, 1]} : vector<8x512xf32> to vector<8x128xf32>
    %427 = arith.negf %426 : vector<8x128xf32>
    %428 = math.exp %427 : vector<8x128xf32>
    %cst_133 = arith.constant 1.000000e+00 : f32
    %429 = vector.broadcast %cst_133 : f32 to vector<8x128xf32>
    %430 = arith.addf %429, %428 : vector<8x128xf32>
    %431 = arith.divf %429, %430 : vector<8x128xf32>
    %432 = arith.mulf %423, %393 : vector<8x128xf32>
    %433 = arith.mulf %417, %425 : vector<8x128xf32>
    %434 = arith.addf %432, %433 : vector<8x128xf32>
    %435 = math.tanh %434 : vector<8x128xf32>
    %436 = arith.mulf %431, %435 : vector<8x128xf32>
    %437 = arith.truncf %436 : vector<8x128xf32> to vector<8x128xbf16>
    %438 = vector.broadcast %403 : i32 to vector<8x128xi32>
    %439 = arith.cmpi sgt, %9, %438 : vector<8x128xi32>
    %cst_134 = arith.constant 0.000000e+00 : bf16
    %440 = vector.broadcast %cst_134 : bf16 to vector<8x128xbf16>
    %441 = arith.select %439, %437, %440 : vector<8x128xi1>, vector<8x128xbf16>
    %c0_135 = arith.constant 0 : index
    %442 = arith.index_cast %397 : i32 to index
    %c0_136 = arith.constant 0 : index
    %c0_137 = arith.constant 0 : index
    %443 = vector.load %arg6[%c0_135, %442, %c0_136, %c0_137] : memref<1x16x8x128xbf16, #tpu.memory_space<vmem>>, vector<1x1x8x128xbf16>
    %444 = vector.shape_cast %443 : vector<1x1x8x128xbf16> to vector<8x128xbf16>
    %445 = vector.shape_cast %441 : vector<8x128xbf16> to vector<1x1x8x128xbf16>
    tpu.vector_store %arg6[%c0_135, %442, %c0_136, %c0_137], %445 {strides = array<i32>} : memref<1x16x8x128xbf16, #tpu.memory_space<vmem>>, vector<1x1x8x128xbf16>,
    %446 = arith.select %439, %437, %392 : vector<8x128xi1>, vector<8x128xbf16>
    %447 = arith.select %439, %434, %393 : vector<8x128xi1>, vector<8x128xf32>
    %c8_i32 = arith.constant 8 : i32
    %c2_i32_138 = arith.constant 2 : i32
    %448 = arith.muli %c2_i32_138, %c8_i32 : i32
    %c15_i32_139 = arith.constant 15 : i32
    %449 = arith.subi %c15_i32_139, %448 : i32
    %450 = arith.muli %arg0, %449 : i32
    %451 = arith.addi %c8_i32, %450 : i32
    %c16_i32_140 = arith.constant 16 : i32
    %452 = arith.muli %arg1, %c16_i32_140 : i32
    %453 = arith.addi %452, %c8_i32 : i32
    %c2_i32_141 = arith.constant 2 : i32
    %454 = arith.muli %c2_i32_141, %453 : i32
    %c15_i32_142 = arith.constant 15 : i32
    %455 = arith.subi %c15_i32_142, %454 : i32
    %456 = arith.muli %arg0, %455 : i32
    %457 = arith.addi %453, %456 : i32
    %c0_143 = arith.constant 0 : index
    %458 = arith.index_cast %451 : i32 to index
    %c0_144 = arith.constant 0 : index
    %c0_145 = arith.constant 0 : index
    %459 = vector.load %arg3[%c0_143, %458, %c0_144, %c0_145] : memref<1x16x8x512xbf16, #tpu.memory_space<vmem>>, vector<1x1x8x512xbf16>
    %460 = vector.shape_cast %459 : vector<1x1x8x512xbf16> to vector<8x512xbf16>
    %461 = arith.extf %460 : vector<8x512xbf16> to vector<8x512xf32>
    %462 = vector.broadcast %6 : vector<1x512xf32> to vector<8x512xf32>
    %463 = arith.addf %461, %462 : vector<8x512xf32>
    %cst_146 = arith.constant dense<0.000000e+00> : vector<8x512xf32>
    %464 = tpu.matmul %446, %4, %cst_146 {dimension_numbers = #tpu.dot_dimension_numbers<[1], [0], [0], [1], [0, 0, 1, 1], [], []>} : vector<8x128xbf16>, vector<128x512xbf16>, vector<8x512xf32> -> vector<8x512xf32>
    %465 = arith.addf %463, %464 : vector<8x512xf32>
    %466 = vector.extract_strided_slice %465 {offsets = [0, 0], sizes = [8, 128], strides = [1, 1]} : vector<8x512xf32> to vector<8x128xf32>
    %467 = arith.negf %466 : vector<8x128xf32>
    %468 = math.exp %467 : vector<8x128xf32>
    %cst_147 = arith.constant 1.000000e+00 : f32
    %469 = vector.broadcast %cst_147 : f32 to vector<8x128xf32>
    %470 = arith.addf %469, %468 : vector<8x128xf32>
    %471 = arith.divf %469, %470 : vector<8x128xf32>
    %472 = vector.extract_strided_slice %465 {offsets = [0, 128], sizes = [8, 128], strides = [1, 1]} : vector<8x512xf32> to vector<8x128xf32>
    %473 = arith.negf %472 : vector<8x128xf32>
    %474 = math.exp %473 : vector<8x128xf32>
    %cst_148 = arith.constant 1.000000e+00 : f32
    %475 = vector.broadcast %cst_148 : f32 to vector<8x128xf32>
    %476 = arith.addf %475, %474 : vector<8x128xf32>
    %477 = arith.divf %475, %476 : vector<8x128xf32>
    %478 = vector.extract_strided_slice %465 {offsets = [0, 256], sizes = [8, 128], strides = [1, 1]} : vector<8x512xf32> to vector<8x128xf32>
    %479 = math.tanh %478 : vector<8x128xf32>
    %480 = vector.extract_strided_slice %465 {offsets = [0, 384], sizes = [8, 128], strides = [1, 1]} : vector<8x512xf32> to vector<8x128xf32>
    %481 = arith.negf %480 : vector<8x128xf32>
    %482 = math.exp %481 : vector<8x128xf32>
    %cst_149 = arith.constant 1.000000e+00 : f32
    %483 = vector.broadcast %cst_149 : f32 to vector<8x128xf32>
    %484 = arith.addf %483, %482 : vector<8x128xf32>
    %485 = arith.divf %483, %484 : vector<8x128xf32>
    %486 = arith.mulf %477, %447 : vector<8x128xf32>
    %487 = arith.mulf %471, %479 : vector<8x128xf32>
    %488 = arith.addf %486, %487 : vector<8x128xf32>
    %489 = math.tanh %488 : vector<8x128xf32>
    %490 = arith.mulf %485, %489 : vector<8x128xf32>
    %491 = arith.truncf %490 : vector<8x128xf32> to vector<8x128xbf16>
    %492 = vector.broadcast %457 : i32 to vector<8x128xi32>
    %493 = arith.cmpi sgt, %9, %492 : vector<8x128xi32>
    %cst_150 = arith.constant 0.000000e+00 : bf16
    %494 = vector.broadcast %cst_150 : bf16 to vector<8x128xbf16>
    %495 = arith.select %493, %491, %494 : vector<8x128xi1>, vector<8x128xbf16>
    %c0_151 = arith.constant 0 : index
    %496 = arith.index_cast %451 : i32 to index
    %c0_152 = arith.constant 0 : index
    %c0_153 = arith.constant 0 : index
    %497 = vector.load %arg6[%c0_151, %496, %c0_152, %c0_153] : memref<1x16x8x128xbf16, #tpu.memory_space<vmem>>, vector<1x1x8x128xbf16>
    %498 = vector.shape_cast %497 : vector<1x1x8x128xbf16> to vector<8x128xbf16>
    %499 = vector.shape_cast %495 : vector<8x128xbf16> to vector<1x1x8x128xbf16>
    tpu.vector_store %arg6[%c0_151, %496, %c0_152, %c0_153], %499 {strides = array<i32>} : memref<1x16x8x128xbf16, #tpu.memory_space<vmem>>, vector<1x1x8x128xbf16>,
    %500 = arith.select %493, %491, %446 : vector<8x128xi1>, vector<8x128xbf16>
    %501 = arith.select %493, %488, %447 : vector<8x128xi1>, vector<8x128xf32>
    %c9_i32 = arith.constant 9 : i32
    %c2_i32_154 = arith.constant 2 : i32
    %502 = arith.muli %c2_i32_154, %c9_i32 : i32
    %c15_i32_155 = arith.constant 15 : i32
    %503 = arith.subi %c15_i32_155, %502 : i32
    %504 = arith.muli %arg0, %503 : i32
    %505 = arith.addi %c9_i32, %504 : i32
    %c16_i32_156 = arith.constant 16 : i32
    %506 = arith.muli %arg1, %c16_i32_156 : i32
    %507 = arith.addi %506, %c9_i32 : i32
    %c2_i32_157 = arith.constant 2 : i32
    %508 = arith.muli %c2_i32_157, %507 : i32
    %c15_i32_158 = arith.constant 15 : i32
    %509 = arith.subi %c15_i32_158, %508 : i32
    %510 = arith.muli %arg0, %509 : i32
    %511 = arith.addi %507, %510 : i32
    %c0_159 = arith.constant 0 : index
    %512 = arith.index_cast %505 : i32 to index
    %c0_160 = arith.constant 0 : index
    %c0_161 = arith.constant 0 : index
    %513 = vector.load %arg3[%c0_159, %512, %c0_160, %c0_161] : memref<1x16x8x512xbf16, #tpu.memory_space<vmem>>, vector<1x1x8x512xbf16>
    %514 = vector.shape_cast %513 : vector<1x1x8x512xbf16> to vector<8x512xbf16>
    %515 = arith.extf %514 : vector<8x512xbf16> to vector<8x512xf32>
    %516 = vector.broadcast %6 : vector<1x512xf32> to vector<8x512xf32>
    %517 = arith.addf %515, %516 : vector<8x512xf32>
    %cst_162 = arith.constant dense<0.000000e+00> : vector<8x512xf32>
    %518 = tpu.matmul %500, %4, %cst_162 {dimension_numbers = #tpu.dot_dimension_numbers<[1], [0], [0], [1], [0, 0, 1, 1], [], []>} : vector<8x128xbf16>, vector<128x512xbf16>, vector<8x512xf32> -> vector<8x512xf32>
    %519 = arith.addf %517, %518 : vector<8x512xf32>
    %520 = vector.extract_strided_slice %519 {offsets = [0, 0], sizes = [8, 128], strides = [1, 1]} : vector<8x512xf32> to vector<8x128xf32>
    %521 = arith.negf %520 : vector<8x128xf32>
    %522 = math.exp %521 : vector<8x128xf32>
    %cst_163 = arith.constant 1.000000e+00 : f32
    %523 = vector.broadcast %cst_163 : f32 to vector<8x128xf32>
    %524 = arith.addf %523, %522 : vector<8x128xf32>
    %525 = arith.divf %523, %524 : vector<8x128xf32>
    %526 = vector.extract_strided_slice %519 {offsets = [0, 128], sizes = [8, 128], strides = [1, 1]} : vector<8x512xf32> to vector<8x128xf32>
    %527 = arith.negf %526 : vector<8x128xf32>
    %528 = math.exp %527 : vector<8x128xf32>
    %cst_164 = arith.constant 1.000000e+00 : f32
    %529 = vector.broadcast %cst_164 : f32 to vector<8x128xf32>
    %530 = arith.addf %529, %528 : vector<8x128xf32>
    %531 = arith.divf %529, %530 : vector<8x128xf32>
    %532 = vector.extract_strided_slice %519 {offsets = [0, 256], sizes = [8, 128], strides = [1, 1]} : vector<8x512xf32> to vector<8x128xf32>
    %533 = math.tanh %532 : vector<8x128xf32>
    %534 = vector.extract_strided_slice %519 {offsets = [0, 384], sizes = [8, 128], strides = [1, 1]} : vector<8x512xf32> to vector<8x128xf32>
    %535 = arith.negf %534 : vector<8x128xf32>
    %536 = math.exp %535 : vector<8x128xf32>
    %cst_165 = arith.constant 1.000000e+00 : f32
    %537 = vector.broadcast %cst_165 : f32 to vector<8x128xf32>
    %538 = arith.addf %537, %536 : vector<8x128xf32>
    %539 = arith.divf %537, %538 : vector<8x128xf32>
    %540 = arith.mulf %531, %501 : vector<8x128xf32>
    %541 = arith.mulf %525, %533 : vector<8x128xf32>
    %542 = arith.addf %540, %541 : vector<8x128xf32>
    %543 = math.tanh %542 : vector<8x128xf32>
    %544 = arith.mulf %539, %543 : vector<8x128xf32>
    %545 = arith.truncf %544 : vector<8x128xf32> to vector<8x128xbf16>
    %546 = vector.broadcast %511 : i32 to vector<8x128xi32>
    %547 = arith.cmpi sgt, %9, %546 : vector<8x128xi32>
    %cst_166 = arith.constant 0.000000e+00 : bf16
    %548 = vector.broadcast %cst_166 : bf16 to vector<8x128xbf16>
    %549 = arith.select %547, %545, %548 : vector<8x128xi1>, vector<8x128xbf16>
    %c0_167 = arith.constant 0 : index
    %550 = arith.index_cast %505 : i32 to index
    %c0_168 = arith.constant 0 : index
    %c0_169 = arith.constant 0 : index
    %551 = vector.load %arg6[%c0_167, %550, %c0_168, %c0_169] : memref<1x16x8x128xbf16, #tpu.memory_space<vmem>>, vector<1x1x8x128xbf16>
    %552 = vector.shape_cast %551 : vector<1x1x8x128xbf16> to vector<8x128xbf16>
    %553 = vector.shape_cast %549 : vector<8x128xbf16> to vector<1x1x8x128xbf16>
    tpu.vector_store %arg6[%c0_167, %550, %c0_168, %c0_169], %553 {strides = array<i32>} : memref<1x16x8x128xbf16, #tpu.memory_space<vmem>>, vector<1x1x8x128xbf16>,
    %554 = arith.select %547, %545, %500 : vector<8x128xi1>, vector<8x128xbf16>
    %555 = arith.select %547, %542, %501 : vector<8x128xi1>, vector<8x128xf32>
    %c10_i32 = arith.constant 10 : i32
    %c2_i32_170 = arith.constant 2 : i32
    %556 = arith.muli %c2_i32_170, %c10_i32 : i32
    %c15_i32_171 = arith.constant 15 : i32
    %557 = arith.subi %c15_i32_171, %556 : i32
    %558 = arith.muli %arg0, %557 : i32
    %559 = arith.addi %c10_i32, %558 : i32
    %c16_i32_172 = arith.constant 16 : i32
    %560 = arith.muli %arg1, %c16_i32_172 : i32
    %561 = arith.addi %560, %c10_i32 : i32
    %c2_i32_173 = arith.constant 2 : i32
    %562 = arith.muli %c2_i32_173, %561 : i32
    %c15_i32_174 = arith.constant 15 : i32
    %563 = arith.subi %c15_i32_174, %562 : i32
    %564 = arith.muli %arg0, %563 : i32
    %565 = arith.addi %561, %564 : i32
    %c0_175 = arith.constant 0 : index
    %566 = arith.index_cast %559 : i32 to index
    %c0_176 = arith.constant 0 : index
    %c0_177 = arith.constant 0 : index
    %567 = vector.load %arg3[%c0_175, %566, %c0_176, %c0_177] : memref<1x16x8x512xbf16, #tpu.memory_space<vmem>>, vector<1x1x8x512xbf16>
    %568 = vector.shape_cast %567 : vector<1x1x8x512xbf16> to vector<8x512xbf16>
    %569 = arith.extf %568 : vector<8x512xbf16> to vector<8x512xf32>
    %570 = vector.broadcast %6 : vector<1x512xf32> to vector<8x512xf32>
    %571 = arith.addf %569, %570 : vector<8x512xf32>
    %cst_178 = arith.constant dense<0.000000e+00> : vector<8x512xf32>
    %572 = tpu.matmul %554, %4, %cst_178 {dimension_numbers = #tpu.dot_dimension_numbers<[1], [0], [0], [1], [0, 0, 1, 1], [], []>} : vector<8x128xbf16>, vector<128x512xbf16>, vector<8x512xf32> -> vector<8x512xf32>
    %573 = arith.addf %571, %572 : vector<8x512xf32>
    %574 = vector.extract_strided_slice %573 {offsets = [0, 0], sizes = [8, 128], strides = [1, 1]} : vector<8x512xf32> to vector<8x128xf32>
    %575 = arith.negf %574 : vector<8x128xf32>
    %576 = math.exp %575 : vector<8x128xf32>
    %cst_179 = arith.constant 1.000000e+00 : f32
    %577 = vector.broadcast %cst_179 : f32 to vector<8x128xf32>
    %578 = arith.addf %577, %576 : vector<8x128xf32>
    %579 = arith.divf %577, %578 : vector<8x128xf32>
    %580 = vector.extract_strided_slice %573 {offsets = [0, 128], sizes = [8, 128], strides = [1, 1]} : vector<8x512xf32> to vector<8x128xf32>
    %581 = arith.negf %580 : vector<8x128xf32>
    %582 = math.exp %581 : vector<8x128xf32>
    %cst_180 = arith.constant 1.000000e+00 : f32
    %583 = vector.broadcast %cst_180 : f32 to vector<8x128xf32>
    %584 = arith.addf %583, %582 : vector<8x128xf32>
    %585 = arith.divf %583, %584 : vector<8x128xf32>
    %586 = vector.extract_strided_slice %573 {offsets = [0, 256], sizes = [8, 128], strides = [1, 1]} : vector<8x512xf32> to vector<8x128xf32>
    %587 = math.tanh %586 : vector<8x128xf32>
    %588 = vector.extract_strided_slice %573 {offsets = [0, 384], sizes = [8, 128], strides = [1, 1]} : vector<8x512xf32> to vector<8x128xf32>
    %589 = arith.negf %588 : vector<8x128xf32>
    %590 = math.exp %589 : vector<8x128xf32>
    %cst_181 = arith.constant 1.000000e+00 : f32
    %591 = vector.broadcast %cst_181 : f32 to vector<8x128xf32>
    %592 = arith.addf %591, %590 : vector<8x128xf32>
    %593 = arith.divf %591, %592 : vector<8x128xf32>
    %594 = arith.mulf %585, %555 : vector<8x128xf32>
    %595 = arith.mulf %579, %587 : vector<8x128xf32>
    %596 = arith.addf %594, %595 : vector<8x128xf32>
    %597 = math.tanh %596 : vector<8x128xf32>
    %598 = arith.mulf %593, %597 : vector<8x128xf32>
    %599 = arith.truncf %598 : vector<8x128xf32> to vector<8x128xbf16>
    %600 = vector.broadcast %565 : i32 to vector<8x128xi32>
    %601 = arith.cmpi sgt, %9, %600 : vector<8x128xi32>
    %cst_182 = arith.constant 0.000000e+00 : bf16
    %602 = vector.broadcast %cst_182 : bf16 to vector<8x128xbf16>
    %603 = arith.select %601, %599, %602 : vector<8x128xi1>, vector<8x128xbf16>
    %c0_183 = arith.constant 0 : index
    %604 = arith.index_cast %559 : i32 to index
    %c0_184 = arith.constant 0 : index
    %c0_185 = arith.constant 0 : index
    %605 = vector.load %arg6[%c0_183, %604, %c0_184, %c0_185] : memref<1x16x8x128xbf16, #tpu.memory_space<vmem>>, vector<1x1x8x128xbf16>
    %606 = vector.shape_cast %605 : vector<1x1x8x128xbf16> to vector<8x128xbf16>
    %607 = vector.shape_cast %603 : vector<8x128xbf16> to vector<1x1x8x128xbf16>
    tpu.vector_store %arg6[%c0_183, %604, %c0_184, %c0_185], %607 {strides = array<i32>} : memref<1x16x8x128xbf16, #tpu.memory_space<vmem>>, vector<1x1x8x128xbf16>,
    %608 = arith.select %601, %599, %554 : vector<8x128xi1>, vector<8x128xbf16>
    %609 = arith.select %601, %596, %555 : vector<8x128xi1>, vector<8x128xf32>
    %c11_i32 = arith.constant 11 : i32
    %c2_i32_186 = arith.constant 2 : i32
    %610 = arith.muli %c2_i32_186, %c11_i32 : i32
    %c15_i32_187 = arith.constant 15 : i32
    %611 = arith.subi %c15_i32_187, %610 : i32
    %612 = arith.muli %arg0, %611 : i32
    %613 = arith.addi %c11_i32, %612 : i32
    %c16_i32_188 = arith.constant 16 : i32
    %614 = arith.muli %arg1, %c16_i32_188 : i32
    %615 = arith.addi %614, %c11_i32 : i32
    %c2_i32_189 = arith.constant 2 : i32
    %616 = arith.muli %c2_i32_189, %615 : i32
    %c15_i32_190 = arith.constant 15 : i32
    %617 = arith.subi %c15_i32_190, %616 : i32
    %618 = arith.muli %arg0, %617 : i32
    %619 = arith.addi %615, %618 : i32
    %c0_191 = arith.constant 0 : index
    %620 = arith.index_cast %613 : i32 to index
    %c0_192 = arith.constant 0 : index
    %c0_193 = arith.constant 0 : index
    %621 = vector.load %arg3[%c0_191, %620, %c0_192, %c0_193] : memref<1x16x8x512xbf16, #tpu.memory_space<vmem>>, vector<1x1x8x512xbf16>
    %622 = vector.shape_cast %621 : vector<1x1x8x512xbf16> to vector<8x512xbf16>
    %623 = arith.extf %622 : vector<8x512xbf16> to vector<8x512xf32>
    %624 = vector.broadcast %6 : vector<1x512xf32> to vector<8x512xf32>
    %625 = arith.addf %623, %624 : vector<8x512xf32>
    %cst_194 = arith.constant dense<0.000000e+00> : vector<8x512xf32>
    %626 = tpu.matmul %608, %4, %cst_194 {dimension_numbers = #tpu.dot_dimension_numbers<[1], [0], [0], [1], [0, 0, 1, 1], [], []>} : vector<8x128xbf16>, vector<128x512xbf16>, vector<8x512xf32> -> vector<8x512xf32>
    %627 = arith.addf %625, %626 : vector<8x512xf32>
    %628 = vector.extract_strided_slice %627 {offsets = [0, 0], sizes = [8, 128], strides = [1, 1]} : vector<8x512xf32> to vector<8x128xf32>
    %629 = arith.negf %628 : vector<8x128xf32>
    %630 = math.exp %629 : vector<8x128xf32>
    %cst_195 = arith.constant 1.000000e+00 : f32
    %631 = vector.broadcast %cst_195 : f32 to vector<8x128xf32>
    %632 = arith.addf %631, %630 : vector<8x128xf32>
    %633 = arith.divf %631, %632 : vector<8x128xf32>
    %634 = vector.extract_strided_slice %627 {offsets = [0, 128], sizes = [8, 128], strides = [1, 1]} : vector<8x512xf32> to vector<8x128xf32>
    %635 = arith.negf %634 : vector<8x128xf32>
    %636 = math.exp %635 : vector<8x128xf32>
    %cst_196 = arith.constant 1.000000e+00 : f32
    %637 = vector.broadcast %cst_196 : f32 to vector<8x128xf32>
    %638 = arith.addf %637, %636 : vector<8x128xf32>
    %639 = arith.divf %637, %638 : vector<8x128xf32>
    %640 = vector.extract_strided_slice %627 {offsets = [0, 256], sizes = [8, 128], strides = [1, 1]} : vector<8x512xf32> to vector<8x128xf32>
    %641 = math.tanh %640 : vector<8x128xf32>
    %642 = vector.extract_strided_slice %627 {offsets = [0, 384], sizes = [8, 128], strides = [1, 1]} : vector<8x512xf32> to vector<8x128xf32>
    %643 = arith.negf %642 : vector<8x128xf32>
    %644 = math.exp %643 : vector<8x128xf32>
    %cst_197 = arith.constant 1.000000e+00 : f32
    %645 = vector.broadcast %cst_197 : f32 to vector<8x128xf32>
    %646 = arith.addf %645, %644 : vector<8x128xf32>
    %647 = arith.divf %645, %646 : vector<8x128xf32>
    %648 = arith.mulf %639, %609 : vector<8x128xf32>
    %649 = arith.mulf %633, %641 : vector<8x128xf32>
    %650 = arith.addf %648, %649 : vector<8x128xf32>
    %651 = math.tanh %650 : vector<8x128xf32>
    %652 = arith.mulf %647, %651 : vector<8x128xf32>
    %653 = arith.truncf %652 : vector<8x128xf32> to vector<8x128xbf16>
    %654 = vector.broadcast %619 : i32 to vector<8x128xi32>
    %655 = arith.cmpi sgt, %9, %654 : vector<8x128xi32>
    %cst_198 = arith.constant 0.000000e+00 : bf16
    %656 = vector.broadcast %cst_198 : bf16 to vector<8x128xbf16>
    %657 = arith.select %655, %653, %656 : vector<8x128xi1>, vector<8x128xbf16>
    %c0_199 = arith.constant 0 : index
    %658 = arith.index_cast %613 : i32 to index
    %c0_200 = arith.constant 0 : index
    %c0_201 = arith.constant 0 : index
    %659 = vector.load %arg6[%c0_199, %658, %c0_200, %c0_201] : memref<1x16x8x128xbf16, #tpu.memory_space<vmem>>, vector<1x1x8x128xbf16>
    %660 = vector.shape_cast %659 : vector<1x1x8x128xbf16> to vector<8x128xbf16>
    %661 = vector.shape_cast %657 : vector<8x128xbf16> to vector<1x1x8x128xbf16>
    tpu.vector_store %arg6[%c0_199, %658, %c0_200, %c0_201], %661 {strides = array<i32>} : memref<1x16x8x128xbf16, #tpu.memory_space<vmem>>, vector<1x1x8x128xbf16>,
    %662 = arith.select %655, %653, %608 : vector<8x128xi1>, vector<8x128xbf16>
    %663 = arith.select %655, %650, %609 : vector<8x128xi1>, vector<8x128xf32>
    %c12_i32 = arith.constant 12 : i32
    %c2_i32_202 = arith.constant 2 : i32
    %664 = arith.muli %c2_i32_202, %c12_i32 : i32
    %c15_i32_203 = arith.constant 15 : i32
    %665 = arith.subi %c15_i32_203, %664 : i32
    %666 = arith.muli %arg0, %665 : i32
    %667 = arith.addi %c12_i32, %666 : i32
    %c16_i32_204 = arith.constant 16 : i32
    %668 = arith.muli %arg1, %c16_i32_204 : i32
    %669 = arith.addi %668, %c12_i32 : i32
    %c2_i32_205 = arith.constant 2 : i32
    %670 = arith.muli %c2_i32_205, %669 : i32
    %c15_i32_206 = arith.constant 15 : i32
    %671 = arith.subi %c15_i32_206, %670 : i32
    %672 = arith.muli %arg0, %671 : i32
    %673 = arith.addi %669, %672 : i32
    %c0_207 = arith.constant 0 : index
    %674 = arith.index_cast %667 : i32 to index
    %c0_208 = arith.constant 0 : index
    %c0_209 = arith.constant 0 : index
    %675 = vector.load %arg3[%c0_207, %674, %c0_208, %c0_209] : memref<1x16x8x512xbf16, #tpu.memory_space<vmem>>, vector<1x1x8x512xbf16>
    %676 = vector.shape_cast %675 : vector<1x1x8x512xbf16> to vector<8x512xbf16>
    %677 = arith.extf %676 : vector<8x512xbf16> to vector<8x512xf32>
    %678 = vector.broadcast %6 : vector<1x512xf32> to vector<8x512xf32>
    %679 = arith.addf %677, %678 : vector<8x512xf32>
    %cst_210 = arith.constant dense<0.000000e+00> : vector<8x512xf32>
    %680 = tpu.matmul %662, %4, %cst_210 {dimension_numbers = #tpu.dot_dimension_numbers<[1], [0], [0], [1], [0, 0, 1, 1], [], []>} : vector<8x128xbf16>, vector<128x512xbf16>, vector<8x512xf32> -> vector<8x512xf32>
    %681 = arith.addf %679, %680 : vector<8x512xf32>
    %682 = vector.extract_strided_slice %681 {offsets = [0, 0], sizes = [8, 128], strides = [1, 1]} : vector<8x512xf32> to vector<8x128xf32>
    %683 = arith.negf %682 : vector<8x128xf32>
    %684 = math.exp %683 : vector<8x128xf32>
    %cst_211 = arith.constant 1.000000e+00 : f32
    %685 = vector.broadcast %cst_211 : f32 to vector<8x128xf32>
    %686 = arith.addf %685, %684 : vector<8x128xf32>
    %687 = arith.divf %685, %686 : vector<8x128xf32>
    %688 = vector.extract_strided_slice %681 {offsets = [0, 128], sizes = [8, 128], strides = [1, 1]} : vector<8x512xf32> to vector<8x128xf32>
    %689 = arith.negf %688 : vector<8x128xf32>
    %690 = math.exp %689 : vector<8x128xf32>
    %cst_212 = arith.constant 1.000000e+00 : f32
    %691 = vector.broadcast %cst_212 : f32 to vector<8x128xf32>
    %692 = arith.addf %691, %690 : vector<8x128xf32>
    %693 = arith.divf %691, %692 : vector<8x128xf32>
    %694 = vector.extract_strided_slice %681 {offsets = [0, 256], sizes = [8, 128], strides = [1, 1]} : vector<8x512xf32> to vector<8x128xf32>
    %695 = math.tanh %694 : vector<8x128xf32>
    %696 = vector.extract_strided_slice %681 {offsets = [0, 384], sizes = [8, 128], strides = [1, 1]} : vector<8x512xf32> to vector<8x128xf32>
    %697 = arith.negf %696 : vector<8x128xf32>
    %698 = math.exp %697 : vector<8x128xf32>
    %cst_213 = arith.constant 1.000000e+00 : f32
    %699 = vector.broadcast %cst_213 : f32 to vector<8x128xf32>
    %700 = arith.addf %699, %698 : vector<8x128xf32>
    %701 = arith.divf %699, %700 : vector<8x128xf32>
    %702 = arith.mulf %693, %663 : vector<8x128xf32>
    %703 = arith.mulf %687, %695 : vector<8x128xf32>
    %704 = arith.addf %702, %703 : vector<8x128xf32>
    %705 = math.tanh %704 : vector<8x128xf32>
    %706 = arith.mulf %701, %705 : vector<8x128xf32>
    %707 = arith.truncf %706 : vector<8x128xf32> to vector<8x128xbf16>
    %708 = vector.broadcast %673 : i32 to vector<8x128xi32>
    %709 = arith.cmpi sgt, %9, %708 : vector<8x128xi32>
    %cst_214 = arith.constant 0.000000e+00 : bf16
    %710 = vector.broadcast %cst_214 : bf16 to vector<8x128xbf16>
    %711 = arith.select %709, %707, %710 : vector<8x128xi1>, vector<8x128xbf16>
    %c0_215 = arith.constant 0 : index
    %712 = arith.index_cast %667 : i32 to index
    %c0_216 = arith.constant 0 : index
    %c0_217 = arith.constant 0 : index
    %713 = vector.load %arg6[%c0_215, %712, %c0_216, %c0_217] : memref<1x16x8x128xbf16, #tpu.memory_space<vmem>>, vector<1x1x8x128xbf16>
    %714 = vector.shape_cast %713 : vector<1x1x8x128xbf16> to vector<8x128xbf16>
    %715 = vector.shape_cast %711 : vector<8x128xbf16> to vector<1x1x8x128xbf16>
    tpu.vector_store %arg6[%c0_215, %712, %c0_216, %c0_217], %715 {strides = array<i32>} : memref<1x16x8x128xbf16, #tpu.memory_space<vmem>>, vector<1x1x8x128xbf16>,
    %716 = arith.select %709, %707, %662 : vector<8x128xi1>, vector<8x128xbf16>
    %717 = arith.select %709, %704, %663 : vector<8x128xi1>, vector<8x128xf32>
    %c13_i32 = arith.constant 13 : i32
    %c2_i32_218 = arith.constant 2 : i32
    %718 = arith.muli %c2_i32_218, %c13_i32 : i32
    %c15_i32_219 = arith.constant 15 : i32
    %719 = arith.subi %c15_i32_219, %718 : i32
    %720 = arith.muli %arg0, %719 : i32
    %721 = arith.addi %c13_i32, %720 : i32
    %c16_i32_220 = arith.constant 16 : i32
    %722 = arith.muli %arg1, %c16_i32_220 : i32
    %723 = arith.addi %722, %c13_i32 : i32
    %c2_i32_221 = arith.constant 2 : i32
    %724 = arith.muli %c2_i32_221, %723 : i32
    %c15_i32_222 = arith.constant 15 : i32
    %725 = arith.subi %c15_i32_222, %724 : i32
    %726 = arith.muli %arg0, %725 : i32
    %727 = arith.addi %723, %726 : i32
    %c0_223 = arith.constant 0 : index
    %728 = arith.index_cast %721 : i32 to index
    %c0_224 = arith.constant 0 : index
    %c0_225 = arith.constant 0 : index
    %729 = vector.load %arg3[%c0_223, %728, %c0_224, %c0_225] : memref<1x16x8x512xbf16, #tpu.memory_space<vmem>>, vector<1x1x8x512xbf16>
    %730 = vector.shape_cast %729 : vector<1x1x8x512xbf16> to vector<8x512xbf16>
    %731 = arith.extf %730 : vector<8x512xbf16> to vector<8x512xf32>
    %732 = vector.broadcast %6 : vector<1x512xf32> to vector<8x512xf32>
    %733 = arith.addf %731, %732 : vector<8x512xf32>
    %cst_226 = arith.constant dense<0.000000e+00> : vector<8x512xf32>
    %734 = tpu.matmul %716, %4, %cst_226 {dimension_numbers = #tpu.dot_dimension_numbers<[1], [0], [0], [1], [0, 0, 1, 1], [], []>} : vector<8x128xbf16>, vector<128x512xbf16>, vector<8x512xf32> -> vector<8x512xf32>
    %735 = arith.addf %733, %734 : vector<8x512xf32>
    %736 = vector.extract_strided_slice %735 {offsets = [0, 0], sizes = [8, 128], strides = [1, 1]} : vector<8x512xf32> to vector<8x128xf32>
    %737 = arith.negf %736 : vector<8x128xf32>
    %738 = math.exp %737 : vector<8x128xf32>
    %cst_227 = arith.constant 1.000000e+00 : f32
    %739 = vector.broadcast %cst_227 : f32 to vector<8x128xf32>
    %740 = arith.addf %739, %738 : vector<8x128xf32>
    %741 = arith.divf %739, %740 : vector<8x128xf32>
    %742 = vector.extract_strided_slice %735 {offsets = [0, 128], sizes = [8, 128], strides = [1, 1]} : vector<8x512xf32> to vector<8x128xf32>
    %743 = arith.negf %742 : vector<8x128xf32>
    %744 = math.exp %743 : vector<8x128xf32>
    %cst_228 = arith.constant 1.000000e+00 : f32
    %745 = vector.broadcast %cst_228 : f32 to vector<8x128xf32>
    %746 = arith.addf %745, %744 : vector<8x128xf32>
    %747 = arith.divf %745, %746 : vector<8x128xf32>
    %748 = vector.extract_strided_slice %735 {offsets = [0, 256], sizes = [8, 128], strides = [1, 1]} : vector<8x512xf32> to vector<8x128xf32>
    %749 = math.tanh %748 : vector<8x128xf32>
    %750 = vector.extract_strided_slice %735 {offsets = [0, 384], sizes = [8, 128], strides = [1, 1]} : vector<8x512xf32> to vector<8x128xf32>
    %751 = arith.negf %750 : vector<8x128xf32>
    %752 = math.exp %751 : vector<8x128xf32>
    %cst_229 = arith.constant 1.000000e+00 : f32
    %753 = vector.broadcast %cst_229 : f32 to vector<8x128xf32>
    %754 = arith.addf %753, %752 : vector<8x128xf32>
    %755 = arith.divf %753, %754 : vector<8x128xf32>
    %756 = arith.mulf %747, %717 : vector<8x128xf32>
    %757 = arith.mulf %741, %749 : vector<8x128xf32>
    %758 = arith.addf %756, %757 : vector<8x128xf32>
    %759 = math.tanh %758 : vector<8x128xf32>
    %760 = arith.mulf %755, %759 : vector<8x128xf32>
    %761 = arith.truncf %760 : vector<8x128xf32> to vector<8x128xbf16>
    %762 = vector.broadcast %727 : i32 to vector<8x128xi32>
    %763 = arith.cmpi sgt, %9, %762 : vector<8x128xi32>
    %cst_230 = arith.constant 0.000000e+00 : bf16
    %764 = vector.broadcast %cst_230 : bf16 to vector<8x128xbf16>
    %765 = arith.select %763, %761, %764 : vector<8x128xi1>, vector<8x128xbf16>
    %c0_231 = arith.constant 0 : index
    %766 = arith.index_cast %721 : i32 to index
    %c0_232 = arith.constant 0 : index
    %c0_233 = arith.constant 0 : index
    %767 = vector.load %arg6[%c0_231, %766, %c0_232, %c0_233] : memref<1x16x8x128xbf16, #tpu.memory_space<vmem>>, vector<1x1x8x128xbf16>
    %768 = vector.shape_cast %767 : vector<1x1x8x128xbf16> to vector<8x128xbf16>
    %769 = vector.shape_cast %765 : vector<8x128xbf16> to vector<1x1x8x128xbf16>
    tpu.vector_store %arg6[%c0_231, %766, %c0_232, %c0_233], %769 {strides = array<i32>} : memref<1x16x8x128xbf16, #tpu.memory_space<vmem>>, vector<1x1x8x128xbf16>,
    %770 = arith.select %763, %761, %716 : vector<8x128xi1>, vector<8x128xbf16>
    %771 = arith.select %763, %758, %717 : vector<8x128xi1>, vector<8x128xf32>
    %c14_i32 = arith.constant 14 : i32
    %c2_i32_234 = arith.constant 2 : i32
    %772 = arith.muli %c2_i32_234, %c14_i32 : i32
    %c15_i32_235 = arith.constant 15 : i32
    %773 = arith.subi %c15_i32_235, %772 : i32
    %774 = arith.muli %arg0, %773 : i32
    %775 = arith.addi %c14_i32, %774 : i32
    %c16_i32_236 = arith.constant 16 : i32
    %776 = arith.muli %arg1, %c16_i32_236 : i32
    %777 = arith.addi %776, %c14_i32 : i32
    %c2_i32_237 = arith.constant 2 : i32
    %778 = arith.muli %c2_i32_237, %777 : i32
    %c15_i32_238 = arith.constant 15 : i32
    %779 = arith.subi %c15_i32_238, %778 : i32
    %780 = arith.muli %arg0, %779 : i32
    %781 = arith.addi %777, %780 : i32
    %c0_239 = arith.constant 0 : index
    %782 = arith.index_cast %775 : i32 to index
    %c0_240 = arith.constant 0 : index
    %c0_241 = arith.constant 0 : index
    %783 = vector.load %arg3[%c0_239, %782, %c0_240, %c0_241] : memref<1x16x8x512xbf16, #tpu.memory_space<vmem>>, vector<1x1x8x512xbf16>
    %784 = vector.shape_cast %783 : vector<1x1x8x512xbf16> to vector<8x512xbf16>
    %785 = arith.extf %784 : vector<8x512xbf16> to vector<8x512xf32>
    %786 = vector.broadcast %6 : vector<1x512xf32> to vector<8x512xf32>
    %787 = arith.addf %785, %786 : vector<8x512xf32>
    %cst_242 = arith.constant dense<0.000000e+00> : vector<8x512xf32>
    %788 = tpu.matmul %770, %4, %cst_242 {dimension_numbers = #tpu.dot_dimension_numbers<[1], [0], [0], [1], [0, 0, 1, 1], [], []>} : vector<8x128xbf16>, vector<128x512xbf16>, vector<8x512xf32> -> vector<8x512xf32>
    %789 = arith.addf %787, %788 : vector<8x512xf32>
    %790 = vector.extract_strided_slice %789 {offsets = [0, 0], sizes = [8, 128], strides = [1, 1]} : vector<8x512xf32> to vector<8x128xf32>
    %791 = arith.negf %790 : vector<8x128xf32>
    %792 = math.exp %791 : vector<8x128xf32>
    %cst_243 = arith.constant 1.000000e+00 : f32
    %793 = vector.broadcast %cst_243 : f32 to vector<8x128xf32>
    %794 = arith.addf %793, %792 : vector<8x128xf32>
    %795 = arith.divf %793, %794 : vector<8x128xf32>
    %796 = vector.extract_strided_slice %789 {offsets = [0, 128], sizes = [8, 128], strides = [1, 1]} : vector<8x512xf32> to vector<8x128xf32>
    %797 = arith.negf %796 : vector<8x128xf32>
    %798 = math.exp %797 : vector<8x128xf32>
    %cst_244 = arith.constant 1.000000e+00 : f32
    %799 = vector.broadcast %cst_244 : f32 to vector<8x128xf32>
    %800 = arith.addf %799, %798 : vector<8x128xf32>
    %801 = arith.divf %799, %800 : vector<8x128xf32>
    %802 = vector.extract_strided_slice %789 {offsets = [0, 256], sizes = [8, 128], strides = [1, 1]} : vector<8x512xf32> to vector<8x128xf32>
    %803 = math.tanh %802 : vector<8x128xf32>
    %804 = vector.extract_strided_slice %789 {offsets = [0, 384], sizes = [8, 128], strides = [1, 1]} : vector<8x512xf32> to vector<8x128xf32>
    %805 = arith.negf %804 : vector<8x128xf32>
    %806 = math.exp %805 : vector<8x128xf32>
    %cst_245 = arith.constant 1.000000e+00 : f32
    %807 = vector.broadcast %cst_245 : f32 to vector<8x128xf32>
    %808 = arith.addf %807, %806 : vector<8x128xf32>
    %809 = arith.divf %807, %808 : vector<8x128xf32>
    %810 = arith.mulf %801, %771 : vector<8x128xf32>
    %811 = arith.mulf %795, %803 : vector<8x128xf32>
    %812 = arith.addf %810, %811 : vector<8x128xf32>
    %813 = math.tanh %812 : vector<8x128xf32>
    %814 = arith.mulf %809, %813 : vector<8x128xf32>
    %815 = arith.truncf %814 : vector<8x128xf32> to vector<8x128xbf16>
    %816 = vector.broadcast %781 : i32 to vector<8x128xi32>
    %817 = arith.cmpi sgt, %9, %816 : vector<8x128xi32>
    %cst_246 = arith.constant 0.000000e+00 : bf16
    %818 = vector.broadcast %cst_246 : bf16 to vector<8x128xbf16>
    %819 = arith.select %817, %815, %818 : vector<8x128xi1>, vector<8x128xbf16>
    %c0_247 = arith.constant 0 : index
    %820 = arith.index_cast %775 : i32 to index
    %c0_248 = arith.constant 0 : index
    %c0_249 = arith.constant 0 : index
    %821 = vector.load %arg6[%c0_247, %820, %c0_248, %c0_249] : memref<1x16x8x128xbf16, #tpu.memory_space<vmem>>, vector<1x1x8x128xbf16>
    %822 = vector.shape_cast %821 : vector<1x1x8x128xbf16> to vector<8x128xbf16>
    %823 = vector.shape_cast %819 : vector<8x128xbf16> to vector<1x1x8x128xbf16>
    tpu.vector_store %arg6[%c0_247, %820, %c0_248, %c0_249], %823 {strides = array<i32>} : memref<1x16x8x128xbf16, #tpu.memory_space<vmem>>, vector<1x1x8x128xbf16>,
    %824 = arith.select %817, %815, %770 : vector<8x128xi1>, vector<8x128xbf16>
    %825 = arith.select %817, %812, %771 : vector<8x128xi1>, vector<8x128xf32>
    %c15_i32_250 = arith.constant 15 : i32
    %c2_i32_251 = arith.constant 2 : i32
    %826 = arith.muli %c2_i32_251, %c15_i32_250 : i32
    %c15_i32_252 = arith.constant 15 : i32
    %827 = arith.subi %c15_i32_252, %826 : i32
    %828 = arith.muli %arg0, %827 : i32
    %829 = arith.addi %c15_i32_250, %828 : i32
    %c16_i32_253 = arith.constant 16 : i32
    %830 = arith.muli %arg1, %c16_i32_253 : i32
    %831 = arith.addi %830, %c15_i32_250 : i32
    %c2_i32_254 = arith.constant 2 : i32
    %832 = arith.muli %c2_i32_254, %831 : i32
    %c15_i32_255 = arith.constant 15 : i32
    %833 = arith.subi %c15_i32_255, %832 : i32
    %834 = arith.muli %arg0, %833 : i32
    %835 = arith.addi %831, %834 : i32
    %c0_256 = arith.constant 0 : index
    %836 = arith.index_cast %829 : i32 to index
    %c0_257 = arith.constant 0 : index
    %c0_258 = arith.constant 0 : index
    %837 = vector.load %arg3[%c0_256, %836, %c0_257, %c0_258] : memref<1x16x8x512xbf16, #tpu.memory_space<vmem>>, vector<1x1x8x512xbf16>
    %838 = vector.shape_cast %837 : vector<1x1x8x512xbf16> to vector<8x512xbf16>
    %839 = arith.extf %838 : vector<8x512xbf16> to vector<8x512xf32>
    %840 = vector.broadcast %6 : vector<1x512xf32> to vector<8x512xf32>
    %841 = arith.addf %839, %840 : vector<8x512xf32>
    %cst_259 = arith.constant dense<0.000000e+00> : vector<8x512xf32>
    %842 = tpu.matmul %824, %4, %cst_259 {dimension_numbers = #tpu.dot_dimension_numbers<[1], [0], [0], [1], [0, 0, 1, 1], [], []>} : vector<8x128xbf16>, vector<128x512xbf16>, vector<8x512xf32> -> vector<8x512xf32>
    %843 = arith.addf %841, %842 : vector<8x512xf32>
    %844 = vector.extract_strided_slice %843 {offsets = [0, 0], sizes = [8, 128], strides = [1, 1]} : vector<8x512xf32> to vector<8x128xf32>
    %845 = arith.negf %844 : vector<8x128xf32>
    %846 = math.exp %845 : vector<8x128xf32>
    %cst_260 = arith.constant 1.000000e+00 : f32
    %847 = vector.broadcast %cst_260 : f32 to vector<8x128xf32>
    %848 = arith.addf %847, %846 : vector<8x128xf32>
    %849 = arith.divf %847, %848 : vector<8x128xf32>
    %850 = vector.extract_strided_slice %843 {offsets = [0, 128], sizes = [8, 128], strides = [1, 1]} : vector<8x512xf32> to vector<8x128xf32>
    %851 = arith.negf %850 : vector<8x128xf32>
    %852 = math.exp %851 : vector<8x128xf32>
    %cst_261 = arith.constant 1.000000e+00 : f32
    %853 = vector.broadcast %cst_261 : f32 to vector<8x128xf32>
    %854 = arith.addf %853, %852 : vector<8x128xf32>
    %855 = arith.divf %853, %854 : vector<8x128xf32>
    %856 = vector.extract_strided_slice %843 {offsets = [0, 256], sizes = [8, 128], strides = [1, 1]} : vector<8x512xf32> to vector<8x128xf32>
    %857 = math.tanh %856 : vector<8x128xf32>
    %858 = vector.extract_strided_slice %843 {offsets = [0, 384], sizes = [8, 128], strides = [1, 1]} : vector<8x512xf32> to vector<8x128xf32>
    %859 = arith.negf %858 : vector<8x128xf32>
    %860 = math.exp %859 : vector<8x128xf32>
    %cst_262 = arith.constant 1.000000e+00 : f32
    %861 = vector.broadcast %cst_262 : f32 to vector<8x128xf32>
    %862 = arith.addf %861, %860 : vector<8x128xf32>
    %863 = arith.divf %861, %862 : vector<8x128xf32>
    %864 = arith.mulf %855, %825 : vector<8x128xf32>
    %865 = arith.mulf %849, %857 : vector<8x128xf32>
    %866 = arith.addf %864, %865 : vector<8x128xf32>
    %867 = math.tanh %866 : vector<8x128xf32>
    %868 = arith.mulf %863, %867 : vector<8x128xf32>
    %869 = arith.truncf %868 : vector<8x128xf32> to vector<8x128xbf16>
    %870 = vector.broadcast %835 : i32 to vector<8x128xi32>
    %871 = arith.cmpi sgt, %9, %870 : vector<8x128xi32>
    %cst_263 = arith.constant 0.000000e+00 : bf16
    %872 = vector.broadcast %cst_263 : bf16 to vector<8x128xbf16>
    %873 = arith.select %871, %869, %872 : vector<8x128xi1>, vector<8x128xbf16>
    %c0_264 = arith.constant 0 : index
    %874 = arith.index_cast %829 : i32 to index
    %c0_265 = arith.constant 0 : index
    %c0_266 = arith.constant 0 : index
    %875 = vector.load %arg6[%c0_264, %874, %c0_265, %c0_266] : memref<1x16x8x128xbf16, #tpu.memory_space<vmem>>, vector<1x1x8x128xbf16>
    %876 = vector.shape_cast %875 : vector<1x1x8x128xbf16> to vector<8x128xbf16>
    %877 = vector.shape_cast %873 : vector<8x128xbf16> to vector<1x1x8x128xbf16>
    tpu.vector_store %arg6[%c0_264, %874, %c0_265, %c0_266], %877 {strides = array<i32>} : memref<1x16x8x128xbf16, #tpu.memory_space<vmem>>, vector<1x1x8x128xbf16>,
    %878 = arith.select %871, %869, %824 : vector<8x128xi1>, vector<8x128xbf16>
    %879 = arith.select %871, %866, %825 : vector<8x128xi1>, vector<8x128xf32>
    %c16_i32_267 = arith.constant 16 : i32
    %880 = arith.index_cast %arg0 : i32 to index
    %c0_268 = arith.constant 0 : index
    %c0_269 = arith.constant 0 : index
    %881 = vector.load %arg7[%880, %c0_268, %c0_269] : memref<2x8x128xbf16, #tpu.memory_space<vmem>>, vector<1x8x128xbf16>
    %882 = vector.shape_cast %881 : vector<1x8x128xbf16> to vector<8x128xbf16>
    %883 = vector.shape_cast %878 : vector<8x128xbf16> to vector<1x8x128xbf16>
    tpu.vector_store %arg7[%880, %c0_268, %c0_269], %883 {strides = array<i32>} : memref<2x8x128xbf16, #tpu.memory_space<vmem>>, vector<1x8x128xbf16>,
    %884 = arith.index_cast %arg0 : i32 to index
    %c0_270 = arith.constant 0 : index
    %c0_271 = arith.constant 0 : index
    %885 = vector.load %arg8[%884, %c0_270, %c0_271] : memref<2x8x128xf32, #tpu.memory_space<vmem>>, vector<1x8x128xf32>
    %886 = vector.shape_cast %885 : vector<1x8x128xf32> to vector<8x128xf32>
    %887 = vector.shape_cast %879 : vector<8x128xf32> to vector<1x8x128xf32>
    tpu.vector_store %arg8[%884, %c0_270, %c0_271], %887 {strides = array<i32>} : memref<2x8x128xf32, #tpu.memory_space<vmem>>, vector<1x8x128xf32>,
    return
  }
  func.func @transform_0(%arg0: i32, %arg1: i32) -> (i32, i32) {
    %c0_i32 = arith.constant 0 : i32
    %c0_i32_0 = arith.constant 0 : i32
    %c0_i32_1 = arith.constant 0 : i32
    return %c0_i32, %c0_i32_0 : i32, i32
  }
  func.func @transform_1(%arg0: i32, %arg1: i32) -> (i32, i32, i32, i32) {
    %c2_i32 = arith.constant 2 : i32
    %0 = arith.muli %c2_i32, %arg1 : i32
    %c0_i32 = arith.constant 0 : i32
    %1 = arith.subi %c0_i32, %0 : i32
    %2 = arith.muli %arg0, %1 : i32
    %3 = arith.addi %arg1, %2 : i32
    %c0_i32_0 = arith.constant 0 : i32
    %c0_i32_1 = arith.constant 0 : i32
    %c0_i32_2 = arith.constant 0 : i32
    return %arg0, %3, %c0_i32_0, %c0_i32_1 : i32, i32, i32, i32
  }
  func.func @transform_2(%arg0: i32, %arg1: i32) -> (i32, i32, i32) {
    %c0_i32 = arith.constant 0 : i32
    %c0_i32_0 = arith.constant 0 : i32
    %c0_i32_1 = arith.constant 0 : i32
    return %arg0, %c0_i32, %c0_i32_0 : i32, i32, i32
  }
  func.func @transform_3(%arg0: i32, %arg1: i32) -> (i32, i32, i32) {
    %c0_i32 = arith.constant 0 : i32
    %c0_i32_0 = arith.constant 0 : i32
    %c0_i32_1 = arith.constant 0 : i32
    return %arg0, %c0_i32, %c0_i32_0 : i32, i32, i32
  }
  func.func @transform_4(%arg0: i32, %arg1: i32) -> (i32, i32, i32, i32) {
    %c2_i32 = arith.constant 2 : i32
    %0 = arith.muli %c2_i32, %arg1 : i32
    %c0_i32 = arith.constant 0 : i32
    %1 = arith.subi %c0_i32, %0 : i32
    %2 = arith.muli %arg0, %1 : i32
    %3 = arith.addi %arg1, %2 : i32
    %c0_i32_0 = arith.constant 0 : i32
    %c0_i32_1 = arith.constant 0 : i32
    %c0_i32_2 = arith.constant 0 : i32
    return %arg0, %3, %c0_i32_0, %c0_i32_1 : i32, i32, i32, i32
  }
}

module attributes {stable_mosaic.version = 11 : i64} {
  func.func @head_kernel(%arg0: i32, %arg1: memref<2x128x128xbf16, #tpu.memory_space<vmem>>, %arg2: memref<256x128xbf16, #tpu.memory_space<vmem>>, %arg3: memref<1x128xf32, #tpu.memory_space<vmem>>, %arg4: memref<128x128xbf16, #tpu.memory_space<vmem>>, %arg5: memref<1x128xf32, #tpu.memory_space<vmem>>, %arg6: memref<128x128xf32, #tpu.memory_space<vmem>>) attributes {dimension_semantics = [#tpu.dimension_semantics<parallel>], iteration_bounds = array<i64: 1>, scalar_prefetch = 0 : i64, scratch_operands = 0 : i64, tpu.core_type = #tpu.core_type<tc>, window_params = [{transform_indices = @transform_0, window_bounds = array<i64: 2, 128, 128>}, {pipeline_mode = #tpu.pipeline_mode<synchronous>, transform_indices = @transform_1, window_bounds = array<i64: 256, 128>}, {pipeline_mode = #tpu.pipeline_mode<synchronous>, transform_indices = @transform_2, window_bounds = array<i64: 1, 128>}, {pipeline_mode = #tpu.pipeline_mode<synchronous>, transform_indices = @transform_3, window_bounds = array<i64: 128, 128>}, {pipeline_mode = #tpu.pipeline_mode<synchronous>, transform_indices = @transform_4, window_bounds = array<i64: 1, 128>}, {transform_indices = @transform_5, window_bounds = array<i64: 128, 128>}]} {
    %c0 = arith.constant 0 : index
    %c0_0 = arith.constant 0 : index
    %c0_1 = arith.constant 0 : index
    %0 = vector.load %arg1[%c0, %c0_0, %c0_1] : memref<2x128x128xbf16, #tpu.memory_space<vmem>>, vector<1x128x128xbf16>
    %1 = vector.shape_cast %0 : vector<1x128x128xbf16> to vector<128x128xbf16>
    %2 = arith.extf %1 : vector<128x128xbf16> to vector<128x128xf32>
    %3 = math.tanh %2 : vector<128x128xf32>
    %4 = arith.truncf %3 : vector<128x128xf32> to vector<128x128xbf16>
    %c1 = arith.constant 1 : index
    %c0_2 = arith.constant 0 : index
    %c0_3 = arith.constant 0 : index
    %5 = vector.load %arg1[%c1, %c0_2, %c0_3] : memref<2x128x128xbf16, #tpu.memory_space<vmem>>, vector<1x128x128xbf16>
    %6 = vector.shape_cast %5 : vector<1x128x128xbf16> to vector<128x128xbf16>
    %7 = arith.extf %6 : vector<128x128xbf16> to vector<128x128xf32>
    %8 = math.tanh %7 : vector<128x128xf32>
    %9 = arith.truncf %8 : vector<128x128xf32> to vector<128x128xbf16>
    %10 = tpu.concatenate %4, %9 in 1 : vector<128x128xbf16>, vector<128x128xbf16> -> vector<128x256xbf16>
    %c0_4 = arith.constant 0 : index
    %c0_5 = arith.constant 0 : index
    %11 = vector.load %arg2[%c0_4, %c0_5] : memref<256x128xbf16, #tpu.memory_space<vmem>>, vector<256x128xbf16>
    %cst = arith.constant dense<0.000000e+00> : vector<128x128xf32>
    %12 = tpu.matmul %10, %11, %cst {dimension_numbers = #tpu.dot_dimension_numbers<[1], [0], [0], [1], [0, 0, 1, 1], [], []>} : vector<128x256xbf16>, vector<256x128xbf16>, vector<128x128xf32> -> vector<128x128xf32>
    %c0_6 = arith.constant 0 : index
    %c0_7 = arith.constant 0 : index
    %13 = vector.load %arg3[%c0_6, %c0_7] : memref<1x128xf32, #tpu.memory_space<vmem>>, vector<1x128xf32>
    %14 = vector.broadcast %13 : vector<1x128xf32> to vector<128x128xf32>
    %15 = arith.addf %12, %14 : vector<128x128xf32>
    %16 = math.tanh %15 : vector<128x128xf32>
    %17 = arith.truncf %16 : vector<128x128xf32> to vector<128x128xbf16>
    %c0_8 = arith.constant 0 : index
    %c0_9 = arith.constant 0 : index
    %18 = vector.load %arg4[%c0_8, %c0_9] : memref<128x128xbf16, #tpu.memory_space<vmem>>, vector<128x128xbf16>
    %cst_10 = arith.constant dense<0.000000e+00> : vector<128x128xf32>
    %19 = tpu.matmul %17, %18, %cst_10 {dimension_numbers = #tpu.dot_dimension_numbers<[1], [0], [0], [1], [0, 0, 1, 1], [], []>} : vector<128x128xbf16>, vector<128x128xbf16>, vector<128x128xf32> -> vector<128x128xf32>
    %c0_11 = arith.constant 0 : index
    %c0_12 = arith.constant 0 : index
    %20 = vector.load %arg5[%c0_11, %c0_12] : memref<1x128xf32, #tpu.memory_space<vmem>>, vector<1x128xf32>
    %21 = vector.broadcast %20 : vector<1x128xf32> to vector<128x128xf32>
    %22 = arith.addf %19, %21 : vector<128x128xf32>
    %c0_13 = arith.constant 0 : index
    %c0_14 = arith.constant 0 : index
    %23 = vector.load %arg6[%c0_13, %c0_14] : memref<128x128xf32, #tpu.memory_space<vmem>>, vector<128x128xf32>
    tpu.vector_store %arg6[%c0_13, %c0_14], %22 {strides = array<i32>} : memref<128x128xf32, #tpu.memory_space<vmem>>, vector<128x128xf32>,
    return
  }
  func.func @transform_0(%arg0: i32) -> (i32, i32, i32) {
    %c0_i32 = arith.constant 0 : i32
    %c0_i32_0 = arith.constant 0 : i32
    %c0_i32_1 = arith.constant 0 : i32
    return %c0_i32, %arg0, %c0_i32_0 : i32, i32, i32
  }
  func.func @transform_1(%arg0: i32) -> (i32, i32) {
    %c0_i32 = arith.constant 0 : i32
    %c0_i32_0 = arith.constant 0 : i32
    %c0_i32_1 = arith.constant 0 : i32
    return %c0_i32, %c0_i32_0 : i32, i32
  }
  func.func @transform_2(%arg0: i32) -> (i32, i32) {
    %c0_i32 = arith.constant 0 : i32
    %c0_i32_0 = arith.constant 0 : i32
    %c0_i32_1 = arith.constant 0 : i32
    return %c0_i32, %c0_i32_0 : i32, i32
  }
  func.func @transform_3(%arg0: i32) -> (i32, i32) {
    %c0_i32 = arith.constant 0 : i32
    %c0_i32_0 = arith.constant 0 : i32
    %c0_i32_1 = arith.constant 0 : i32
    return %c0_i32, %c0_i32_0 : i32, i32
  }
  func.func @transform_4(%arg0: i32) -> (i32, i32) {
    %c0_i32 = arith.constant 0 : i32
    %c0_i32_0 = arith.constant 0 : i32
    %c0_i32_1 = arith.constant 0 : i32
    return %c0_i32, %c0_i32_0 : i32, i32
  }
  func.func @transform_5(%arg0: i32) -> (i32, i32) {
    %c0_i32 = arith.constant 0 : i32
    %c0_i32_0 = arith.constant 0 : i32
    return %arg0, %c0_i32 : i32, i32
  }
}

</mosaic_0001>

<bundles_post_ra>
// kernel: bilstm_forward.3
= control target key start
LH: loop header
LB: loop body
LE: loop exit
PB: predicated region body
PF: predicated region fallthrough
CT: control target
= control target key end

     0   :  { %v1606_v3 = vmov 0   ;;  %s2080_s1 = inlined_call_operand.vmem [shape: bf16[128,1024], index: 1, kind: input, shape index: {}]   ;;  %s2081_s0 = inlined_call_operand.vmem [shape: bf16[128,128], index: 0, kind: input, shape index: {}]   ;;  %s2082_s2 = inlined_call_operand.vmem [shape: bf16[2,128,512], index: 2, kind: output, shape index: {}]  }
   0x1   :  { %v28_v0 = vld [vmem:[%s2080_s1] sm:$0xff]  ;;  %v29_v2 = vld [vmem:[%s2080_s1 + $0x8] sm:$0xff]  ;;  %492 = vmatprep.mubr.bf16.mxu0 %v1606_v3  ;;  %605 = vmatprep.mubr.bf16.mxu1 %v1606_v3  ;;  %v30_v63 = vld [vmem:[%s2080_s1 + $0x10] sm:$0xff] }
   0x2   :  { %v32_v1 = vld [vmem:[%s2080_s1 + $0x20] sm:$0xff]  ;;  %v33_v5 = vld [vmem:[%s2080_s1 + $0x28] sm:$0xff] }
   0x3   :  { %v1374_v4 = vcombine.high %v28_v0, %v32_v1  ;;  %v1373_v6 = vcombine.low %v28_v0, %v32_v1  ;;  %v36_v7 = vld [vmem:[%s2080_s1 + $0x40] sm:$0xff]  ;;  %v1376_v9 = vcombine.high %v29_v2, %v33_v5  ;;  %v1375_v10 = vcombine.low %v29_v2, %v33_v5  ;;  %v37_v12 = vld [vmem:[%s2080_s1 + $0x48] sm:$0xff]  ;;  %v34_v0 = vld [vmem:[%s2080_s1 + $0x30] sm:$0xff] }
   0x4   :  { %v40_v8 = vld [vmem:[%s2080_s1 + $0x60] sm:$0xff]  ;;  %v41_v13 = vld [vmem:[%s2080_s1 + $0x68] sm:$0xff]  ;;  %v31_v1 = vld [vmem:[%s2080_s1 + $0x18] sm:$0xff] }
   0x5   :  { %v1382_v11 = vcombine.high %v36_v7, %v40_v8  ;;  %v44_v14 = vld [vmem:[%s2080_s1 + $0x80] sm:$0xff]  ;;  %460 = vmatprep.subr.bf16.mxu0 %v1374_v4  ;;  %v1384_v15 = vcombine.high %v37_v12, %v41_v13  ;;  %v45_v17 = vld [vmem:[%s2080_s1 + $0x88] sm:$0xff]  ;;  %573 = vmatprep.subr.bf16.mxu1 %v1376_v9  ;;  %v1381_v19 = vcombine.low %v36_v7, %v40_v8  ;;  %v35_v2 = vld [vmem:[%s2080_s1 + $0x38] sm:$0xff] }
   0x6   :  { %v48_v16 = vld [vmem:[%s2080_s1 + $0xa0] sm:$0xff]  ;;  %v49_v18 = vld [vmem:[%s2080_s1 + $0xa8] sm:$0xff]  ;;  %461 = vmatpush1.bf16.msra.mxu0 %v1373_v6  ;;  %574 = vmatpush1.bf16.msra.mxu1 %v1375_v10  ;;  %v1383_v20 = vcombine.low %v37_v12, %v41_v13  ;;  %v1378_v6 = vcombine.high %v30_v63, %v34_v0  ;;  %v1380_v7 = vcombine.high %v31_v1, %v35_v2  ;;  %v38_v9 = vld [vmem:[%s2080_s1 + $0x50] sm:$0xff] }
   0x7   :  { %462 = vmatprep.subr.bf16.mxu0 %v1382_v11  ;;  %v1390_v21 = vcombine.high %v44_v14, %v48_v16  ;;  %575 = vmatprep.subr.bf16.mxu1 %v1384_v15  ;;  %v1392_v22 = vcombine.high %v45_v17, %v49_v18  ;;  %v52_v23 = vld [vmem:[%s2080_s1 + $0xc0] sm:$0xff]  ;;  %v53_v25 = vld [vmem:[%s2080_s1 + $0xc8] sm:$0xff]  ;;  %v1389_v27 = vcombine.low %v44_v14, %v48_v16  ;;  %v42_v10 = vld [vmem:[%s2080_s1 + $0x70] sm:$0xff] }
   0x8   :  { %v56_v24 = vld [vmem:[%s2080_s1 + $0xe0] sm:$0xff]  ;;  %v57_v26 = vld [vmem:[%s2080_s1 + $0xe8] sm:$0xff]  ;;  %v1391_v28 = vcombine.low %v45_v17, %v49_v18  ;;  %v1377_v11 = vcombine.low %v30_v63, %v34_v0  ;;  %v39_v12 = vld [vmem:[%s2080_s1 + $0x58] sm:$0xff]  ;;  %v1379_v14 = vcombine.low %v31_v1, %v35_v2  ;;  %v1386_v15 = vcombine.high %v38_v9, %v42_v10 }
   0x9   :  { %v1398_v29 = vcombine.high %v52_v23, %v56_v24  ;;  %v1400_v30 = vcombine.high %v53_v25, %v57_v26  ;;  %v60_v31 = vld [vmem:[%s2080_s1 + $0x100] sm:$0xff]  ;;  %v61_v33 = vld [vmem:[%s2080_s1 + $0x108] sm:$0xff]  ;;  %v1397_v35 = vcombine.low %v52_v23, %v56_v24  ;;  %v1399_v36 = vcombine.low %v53_v25, %v57_v26  ;;  %v43_v13 = vld [vmem:[%s2080_s1 + $0x78] sm:$0xff] }
   0xa   :  { %463 = vmatpush1.bf16.msra.mxu0 %v1381_v19  ;;  %576 = vmatpush1.bf16.msra.mxu1 %v1383_v20  ;;  %v64_v32 = vld [vmem:[%s2080_s1 + $0x120] sm:$0xff]  ;;  %v65_v34 = vld [vmem:[%s2080_s1 + $0x128] sm:$0xff]  ;;  %v46_v16 = vld [vmem:[%s2080_s1 + $0x90] sm:$0xff]  ;;  %v1388_v18 = vcombine.high %v39_v12, %v43_v13 }
   0xb   :  { %464 = vmatprep.subr.bf16.mxu0 %v1390_v21  ;;  %577 = vmatprep.subr.bf16.mxu1 %v1392_v22  ;;  %v1406_v37 = vcombine.high %v60_v31, %v64_v32  ;;  %v1408_v38 = vcombine.high %v61_v33, %v65_v34  ;;  %v68_v39 = vld [vmem:[%s2080_s1 + $0x140] sm:$0xff]  ;;  %v69_v41 = vld [vmem:[%s2080_s1 + $0x148] sm:$0xff]  ;;  %v1405_v43 = vcombine.low %v60_v31, %v64_v32  ;;  %v50_v17 = vld [vmem:[%s2080_s1 + $0xb0] sm:$0xff] }
   0xc   :  { %v72_v40 = vld [vmem:[%s2080_s1 + $0x160] sm:$0xff]  ;;  %v73_v42 = vld [vmem:[%s2080_s1 + $0x168] sm:$0xff]  ;;  %v1407_v44 = vcombine.low %v61_v33, %v65_v34  ;;  %v47_v19 = vld [vmem:[%s2080_s1 + $0x98] sm:$0xff]  ;;  %v1385_v21 = vcombine.low %v38_v9, %v42_v10  ;;  %v1387_v22 = vcombine.low %v39_v12, %v43_v13  ;;  %v1394_v23 = vcombine.high %v46_v16, %v50_v17 }
   0xd   :  { %v1414_v45 = vcombine.high %v68_v39, %v72_v40  ;;  %v1416_v46 = vcombine.high %v69_v41, %v73_v42  ;;  %v76_v47 = vld [vmem:[%s2080_s1 + $0x180] sm:$0xff]  ;;  %v77_v49 = vld [vmem:[%s2080_s1 + $0x188] sm:$0xff]  ;;  %v1413_v51 = vcombine.low %v68_v39, %v72_v40  ;;  %v1415_v52 = vcombine.low %v69_v41, %v73_v42  ;;  %v51_v20 = vld [vmem:[%s2080_s1 + $0xb8] sm:$0xff] }
   0xe   :  { %465 = vmatpush1.bf16.msra.mxu0 %v1389_v27  ;;  %578 = vmatpush1.bf16.msra.mxu1 %v1391_v28  ;;  %v80_v48 = vld [vmem:[%s2080_s1 + $0x1a0] sm:$0xff]  ;;  %v81_v50 = vld [vmem:[%s2080_s1 + $0x1a8] sm:$0xff]  ;;  %v1396_v24 = vcombine.high %v47_v19, %v51_v20  ;;  %v54_v26 = vld [vmem:[%s2080_s1 + $0xd0] sm:$0xff]  ;;  %v1395_v31 = vcombine.low %v47_v19, %v51_v20 }
   0xf   :  { %466 = vmatprep.subr.bf16.mxu0 %v1398_v29  ;;  %579 = vmatprep.subr.bf16.mxu1 %v1400_v30  ;;  %v1422_v53 = vcombine.high %v76_v47, %v80_v48  ;;  %v84_v54 = vld [vmem:[%s2080_s1 + $0x1c0] sm:$0xff]  ;;  %v1424_v55 = vcombine.high %v77_v49, %v81_v50  ;;  %v85_v57 = vld [vmem:[%s2080_s1 + $0x1c8] sm:$0xff]  ;;  %v1421_v59 = vcombine.low %v76_v47, %v80_v48  ;;  %v58_v27 = vld [vmem:[%s2080_s1 + $0xf0] sm:$0xff] }
  0x10   :  { %v88_v56 = vld [vmem:[%s2080_s1 + $0x1e0] sm:$0xff]  ;;  %v89_v58 = vld [vmem:[%s2080_s1 + $0x1e8] sm:$0xff]  ;;  %v1423_v60 = vcombine.low %v77_v49, %v81_v50  ;;  %v55_v28 = vld [vmem:[%s2080_s1 + $0xd8] sm:$0xff]  ;;  %v1393_v30 = vcombine.low %v46_v16, %v50_v17  ;;  %v1402_v32 = vcombine.high %v54_v26, %v58_v27 }
  0x11   :  { %v1430_v61 = vcombine.high %v84_v54, %v88_v56  ;;  %v1432_v62 = vcombine.high %v85_v57, %v89_v58  ;;  %v1429_v4 = vcombine.low %v84_v54, %v88_v56  ;;  %v1431_v5 = vcombine.low %v85_v57, %v89_v58  ;;  %v1735_v8 = vld [vmem:[%s2081_s0] sm:$0xff]   ;;  %v1768_v25 = vld [vmem:[%s2081_s0 + $0x8] sm:$0xff]   ;;  %v59_v29 = vld [vmem:[%s2080_s1 + $0xf8] sm:$0xff] }
  0x12   :  { %467 = vmatpush1.bf16.msra.mxu0 %v1397_v35  ;;  %580 = vmatpush1.bf16.msra.mxu1 %v1399_v36  ;;  %v1404_v33 = vcombine.high %v55_v28, %v59_v29  ;;  %v62_v34 = vld [vmem:[%s2080_s1 + $0x110] sm:$0xff]  ;;  %v63_v36 = vld [vmem:[%s2080_s1 + $0x118] sm:$0xff]  ;;  %v1403_v39 = vcombine.low %v55_v28, %v59_v29  ;;  %v1603_v9 = vld [vmem:[%s2081_s0 + $0x28] sm:$0xff]  }
  0x13   :  { %468 = vmatprep.subr.bf16.mxu0 %v1406_v37  ;;  %581 = vmatprep.subr.bf16.mxu1 %v1408_v38  ;;  %v66_v35 = vld [vmem:[%s2080_s1 + $0x130] sm:$0xff]  ;;  %v67_v37 = vld [vmem:[%s2080_s1 + $0x138] sm:$0xff]  ;;  %v1401_v38 = vcombine.low %v54_v26, %v58_v27 }
  0x14   :  { %v1410_v40 = vcombine.high %v62_v34, %v66_v35  ;;  %v1801_v41 = vld [vmem:[%s2081_s0 + $0x10] sm:$0xff]   ;;  %v1412_v42 = vcombine.high %v63_v36, %v67_v37  ;;  %v1409_v47 = vcombine.low %v62_v34, %v66_v35  ;;  %v1411_v48 = vcombine.low %v63_v36, %v67_v37  ;;  %v83_v54 = vld [vmem:[%s2080_s1 + $0x1b8] sm:$0xff] }
  0x15   :  { %v1601_v58 = vld [vmem:[%s2081_s0 + $0x18] sm:$0xff]   ;;  %v1604_v10 = vld [vmem:[%s2081_s0 + $0x30] sm:$0xff]  }
  0x16   :  { %469 = vmatpush1.bf16.msra.mxu0 %v1405_v43  ;;  %582 = vmatpush1.bf16.msra.mxu1 %v1407_v44  ;;  %v70_v43 = vld [vmem:[%s2080_s1 + $0x150] sm:$0xff]  ;;  %v91_v63 = vld [vmem:[%s2080_s1 + $0x1f8] sm:$0xff] }
  0x17   :  { %470 = vmatprep.subr.bf16.mxu0 %v1414_v45  ;;  %583 = vmatprep.subr.bf16.mxu1 %v1416_v46  ;;  %v74_v44 = vld [vmem:[%s2080_s1 + $0x170] sm:$0xff]  ;;  %v71_v45 = vld [vmem:[%s2080_s1 + $0x158] sm:$0xff] }
  0x18   :  { %v75_v46 = vld [vmem:[%s2080_s1 + $0x178] sm:$0xff]  ;;  %v1418_v49 = vcombine.high %v70_v43, %v74_v44 }
  0x19   :  { %v1420_v50 = vcombine.high %v71_v45, %v75_v46  ;;  %v1419_v56 = vcombine.low %v71_v45, %v75_v46 }
  0x1a   :  { %471 = vmatpush1.bf16.msra.mxu0 %v1413_v51  ;;  %584 = vmatpush1.bf16.msra.mxu1 %v1415_v52  ;;  %v78_v51 = vld [vmem:[%s2080_s1 + $0x190] sm:$0xff] }
  0x1b   :  { %472 = vmatprep.subr.bf16.mxu0 %v1422_v53  ;;  %585 = vmatprep.subr.bf16.mxu1 %v1424_v55  ;;  %v82_v52 = vld [vmem:[%s2080_s1 + $0x1b0] sm:$0xff]  ;;  %v79_v53 = vld [vmem:[%s2080_s1 + $0x198] sm:$0xff]  ;;  %v1417_v55 = vcombine.low %v70_v43, %v74_v44 }
  0x1c   :  { %v1426_v57 = vcombine.high %v78_v51, %v82_v52  ;;  %v1425_v0 = vcombine.low %v78_v51, %v82_v52  ;;  %v1427_v1 = vcombine.low %v79_v53, %v83_v54 }
  0x1e   :  { %473 = vmatpush1.bf16.msra.mxu0 %v1421_v59  ;;  %586 = vmatpush1.bf16.msra.mxu1 %v1423_v60  ;;  %v1428_v59 = vcombine.high %v79_v53, %v83_v54  ;;  %v86_v60 = vld [vmem:[%s2080_s1 + $0x1d0] sm:$0xff] }
  0x1f   :  { %474 = vmatprep.subr.bf16.mxu0 %v1430_v61  ;;  %587 = vmatprep.subr.bf16.mxu1 %v1432_v62  ;;  %v90_v61 = vld [vmem:[%s2080_s1 + $0x1f0] sm:$0xff]  ;;  %v87_v62 = vld [vmem:[%s2080_s1 + $0x1d8] sm:$0xff] }
  0x20   :  { %v1434_v2 = vcombine.high %v86_v60, %v90_v61 }
  0x22   :  { %475 = vmatpush1.bf16.msra.mxu0 %v1429_v4  ;;  %588 = vmatpush1.bf16.msra.mxu1 %v1431_v5  ;;  %v1436_v4 = vcombine.high %v87_v62, %v91_v63  ;;  %v1433_v5 = vcombine.low %v86_v60, %v90_v61 }
  0x23   :  { %686 = vmatprep.subr.bf16.mxu0 %v1378_v6  ;;  %799 = vmatprep.subr.bf16.mxu1 %v1380_v7  ;;  %v1435_v6 = vcombine.low %v87_v62, %v91_v63  ;;  %v1602_v7 = vld [vmem:[%s2081_s0 + $0x20] sm:$0xff]  }
  0x25   :  { %493 = vmatmul.mubr.bf16.vlgmr.msra.gmra.mrb[0].mxu0 %v1735_v8  ;;  %606 = vmatmul.mubr.bf16.vlgmr.msra.gmra.mrb[0].mxu1 %v1735_v8 }
  0x26   :  { %687 = vmatpush1.bf16.msra.mxu0 %v1377_v11  ;;  %800 = vmatpush1.bf16.msra.mxu1 %v1379_v14  ;;  %v1605_v11 = vld [vmem:[%s2081_s0 + $0x38] sm:$0xff]  }
  0x27   :  { %502 = vmatprep.mubr.bf16.mxu0 %v1606_v3  ;;  %615 = vmatprep.mubr.bf16.mxu1 %v1606_v3 }
  0x28   :  { %688 = vmatprep.subr.bf16.mxu0 %v1386_v15  ;;  %801 = vmatprep.subr.bf16.mxu1 %v1388_v18 }
  0x2a   :  { %689 = vmatpush1.bf16.msra.mxu0 %v1385_v21  ;;  %802 = vmatpush1.bf16.msra.mxu1 %v1387_v22 }
  0x2b   :  { %690 = vmatprep.subr.bf16.mxu0 %v1394_v23  ;;  %803 = vmatprep.subr.bf16.mxu1 %v1396_v24 }
  0x2d   :  { %503 = vmatmul.mubr.bf16.gmra.mrb[4].mxu0 %v1768_v25  ;;  %616 = vmatmul.mubr.bf16.gmra.mrb[4].mxu1 %v1768_v25 }
  0x2e   :  { %512 = vmatprep.mubr.bf16.mxu0 %v1606_v3  ;;  %625 = vmatprep.mubr.bf16.mxu1 %v1606_v3 }
  0x2f   :  { %691 = vmatpush1.bf16.msra.mxu0 %v1393_v30  ;;  %804 = vmatpush1.bf16.msra.mxu1 %v1395_v31 }
  0x30   :  { %692 = vmatprep.subr.bf16.mxu0 %v1402_v32  ;;  %805 = vmatprep.subr.bf16.mxu1 %v1404_v33 }
  0x33   :  { %693 = vmatpush1.bf16.msra.mxu0 %v1401_v38  ;;  %806 = vmatpush1.bf16.msra.mxu1 %v1403_v39 }
  0x34   :  { %694 = vmatprep.subr.bf16.mxu0 %v1410_v40  ;;  %807 = vmatprep.subr.bf16.mxu1 %v1412_v42 }
  0x35   :  { %513 = vmatmul.mubr.bf16.gmra.mrb[8].mxu0 %v1801_v41  ;;  %626 = vmatmul.mubr.bf16.gmra.mrb[8].mxu1 %v1801_v41 }
  0x36   :  { %522 = vmatprep.mubr.bf16.mxu0 %v1606_v3  ;;  %635 = vmatprep.mubr.bf16.mxu1 %v1606_v3 }
  0x37   :  { %695 = vmatpush1.bf16.msra.mxu0 %v1409_v47  ;;  %808 = vmatpush1.bf16.msra.mxu1 %v1411_v48 }
  0x38   :  { %696 = vmatprep.subr.bf16.mxu0 %v1418_v49  ;;  %809 = vmatprep.subr.bf16.mxu1 %v1420_v50 }
  0x3b   :  { %697 = vmatpush1.bf16.msra.mxu0 %v1417_v55  ;;  %810 = vmatpush1.bf16.msra.mxu1 %v1419_v56 }
  0x3c   :  { %698 = vmatprep.subr.bf16.mxu0 %v1426_v57  ;;  %811 = vmatprep.subr.bf16.mxu1 %v1428_v59 }
  0x3d   :  { %523 = vmatmul.mubr.bf16.gmra.mrb[12].mxu0 %v1601_v58  ;;  %636 = vmatmul.mubr.bf16.gmra.mrb[12].mxu1 %v1601_v58 }
  0x3e   :  { %532 = vmatprep.mubr.bf16.mxu0 %v1606_v3  ;;  %645 = vmatprep.mubr.bf16.mxu1 %v1606_v3 }
  0x3f   :  { %699 = vmatpush1.bf16.msra.mxu0 %v1425_v0  ;;  %812 = vmatpush1.bf16.msra.mxu1 %v1427_v1 }
  0x40   :  { %700 = vmatprep.subr.bf16.mxu0 %v1434_v2  ;;  %813 = vmatprep.subr.bf16.mxu1 %v1436_v4 }
  0x43   :  { %701 = vmatpush1.bf16.msra.mxu0 %v1433_v5  ;;  %814 = vmatpush1.bf16.msra.mxu1 %v1435_v6 }
  0x45   :  { %533 = vmatmul.mubr.bf16.gmra.mrb[16].mxu0 %v1602_v7  ;;  %646 = vmatmul.mubr.bf16.gmra.mrb[16].mxu1 %v1602_v7 }
  0x46   :  { %542 = vmatprep.mubr.bf16.mxu0 %v1606_v3  ;;  %655 = vmatprep.mubr.bf16.mxu1 %v1606_v3 }
  0x4d   :  { %543 = vmatmul.mubr.bf16.gmra.mrb[20].mxu0 %v1603_v9  ;;  %656 = vmatmul.mubr.bf16.gmra.mrb[20].mxu1 %v1603_v9 }
  0x4e   :  { %552 = vmatprep.mubr.bf16.mxu0 %v1606_v3  ;;  %665 = vmatprep.mubr.bf16.mxu1 %v1606_v3 }
  0x55   :  { %553 = vmatmul.mubr.bf16.gmra.mrb[24].mxu0 %v1604_v10  ;;  %666 = vmatmul.mubr.bf16.gmra.mrb[24].mxu1 %v1604_v10 }
  0x56   :  { %562 = vmatprep.mubr.bf16.mxu0 %v1606_v3  ;;  %675 = vmatprep.mubr.bf16.mxu1 %v1606_v3 }
  0x5d   :  { %563 = vmatmul.mubr.bf16.gmra.mrb[28].mxu0 %v1605_v11  ;;  %676 = vmatmul.mubr.bf16.gmra.mrb[28].mxu1 %v1605_v11 }
  0x5e   :  { %718 = vmatprep.mubr.bf16.mxu0 %v1606_v3  ;;  %831 = vmatprep.mubr.bf16.mxu1 %v1606_v3 }
  0x65   :  { %719 = vmatmul.mubr.bf16.vlgmr.msra.gmra.mrb[32].mxu0 %v1735_v8  ;;  %832 = vmatmul.mubr.bf16.vlgmr.msra.gmra.mrb[32].mxu1 %v1735_v8 }
  0x66   :  { %728 = vmatprep.mubr.bf16.mxu0 %v1606_v3  ;;  %841 = vmatprep.mubr.bf16.mxu1 %v1606_v3 }
  0x6d   :  { %729 = vmatmul.mubr.bf16.gmra.mrb[36].mxu0 %v1768_v25  ;;  %842 = vmatmul.mubr.bf16.gmra.mrb[36].mxu1 %v1768_v25 }
  0x6e   :  { %738 = vmatprep.mubr.bf16.mxu0 %v1606_v3  ;;  %851 = vmatprep.mubr.bf16.mxu1 %v1606_v3 }
  0x75   :  { %739 = vmatmul.mubr.bf16.gmra.mrb[40].mxu0 %v1801_v41  ;;  %852 = vmatmul.mubr.bf16.gmra.mrb[40].mxu1 %v1801_v41 }
  0x76   :  { %748 = vmatprep.mubr.bf16.mxu0 %v1606_v3  ;;  %861 = vmatprep.mubr.bf16.mxu1 %v1606_v3 }
  0x7d   :  { %749 = vmatmul.mubr.bf16.gmra.mrb[44].mxu0 %v1601_v58  ;;  %862 = vmatmul.mubr.bf16.gmra.mrb[44].mxu1 %v1601_v58 }
  0x7e   :  { %758 = vmatprep.mubr.bf16.mxu0 %v1606_v3  ;;  %871 = vmatprep.mubr.bf16.mxu1 %v1606_v3 }
  0x85   :  { %759 = vmatmul.mubr.bf16.gmra.mrb[48].mxu0 %v1602_v7  ;;  %872 = vmatmul.mubr.bf16.gmra.mrb[48].mxu1 %v1602_v7 }
  0x86   :  { %768 = vmatprep.mubr.bf16.mxu0 %v1606_v3  ;;  %881 = vmatprep.mubr.bf16.mxu1 %v1606_v3 }
  0x8d   :  { %769 = vmatmul.mubr.bf16.gmra.mrb[52].mxu0 %v1603_v9  ;;  %882 = vmatmul.mubr.bf16.gmra.mrb[52].mxu1 %v1603_v9 }
  0x8e   :  { %778 = vmatprep.mubr.bf16.mxu0 %v1606_v3  ;;  %891 = vmatprep.mubr.bf16.mxu1 %v1606_v3 }
  0x95   :  { %779 = vmatmul.mubr.bf16.gmra.mrb[56].mxu0 %v1604_v10  ;;  %892 = vmatmul.mubr.bf16.gmra.mrb[56].mxu1 %v1604_v10 }
  0x96   :  { %788 = vmatprep.mubr.bf16.mxu0 %v1606_v3  ;;  %901 = vmatprep.mubr.bf16.mxu1 %v1606_v3 }
  0x9d   :  { %789 = vmatmul.mubr.bf16.gmra.mrb[60].mxu0 %v1605_v11  ;;  %902 = vmatmul.mubr.bf16.gmra.mrb[60].mxu1 %v1605_v11 }
  0xf8   :  { %v494_v8 = vpop.f32.mrb[0].mxu0  ;;  %v607_v12 = vpop.f32.mrb[0].mxu1 }
  0xf9   :  { %v496_v13 = vpop.f32.mrb[1].mxu0  ;;  %v609_v15 = vpop.f32.mrb[1].mxu1 }
  0xfa   :  { %v1533_v14 = vpack.c.bf16 %v496_v13, %v494_v8  ;;  %v498_v16 = vpop.f32.mrb[2].mxu0  ;;  %v1534_v17 = vpack.c.bf16 %v609_v15, %v607_v12  ;;  %v611_v18 = vpop.f32.mrb[2].mxu1 }
  0xfb   :  { %v500_v19 = vpop.f32.mrb[3].mxu0  ;;  %v613_v21 = vpop.f32.mrb[3].mxu1 }
  0xfc   :  { %1104 = vst [vmem:[%s2082_s2] sm:$0xff] %v1533_v14  ;;  %v1535_v20 = vpack.c.bf16 %v500_v19, %v498_v16  ;;  %1105 = vst [vmem:[%s2082_s2 + $0x8] sm:$0xff] %v1534_v17  ;;  %v1536_v3 = vpack.c.bf16 %v613_v21, %v611_v18 }
  0xfe   :  { %1106 = vst [vmem:[%s2082_s2 + $0x10] sm:$0xff] %v1535_v20  ;;  %1107 = vst [vmem:[%s2082_s2 + $0x18] sm:$0xff] %v1536_v3 }
 0x100   :  { %v504_v22 = vpop.f32.mrb[4].mxu0  ;;  %v617_v23 = vpop.f32.mrb[4].mxu1 }
 0x101   :  { %v506_v24 = vpop.f32.mrb[5].mxu0  ;;  %v619_v26 = vpop.f32.mrb[5].mxu1 }
 0x102   :  { %v1537_v25 = vpack.c.bf16 %v506_v24, %v504_v22  ;;  %v508_v27 = vpop.f32.mrb[6].mxu0  ;;  %v1538_v28 = vpack.c.bf16 %v619_v26, %v617_v23  ;;  %v621_v29 = vpop.f32.mrb[6].mxu1 }
 0x103   :  { %v510_v30 = vpop.f32.mrb[7].mxu0  ;;  %v623_v32 = vpop.f32.mrb[7].mxu1 }
 0x104   :  { %1108 = vst [vmem:[%s2082_s2 + $0x20] sm:$0xff] %v1537_v25  ;;  %v1539_v31 = vpack.c.bf16 %v510_v30, %v508_v27  ;;  %1109 = vst [vmem:[%s2082_s2 + $0x28] sm:$0xff] %v1538_v28  ;;  %v1540_v33 = vpack.c.bf16 %v623_v32, %v621_v29 }
 0x106   :  { %1110 = vst [vmem:[%s2082_s2 + $0x30] sm:$0xff] %v1539_v31  ;;  %1111 = vst [vmem:[%s2082_s2 + $0x38] sm:$0xff] %v1540_v33 }
 0x108   :  { %v514_v34 = vpop.f32.mrb[8].mxu0  ;;  %v627_v35 = vpop.f32.mrb[8].mxu1 }
 0x109   :  { %v516_v36 = vpop.f32.mrb[9].mxu0  ;;  %v629_v38 = vpop.f32.mrb[9].mxu1 }
 0x10a   :  { %v1541_v37 = vpack.c.bf16 %v516_v36, %v514_v34  ;;  %v518_v39 = vpop.f32.mrb[10].mxu0  ;;  %v1542_v40 = vpack.c.bf16 %v629_v38, %v627_v35  ;;  %v631_v41 = vpop.f32.mrb[10].mxu1 }
 0x10b   :  { %v520_v42 = vpop.f32.mrb[11].mxu0  ;;  %v633_v44 = vpop.f32.mrb[11].mxu1 }
 0x10c   :  { %1112 = vst [vmem:[%s2082_s2 + $0x40] sm:$0xff] %v1541_v37  ;;  %v1543_v43 = vpack.c.bf16 %v520_v42, %v518_v39  ;;  %1113 = vst [vmem:[%s2082_s2 + $0x48] sm:$0xff] %v1542_v40  ;;  %v1544_v45 = vpack.c.bf16 %v633_v44, %v631_v41 }
 0x10e   :  { %1114 = vst [vmem:[%s2082_s2 + $0x50] sm:$0xff] %v1543_v43  ;;  %1115 = vst [vmem:[%s2082_s2 + $0x58] sm:$0xff] %v1544_v45 }
 0x110   :  { %v524_v46 = vpop.f32.mrb[12].mxu0  ;;  %v637_v47 = vpop.f32.mrb[12].mxu1 }
 0x111   :  { %v526_v48 = vpop.f32.mrb[13].mxu0  ;;  %v639_v50 = vpop.f32.mrb[13].mxu1 }
 0x112   :  { %v1545_v49 = vpack.c.bf16 %v526_v48, %v524_v46  ;;  %v528_v51 = vpop.f32.mrb[14].mxu0  ;;  %v1546_v52 = vpack.c.bf16 %v639_v50, %v637_v47  ;;  %v641_v53 = vpop.f32.mrb[14].mxu1 }
 0x113   :  { %v530_v54 = vpop.f32.mrb[15].mxu0  ;;  %v643_v56 = vpop.f32.mrb[15].mxu1 }
 0x114   :  { %1116 = vst [vmem:[%s2082_s2 + $0x60] sm:$0xff] %v1545_v49  ;;  %v1547_v55 = vpack.c.bf16 %v530_v54, %v528_v51  ;;  %1117 = vst [vmem:[%s2082_s2 + $0x68] sm:$0xff] %v1546_v52  ;;  %v1548_v57 = vpack.c.bf16 %v643_v56, %v641_v53 }
 0x116   :  { %1118 = vst [vmem:[%s2082_s2 + $0x70] sm:$0xff] %v1547_v55  ;;  %1119 = vst [vmem:[%s2082_s2 + $0x78] sm:$0xff] %v1548_v57 }
 0x118   :  { %v534_v58 = vpop.f32.mrb[16].mxu0  ;;  %v647_v59 = vpop.f32.mrb[16].mxu1 }
 0x119   :  { %v536_v60 = vpop.f32.mrb[17].mxu0  ;;  %v649_v62 = vpop.f32.mrb[17].mxu1 }
 0x11a   :  { %v1549_v61 = vpack.c.bf16 %v536_v60, %v534_v58  ;;  %v538_v63 = vpop.f32.mrb[18].mxu0  ;;  %v1550_v0 = vpack.c.bf16 %v649_v62, %v647_v59  ;;  %v651_v1 = vpop.f32.mrb[18].mxu1 }
 0x11b   :  { %v540_v2 = vpop.f32.mrb[19].mxu0  ;;  %v653_v5 = vpop.f32.mrb[19].mxu1 }
 0x11c   :  { %1120 = vst [vmem:[%s2082_s2 + $0x80] sm:$0xff] %v1549_v61  ;;  %v1551_v4 = vpack.c.bf16 %v540_v2, %v538_v63  ;;  %1121 = vst [vmem:[%s2082_s2 + $0x88] sm:$0xff] %v1550_v0  ;;  %v1552_v6 = vpack.c.bf16 %v653_v5, %v651_v1 }
 0x11e   :  { %1122 = vst [vmem:[%s2082_s2 + $0x90] sm:$0xff] %v1551_v4  ;;  %1123 = vst [vmem:[%s2082_s2 + $0x98] sm:$0xff] %v1552_v6 }
 0x120   :  { %v544_v7 = vpop.f32.mrb[20].mxu0  ;;  %v657_v9 = vpop.f32.mrb[20].mxu1 }
 0x121   :  { %v546_v10 = vpop.f32.mrb[21].mxu0  ;;  %v659_v8 = vpop.f32.mrb[21].mxu1 }
 0x122   :  { %v1553_v11 = vpack.c.bf16 %v546_v10, %v544_v7  ;;  %v548_v12 = vpop.f32.mrb[22].mxu0  ;;  %v1554_v13 = vpack.c.bf16 %v659_v8, %v657_v9  ;;  %v661_v14 = vpop.f32.mrb[22].mxu1 }
 0x123   :  { %v550_v15 = vpop.f32.mrb[23].mxu0  ;;  %v663_v17 = vpop.f32.mrb[23].mxu1 }
 0x124   :  { %1124 = vst [vmem:[%s2082_s2 + $0xa0] sm:$0xff] %v1553_v11  ;;  %v1555_v16 = vpack.c.bf16 %v550_v15, %v548_v12  ;;  %1125 = vst [vmem:[%s2082_s2 + $0xa8] sm:$0xff] %v1554_v13  ;;  %v1556_v18 = vpack.c.bf16 %v663_v17, %v661_v14 }
 0x126   :  { %1126 = vst [vmem:[%s2082_s2 + $0xb0] sm:$0xff] %v1555_v16  ;;  %1127 = vst [vmem:[%s2082_s2 + $0xb8] sm:$0xff] %v1556_v18 }
 0x128   :  { %v554_v19 = vpop.f32.mrb[24].mxu0  ;;  %v667_v20 = vpop.f32.mrb[24].mxu1 }
 0x129   :  { %v556_v21 = vpop.f32.mrb[25].mxu0  ;;  %v669_v22 = vpop.f32.mrb[25].mxu1 }
 0x12a   :  { %v1557_v3 = vpack.c.bf16 %v556_v21, %v554_v19  ;;  %v558_v23 = vpop.f32.mrb[26].mxu0  ;;  %v1558_v24 = vpack.c.bf16 %v669_v22, %v667_v20  ;;  %v671_v25 = vpop.f32.mrb[26].mxu1 }
 0x12b   :  { %v560_v26 = vpop.f32.mrb[27].mxu0  ;;  %v673_v28 = vpop.f32.mrb[27].mxu1 }
 0x12c   :  { %1128 = vst [vmem:[%s2082_s2 + $0xc0] sm:$0xff] %v1557_v3  ;;  %v1559_v27 = vpack.c.bf16 %v560_v26, %v558_v23  ;;  %1129 = vst [vmem:[%s2082_s2 + $0xc8] sm:$0xff] %v1558_v24  ;;  %v1560_v29 = vpack.c.bf16 %v673_v28, %v671_v25 }
 0x12e   :  { %1130 = vst [vmem:[%s2082_s2 + $0xd0] sm:$0xff] %v1559_v27  ;;  %1131 = vst [vmem:[%s2082_s2 + $0xd8] sm:$0xff] %v1560_v29 }
 0x130   :  { %v564_v30 = vpop.f32.mrb[28].mxu0  ;;  %v677_v31 = vpop.f32.mrb[28].mxu1 }
 0x131   :  { %v566_v32 = vpop.f32.mrb[29].mxu0  ;;  %v679_v34 = vpop.f32.mrb[29].mxu1 }
 0x132   :  { %v1561_v33 = vpack.c.bf16 %v566_v32, %v564_v30  ;;  %v568_v35 = vpop.f32.mrb[30].mxu0  ;;  %v1562_v36 = vpack.c.bf16 %v679_v34, %v677_v31  ;;  %v681_v37 = vpop.f32.mrb[30].mxu1 }
 0x133   :  { %v570_v38 = vpop.f32.mrb[31].mxu0  ;;  %v683_v40 = vpop.f32.mrb[31].mxu1 }
 0x134   :  { %1132 = vst [vmem:[%s2082_s2 + $0xe0] sm:$0xff] %v1561_v33  ;;  %v1563_v39 = vpack.c.bf16 %v570_v38, %v568_v35  ;;  %1133 = vst [vmem:[%s2082_s2 + $0xe8] sm:$0xff] %v1562_v36  ;;  %v1564_v41 = vpack.c.bf16 %v683_v40, %v681_v37 }
 0x136   :  { %1134 = vst [vmem:[%s2082_s2 + $0xf0] sm:$0xff] %v1563_v39  ;;  %1135 = vst [vmem:[%s2082_s2 + $0xf8] sm:$0xff] %v1564_v41 }
 0x138   :  { %v720_v42 = vpop.f32.mrb[32].mxu0  ;;  %v833_v43 = vpop.f32.mrb[32].mxu1 }
 0x139   :  { %v722_v44 = vpop.f32.mrb[33].mxu0  ;;  %v835_v46 = vpop.f32.mrb[33].mxu1 }
 0x13a   :  { %v1565_v45 = vpack.c.bf16 %v722_v44, %v720_v42  ;;  %v724_v47 = vpop.f32.mrb[34].mxu0  ;;  %v1566_v48 = vpack.c.bf16 %v835_v46, %v833_v43  ;;  %v837_v49 = vpop.f32.mrb[34].mxu1 }
 0x13b   :  { %v726_v50 = vpop.f32.mrb[35].mxu0  ;;  %v839_v52 = vpop.f32.mrb[35].mxu1 }
 0x13c   :  { %1501 = vst [vmem:[%s2082_s2 + $0x100] sm:$0xff] %v1565_v45  ;;  %v1567_v51 = vpack.c.bf16 %v726_v50, %v724_v47  ;;  %1502 = vst [vmem:[%s2082_s2 + $0x108] sm:$0xff] %v1566_v48  ;;  %v1568_v53 = vpack.c.bf16 %v839_v52, %v837_v49 }
 0x13e   :  { %1503 = vst [vmem:[%s2082_s2 + $0x110] sm:$0xff] %v1567_v51  ;;  %1504 = vst [vmem:[%s2082_s2 + $0x118] sm:$0xff] %v1568_v53 }
 0x140   :  { %v730_v54 = vpop.f32.mrb[36].mxu0  ;;  %v843_v55 = vpop.f32.mrb[36].mxu1 }
 0x141   :  { %v732_v56 = vpop.f32.mrb[37].mxu0  ;;  %v845_v58 = vpop.f32.mrb[37].mxu1 }
 0x142   :  { %v1569_v57 = vpack.c.bf16 %v732_v56, %v730_v54  ;;  %v734_v59 = vpop.f32.mrb[38].mxu0  ;;  %v1570_v60 = vpack.c.bf16 %v845_v58, %v843_v55  ;;  %v847_v61 = vpop.f32.mrb[38].mxu1 }
 0x143   :  { %v736_v62 = vpop.f32.mrb[39].mxu0  ;;  %v849_v0 = vpop.f32.mrb[39].mxu1 }
 0x144   :  { %1505 = vst [vmem:[%s2082_s2 + $0x120] sm:$0xff] %v1569_v57  ;;  %v1571_v63 = vpack.c.bf16 %v736_v62, %v734_v59  ;;  %1506 = vst [vmem:[%s2082_s2 + $0x128] sm:$0xff] %v1570_v60  ;;  %v1572_v1 = vpack.c.bf16 %v849_v0, %v847_v61 }
 0x146   :  { %1507 = vst [vmem:[%s2082_s2 + $0x130] sm:$0xff] %v1571_v63  ;;  %1508 = vst [vmem:[%s2082_s2 + $0x138] sm:$0xff] %v1572_v1 }
 0x148   :  { %v740_v2 = vpop.f32.mrb[40].mxu0  ;;  %v853_v4 = vpop.f32.mrb[40].mxu1 }
 0x149   :  { %v742_v5 = vpop.f32.mrb[41].mxu0  ;;  %v855_v7 = vpop.f32.mrb[41].mxu1 }
 0x14a   :  { %v1573_v6 = vpack.c.bf16 %v742_v5, %v740_v2  ;;  %v744_v9 = vpop.f32.mrb[42].mxu0  ;;  %v1574_v10 = vpack.c.bf16 %v855_v7, %v853_v4  ;;  %v857_v11 = vpop.f32.mrb[42].mxu1 }
 0x14b   :  { %v746_v8 = vpop.f32.mrb[43].mxu0  ;;  %v859_v13 = vpop.f32.mrb[43].mxu1 }
 0x14c   :  { %1509 = vst [vmem:[%s2082_s2 + $0x140] sm:$0xff] %v1573_v6  ;;  %v1575_v12 = vpack.c.bf16 %v746_v8, %v744_v9  ;;  %1510 = vst [vmem:[%s2082_s2 + $0x148] sm:$0xff] %v1574_v10  ;;  %v1576_v14 = vpack.c.bf16 %v859_v13, %v857_v11 }
 0x14e   :  { %1511 = vst [vmem:[%s2082_s2 + $0x150] sm:$0xff] %v1575_v12  ;;  %1512 = vst [vmem:[%s2082_s2 + $0x158] sm:$0xff] %v1576_v14 }
 0x150   :  { %v750_v15 = vpop.f32.mrb[44].mxu0  ;;  %v863_v16 = vpop.f32.mrb[44].mxu1 }
 0x151   :  { %v752_v17 = vpop.f32.mrb[45].mxu0  ;;  %v865_v19 = vpop.f32.mrb[45].mxu1 }
 0x152   :  { %v1577_v18 = vpack.c.bf16 %v752_v17, %v750_v15  ;;  %v754_v20 = vpop.f32.mrb[46].mxu0  ;;  %v1578_v21 = vpack.c.bf16 %v865_v19, %v863_v16  ;;  %v867_v3 = vpop.f32.mrb[46].mxu1 }
 0x153   :  { %v756_v22 = vpop.f32.mrb[47].mxu0  ;;  %v869_v24 = vpop.f32.mrb[47].mxu1 }
 0x154   :  { %1513 = vst [vmem:[%s2082_s2 + $0x160] sm:$0xff] %v1577_v18  ;;  %v1579_v23 = vpack.c.bf16 %v756_v22, %v754_v20  ;;  %1514 = vst [vmem:[%s2082_s2 + $0x168] sm:$0xff] %v1578_v21  ;;  %v1580_v25 = vpack.c.bf16 %v869_v24, %v867_v3 }
 0x156   :  { %1515 = vst [vmem:[%s2082_s2 + $0x170] sm:$0xff] %v1579_v23  ;;  %1516 = vst [vmem:[%s2082_s2 + $0x178] sm:$0xff] %v1580_v25 }
 0x158   :  { %v760_v26 = vpop.f32.mrb[48].mxu0  ;;  %v873_v27 = vpop.f32.mrb[48].mxu1 }
 0x159   :  { %v762_v28 = vpop.f32.mrb[49].mxu0  ;;  %v875_v30 = vpop.f32.mrb[49].mxu1 }
 0x15a   :  { %v1581_v29 = vpack.c.bf16 %v762_v28, %v760_v26  ;;  %v764_v31 = vpop.f32.mrb[50].mxu0  ;;  %v1582_v32 = vpack.c.bf16 %v875_v30, %v873_v27  ;;  %v877_v33 = vpop.f32.mrb[50].mxu1 }
 0x15b   :  { %v766_v34 = vpop.f32.mrb[51].mxu0  ;;  %v879_v36 = vpop.f32.mrb[51].mxu1 }
 0x15c   :  { %1517 = vst [vmem:[%s2082_s2 + $0x180] sm:$0xff] %v1581_v29  ;;  %v1583_v35 = vpack.c.bf16 %v766_v34, %v764_v31  ;;  %1518 = vst [vmem:[%s2082_s2 + $0x188] sm:$0xff] %v1582_v32  ;;  %v1584_v37 = vpack.c.bf16 %v879_v36, %v877_v33 }
 0x15e   :  { %1519 = vst [vmem:[%s2082_s2 + $0x190] sm:$0xff] %v1583_v35  ;;  %1520 = vst [vmem:[%s2082_s2 + $0x198] sm:$0xff] %v1584_v37 }
 0x160   :  { %v770_v38 = vpop.f32.mrb[52].mxu0  ;;  %v883_v39 = vpop.f32.mrb[52].mxu1 }
 0x161   :  { %v772_v40 = vpop.f32.mrb[53].mxu0  ;;  %v885_v42 = vpop.f32.mrb[53].mxu1 }
 0x162   :  { %v1585_v41 = vpack.c.bf16 %v772_v40, %v770_v38  ;;  %v774_v43 = vpop.f32.mrb[54].mxu0  ;;  %v1586_v44 = vpack.c.bf16 %v885_v42, %v883_v39  ;;  %v887_v45 = vpop.f32.mrb[54].mxu1 }
 0x163   :  { %v776_v46 = vpop.f32.mrb[55].mxu0  ;;  %v889_v48 = vpop.f32.mrb[55].mxu1 }
 0x164   :  { %1521 = vst [vmem:[%s2082_s2 + $0x1a0] sm:$0xff] %v1585_v41  ;;  %v1587_v47 = vpack.c.bf16 %v776_v46, %v774_v43  ;;  %1522 = vst [vmem:[%s2082_s2 + $0x1a8] sm:$0xff] %v1586_v44  ;;  %v1588_v49 = vpack.c.bf16 %v889_v48, %v887_v45 }
 0x166   :  { %1523 = vst [vmem:[%s2082_s2 + $0x1b0] sm:$0xff] %v1587_v47  ;;  %1524 = vst [vmem:[%s2082_s2 + $0x1b8] sm:$0xff] %v1588_v49 }
 0x168   :  { %v780_v50 = vpop.f32.mrb[56].mxu0  ;;  %v893_v51 = vpop.f32.mrb[56].mxu1 }
 0x169   :  { %v782_v52 = vpop.f32.mrb[57].mxu0  ;;  %v895_v54 = vpop.f32.mrb[57].mxu1 }
 0x16a   :  { %v1589_v53 = vpack.c.bf16 %v782_v52, %v780_v50  ;;  %v784_v55 = vpop.f32.mrb[58].mxu0  ;;  %v1590_v56 = vpack.c.bf16 %v895_v54, %v893_v51  ;;  %v897_v57 = vpop.f32.mrb[58].mxu1 }
 0x16b   :  { %v786_v58 = vpop.f32.mrb[59].mxu0  ;;  %v899_v60 = vpop.f32.mrb[59].mxu1 }
 0x16c   :  { %1525 = vst [vmem:[%s2082_s2 + $0x1c0] sm:$0xff] %v1589_v53  ;;  %v1591_v59 = vpack.c.bf16 %v786_v58, %v784_v55  ;;  %1526 = vst [vmem:[%s2082_s2 + $0x1c8] sm:$0xff] %v1590_v56  ;;  %v1592_v61 = vpack.c.bf16 %v899_v60, %v897_v57 }
 0x16e   :  { %1527 = vst [vmem:[%s2082_s2 + $0x1d0] sm:$0xff] %v1591_v59  ;;  %1528 = vst [vmem:[%s2082_s2 + $0x1d8] sm:$0xff] %v1592_v61 }
 0x170   :  { %v790_v62 = vpop.f32.mrb[60].mxu0  ;;  %v903_v63 = vpop.f32.mrb[60].mxu1 }
 0x171   :  { %v792_v0 = vpop.f32.mrb[61].mxu0  ;;  %v905_v2 = vpop.f32.mrb[61].mxu1 }
 0x172   :  { %v1593_v1 = vpack.c.bf16 %v792_v0, %v790_v62  ;;  %v794_v4 = vpop.f32.mrb[62].mxu0  ;;  %v1594_v5 = vpack.c.bf16 %v905_v2, %v903_v63  ;;  %v907_v6 = vpop.f32.mrb[62].mxu1 }
 0x173   :  { %v796_v7 = vpop.f32.mrb[63].mxu0  ;;  %v909_v10 = vpop.f32.mrb[63].mxu1 }
 0x174   :  { %1529 = vst [vmem:[%s2082_s2 + $0x1e0] sm:$0xff] %v1593_v1  ;;  %v1595_v9 = vpack.c.bf16 %v796_v7, %v794_v4  ;;  %1530 = vst [vmem:[%s2082_s2 + $0x1e8] sm:$0xff] %v1594_v5  ;;  %v1596_v11 = vpack.c.bf16 %v909_v10, %v907_v6 }
 0x176   :  { %1531 = vst [vmem:[%s2082_s2 + $0x1f0] sm:$0xff] %v1595_v9  ;;  %1532 = vst [vmem:[%s2082_s2 + $0x1f8] sm:$0xff] %v1596_v11 }

// kernel: bilstm_forward.5
= control target key start
LH: loop header
LB: loop body
LE: loop exit
PB: predicated region body
PF: predicated region fallthrough
CT: control target
= control target key end

     0   :  { %s1153_s1 = inlined_call_operand.vmem [shape: bf16[256,128], index: 1, kind: input, shape index: {}]   ;;  %s1154_s0 = inlined_call_operand.vmem [shape: bf16[2,128,128], index: 0, kind: input, shape index: {}]   ;;  %s1155_s3 = inlined_call_operand.vmem [shape: bf16[128,128], index: 3, kind: input, shape index: {}]   ;;  %s1156_s2 = inlined_call_operand.vmem [shape: f32[1,128], index: 2, kind: input, shape index: {}]   ;;  %s1157_s4 = inlined_call_operand.vmem [shape: f32[1,128], index: 4, kind: input, shape index: {}]   ;;  %s1158_s5 = inlined_call_operand.vmem [shape: f32[128,128], index: 5, kind: output, shape index: {}]  }
   0x1   :  { %v811_v0 = vld [vmem:[%s1153_s1 + $0x40] sm:$0xff]   ;;  %v813_v2 = vld [vmem:[%s1153_s1 + $0x48] sm:$0xff]   ;;  %v815_v4 = vld [vmem:[%s1153_s1 + $0x50] sm:$0xff]  }
   0x2   :  { %v812_v1 = vld [vmem:[%s1153_s1] sm:$0xff]   ;;  %699 = vmatprep.subr.bf16.mxu0 %v811_v0  ;;  %v814_v3 = vld [vmem:[%s1153_s1 + $0x8] sm:$0xff]   ;;  %v816_v5 = vld [vmem:[%s1153_s1 + $0x10] sm:$0xff]  }
   0x3   :  { %700 = vmatpush3.bf16.msra.mxu0 %v812_v1  ;;  %v817_v6 = vld [vmem:[%s1153_s1 + $0x58] sm:$0xff]   ;;  %v819_v8 = vld [vmem:[%s1153_s1 + $0x60] sm:$0xff]   ;;  %v821_v10 = vld [vmem:[%s1153_s1 + $0x68] sm:$0xff]  }
   0x4   :  { %701 = vmatprep.subr.bf16.mxu0 %v813_v2  ;;  %v818_v7 = vld [vmem:[%s1153_s1 + $0x18] sm:$0xff]   ;;  %v820_v9 = vld [vmem:[%s1153_s1 + $0x20] sm:$0xff]   ;;  %v692_v13 = vld [vmem:[%s1154_s0 + $0x48] sm:$0xff]  }
   0x5   :  { %v691_v11 = vld [vmem:[%s1154_s0 + $0x40] sm:$0xff]   ;;  %v684_v18 = vld [vmem:[%s1154_s0 + $0x8] sm:$0xff]   ;;  %v658_v20 = vunpack.c.l.bf16 %v692_v13  ;;  %v823_v21 = vld [vmem:[%s1153_s1 + $0x70] sm:$0xff]   ;;  %v659_v22 = vunpack.c.h.bf16 %v692_v13 }
   0x6   :  { %v621_v12 = vld [vmem:[%s1154_s0] sm:$0xff]   ;;  %v654_v14 = vunpack.c.l.bf16 %v691_v11  ;;  %v655_v15 = vunpack.c.h.bf16 %v691_v11  ;;  %v822_v19 = vld [vmem:[%s1153_s1 + $0x28] sm:$0xff]   ;;  %v693_v23 = vld [vmem:[%s1154_s0 + $0x50] sm:$0xff]   ;;  %v626_v25 = vunpack.c.l.bf16 %v684_v18  ;;  %v627_v27 = vunpack.c.h.bf16 %v684_v18 }
   0x7   :  { %702 = vmatpush3.bf16.msra.mxu0 %v814_v3  ;;  %v622_v16 = vunpack.c.l.bf16 %v621_v12  ;;  %v623_v17 = vunpack.c.h.bf16 %v621_v12  ;;  %v824_v24 = vld [vmem:[%s1153_s1 + $0x30] sm:$0xff]   ;;  %v825_v26 = vld [vmem:[%s1153_s1 + $0x78] sm:$0xff]   ;;  %v827_v28 = vld [vmem:[%s1155_s3] sm:$0xff]   ;;  %v662_v29 = vunpack.c.l.bf16 %v693_v23  ;;  %v663_v31 = vunpack.c.h.bf16 %v693_v23 }
   0x8   :  { %703 = vmatprep.subr.bf16.mxu0 %v815_v4  ;;  %835 = vtanh.f32 %v654_v14  ;;  %v685_v30 = vld [vmem:[%s1154_s0 + $0x10] sm:$0xff]   ;;  %779 = vmatprep.subr.bf16.mxu1 %v827_v28  ;;  %v826_v32 = vld [vmem:[%s1153_s1 + $0x38] sm:$0xff]   ;;  %v695_v49 = vld [vmem:[%s1154_s0 + $0x60] sm:$0xff]  }
   0x9   :  { %837 = vtanh.f32 %v655_v15  ;;  %780 = vmatpush3.bf16.msra.mxu1 %v827_v28  ;;  %v694_v33 = vld [vmem:[%s1154_s0 + $0x58] sm:$0xff]   ;;  %v630_v34 = vunpack.c.l.bf16 %v685_v30  ;;  %v631_v36 = vunpack.c.h.bf16 %v685_v30  ;;  %v670_v55 = vunpack.c.l.bf16 %v695_v49  ;;  %v687_v59 = vld [vmem:[%s1154_s0 + $0x20] sm:$0xff]   ;;  %v696_v62 = vld [vmem:[%s1154_s0 + $0x68] sm:$0xff]  }
   0xa   :  { %839 = vtanh.f32 %v622_v16  ;;  %v666_v38 = vunpack.c.l.bf16 %v694_v33  ;;  %v667_v41 = vunpack.c.h.bf16 %v694_v33  ;;  %v686_v45 = vld [vmem:[%s1154_s0 + $0x18] sm:$0xff]   ;;  %v671_v57 = vunpack.c.h.bf16 %v695_v49  ;;  %v828_v49 = vld [vmem:[%s1155_s3 + $0x8] sm:$0xff]  }
   0xb   :  { %704 = vmatpush3.bf16.msra.mxu0 %v816_v5  ;;  %841 = vtanh.f32 %v623_v17  ;;  %v634_v51 = vunpack.c.l.bf16 %v686_v45  ;;  %v635_v53 = vunpack.c.h.bf16 %v686_v45  ;;  %v638_v0 = vunpack.c.l.bf16 %v687_v59  ;;  %781 = vmatprep.subr.bf16.mxu1 %v828_v49 }
   0xc   :  { %705 = vmatprep.subr.bf16.mxu0 %v817_v6  ;;  %843 = vtanh.f32 %v658_v20  ;;  %v639_v2 = vunpack.c.h.bf16 %v687_v59  ;;  %v674_v3 = vunpack.c.l.bf16 %v696_v62  ;;  %v675_v5 = vunpack.c.h.bf16 %v696_v62 }
   0xd   :  { %845 = vtanh.f32 %v659_v22  ;;  %v698_v22 = vld [vmem:[%s1154_s0 + $0x78] sm:$0xff]   ;;  %782 = vmatpush3.bf16.msra.mxu1 %v828_v49 }
   0xe   :  { %847 = vtanh.f32 %v626_v25 }
   0xf   :  { %706 = vmatpush3.bf16.msra.mxu0 %v818_v7  ;;  %849 = vtanh.f32 %v627_v27  ;;  %v688_v7 = vld [vmem:[%s1154_s0 + $0x28] sm:$0xff]   ;;  %v682_v27 = vunpack.c.l.bf16 %v698_v22 }
  0x10   :  { %707 = vmatprep.subr.bf16.mxu0 %v819_v8  ;;  %851 = vtanh.f32 %v662_v29  ;;  %v642_v12 = vunpack.c.l.bf16 %v688_v7  ;;  %v643_v14 = vunpack.c.h.bf16 %v688_v7  ;;  %v683_v29 = vunpack.c.h.bf16 %v698_v22 }
  0x11   :  { %853 = vtanh.f32 %v663_v31 }
  0x12   :  { %v836_v35 = vpop.eup %835  ;;  %855 = vtanh.f32 %v630_v34 }
  0x13   :  { %708 = vmatpush3.bf16.msra.mxu0 %v820_v9  ;;  %v838_v37 = vpop.eup %837  ;;  %857 = vtanh.f32 %v631_v36 }
  0x14   :  { %709 = vmatprep.subr.bf16.mxu0 %v821_v10  ;;  %v840_v39 = vpop.eup %839  ;;  %v126_v40 = vpack.c.bf16 %v838_v37, %v836_v35  ;;  %859 = vtanh.f32 %v666_v38  ;;  %v697_v10 = vld [vmem:[%s1154_s0 + $0x70] sm:$0xff]  }
  0x15   :  { %v842_v42 = vpop.eup %841  ;;  %861 = vtanh.f32 %v667_v41  ;;  %v678_v15 = vunpack.c.l.bf16 %v697_v10  ;;  %v679_v17 = vunpack.c.h.bf16 %v697_v10 }
  0x16   :  { %v844_v43 = vpop.eup %843  ;;  %301 = vmatprep.mubr.bf16.mxu0 %v126_v40  ;;  %v69_v44 = vpack.c.bf16 %v842_v42, %v840_v39  ;;  %863 = vtanh.f32 %v634_v51  ;;  %v830_v51 = vld [vmem:[%s1155_s3 + $0x18] sm:$0xff]  }
  0x17   :  { %710 = vmatpush3.bf16.msra.mxu0 %v822_v19  ;;  %v846_v46 = vpop.eup %845  ;;  %865 = vtanh.f32 %v635_v53  ;;  %v689_v19 = vld [vmem:[%s1154_s0 + $0x30] sm:$0xff]   ;;  %v832_v53 = vld [vmem:[%s1155_s3 + $0x28] sm:$0xff]  }
  0x18   :  { %711 = vmatprep.subr.bf16.mxu0 %v823_v21  ;;  %v848_v47 = vpop.eup %847  ;;  %v127_v48 = vpack.c.bf16 %v846_v46, %v844_v43  ;;  %867 = vtanh.f32 %v670_v55  ;;  %v834_v55 = vld [vmem:[%s1155_s3 + $0x38] sm:$0xff]  }
  0x19   :  { %v850_v50 = vpop.eup %849  ;;  %869 = vtanh.f32 %v671_v57  ;;  %v1084_v57 = vld [vmem:[%s1156_s2] ss:$0 sm:$0xff] }
  0x1a   :  { %v852_v52 = vpop.eup %851  ;;  %v70_v56 = vpack.c.bf16 %v850_v50, %v848_v47  ;;  %871 = vtanh.f32 %v638_v0  ;;  %v829_v50 = vld [vmem:[%s1155_s3 + $0x10] sm:$0xff]  }
  0x1b   :  { %712 = vmatpush3.bf16.msra.mxu0 %v824_v24  ;;  %v854_v54 = vpop.eup %853  ;;  %873 = vtanh.f32 %v639_v2  ;;  %v646_v24 = vunpack.c.l.bf16 %v689_v19  ;;  %783 = vmatprep.subr.bf16.mxu1 %v829_v50 }
  0x1c   :  { %713 = vmatprep.subr.bf16.mxu0 %v825_v26  ;;  %v128_v58 = vpack.c.bf16 %v854_v54, %v852_v52  ;;  %v856_v60 = vpop.eup %855  ;;  %875 = vtanh.f32 %v674_v3  ;;  %v647_v26 = vunpack.c.h.bf16 %v689_v19  ;;  %784 = vmatpush3.bf16.msra.mxu1 %v829_v50  ;;  %v831_v52 = vld [vmem:[%s1155_s3 + $0x20] sm:$0xff]   ;;  %v833_v54 = vld [vmem:[%s1155_s3 + $0x30] sm:$0xff]  }
  0x1d   :  { %v858_v61 = vpop.eup %857  ;;  %877 = vtanh.f32 %v675_v5  ;;  %785 = vmatprep.subr.bf16.mxu1 %v830_v51 }
  0x1e   :  { %v860_v63 = vpop.eup %859  ;;  %v71_v4 = vpack.c.bf16 %v858_v61, %v856_v60  ;;  %879 = vtanh.f32 %v642_v12 }
  0x1f   :  { %714 = vmatpush3.bf16.msra.mxu0 %v826_v32  ;;  %v862_v1 = vpop.eup %861  ;;  %881 = vtanh.f32 %v643_v14  ;;  %v690_v32 = vld [vmem:[%s1154_s0 + $0x38] sm:$0xff]  }
  0x20   :  { %v129_v6 = vpack.c.bf16 %v862_v1, %v860_v63  ;;  %v864_v8 = vpop.eup %863  ;;  %883 = vtanh.f32 %v678_v15  ;;  %v650_v36 = vunpack.c.l.bf16 %v690_v32  ;;  %v651_v37 = vunpack.c.h.bf16 %v690_v32  ;;  %786 = vmatpush3.bf16.msra.mxu1 %v830_v51 }
  0x21   :  { %v866_v9 = vpop.eup %865  ;;  %885 = vtanh.f32 %v679_v17  ;;  %787 = vmatprep.subr.bf16.mxu1 %v831_v52 }
  0x22   :  { %302 = vmatmul.mubr.bf16.vlgmr.msra.gmra.mrb[0].mxu0 %v69_v44  ;;  %v868_v11 = vpop.eup %867  ;;  %v72_v16 = vpack.c.bf16 %v866_v9, %v864_v8  ;;  %887 = vtanh.f32 %v646_v24 }
  0x23   :  { %309 = vmatprep.mubr.bf16.mxu0 %v127_v48  ;;  %v870_v13 = vpop.eup %869  ;;  %889 = vtanh.f32 %v647_v26 }
  0x24   :  { %v130_v18 = vpack.c.bf16 %v870_v13, %v868_v11  ;;  %v872_v20 = vpop.eup %871  ;;  %891 = vtanh.f32 %v682_v27  ;;  %788 = vmatpush3.bf16.msra.mxu1 %v831_v52 }
  0x25   :  { %v874_v21 = vpop.eup %873  ;;  %893 = vtanh.f32 %v683_v29  ;;  %789 = vmatprep.subr.bf16.mxu1 %v832_v53 }
  0x26   :  { %v876_v23 = vpop.eup %875  ;;  %v73_v28 = vpack.c.bf16 %v874_v21, %v872_v20  ;;  %895 = vtanh.f32 %v650_v36 }
  0x27   :  { %v878_v25 = vpop.eup %877  ;;  %897 = vtanh.f32 %v651_v37 }
  0x28   :  { %v131_v30 = vpack.c.bf16 %v878_v25, %v876_v23  ;;  %v880_v31 = vpop.eup %879  ;;  %790 = vmatpush3.bf16.msra.mxu1 %v832_v53 }
  0x29   :  { %v882_v33 = vpop.eup %881  ;;  %791 = vmatprep.subr.bf16.mxu1 %v833_v54 }
  0x2a   :  { %310 = vmatmul.mubr.bf16.gmra.mrb[4].mxu0 %v70_v56  ;;  %v884_v34 = vpop.eup %883  ;;  %v74_v38 = vpack.c.bf16 %v882_v33, %v880_v31 }
  0x2b   :  { %317 = vmatprep.mubr.bf16.mxu0 %v128_v58  ;;  %v886_v35 = vpop.eup %885 }
  0x2c   :  { %v132_v39 = vpack.c.bf16 %v886_v35, %v884_v34  ;;  %v888_v40 = vpop.eup %887  ;;  %792 = vmatpush3.bf16.msra.mxu1 %v833_v54 }
  0x2d   :  { %v890_v41 = vpop.eup %889  ;;  %793 = vmatprep.subr.bf16.mxu1 %v834_v55 }
  0x2e   :  { %v892_v42 = vpop.eup %891  ;;  %v75_v44 = vpack.c.bf16 %v890_v41, %v888_v40 }
  0x2f   :  { %v894_v43 = vpop.eup %893 }
  0x30   :  { %v133_v45 = vpack.c.bf16 %v894_v43, %v892_v42  ;;  %v896_v46 = vpop.eup %895  ;;  %794 = vmatpush3.bf16.msra.mxu1 %v834_v55 }
  0x31   :  { %v898_v47 = vpop.eup %897 }
  0x32   :  { %318 = vmatmul.mubr.bf16.gmra.mrb[8].mxu0 %v71_v4  ;;  %v76_v48 = vpack.c.bf16 %v898_v47, %v896_v46 }
  0x33   :  { %325 = vmatprep.mubr.bf16.mxu0 %v129_v6 }
  0x3a   :  { %326 = vmatmul.mubr.bf16.gmra.mrb[12].mxu0 %v72_v16 }
  0x3b   :  { %333 = vmatprep.mubr.bf16.mxu0 %v130_v18 }
  0x42   :  { %334 = vmatmul.mubr.bf16.gmra.mrb[16].mxu0 %v73_v28 }
  0x43   :  { %341 = vmatprep.mubr.bf16.mxu0 %v131_v30 }
  0x4a   :  { %342 = vmatmul.mubr.bf16.gmra.mrb[20].mxu0 %v74_v38 }
  0x4b   :  { %349 = vmatprep.mubr.bf16.mxu0 %v132_v39 }
  0x52   :  { %350 = vmatmul.mubr.bf16.gmra.mrb[24].mxu0 %v75_v44 }
  0x53   :  { %357 = vmatprep.mubr.bf16.mxu0 %v133_v45 }
  0x5a   :  { %358 = vmatmul.mubr.bf16.gmra.mrb[28].mxu0 %v76_v48 }
  0xf5   :  { %v715_v56 = vpop.f32.mrb[0].mxu0 }
  0xf6   :  { %v716_v58 = vpop.f32.mrb[1].mxu0 }
  0xf7   :  { %v717_v59 = vadd.f32 %v716_v58, %v715_v56  ;;  %v718_v60 = vpop.f32.mrb[2].mxu0 }
  0xf8   :  { %v719_v61 = vpop.f32.mrb[3].mxu0 }
  0xf9   :  { %v304_v62 = vadd.f32 %v717_v59, %v1084_v57  ;;  %v720_v63 = vadd.f32 %v719_v61, %v718_v60 }
  0xfb   :  { %v307_v0 = vadd.f32 %v720_v63, %v1084_v57  ;;  %899 = vtanh.f32 %v304_v62 }
  0xfd   :  { %901 = vtanh.f32 %v307_v0  ;;  %v721_v1 = vpop.f32.mrb[4].mxu0 }
  0xfe   :  { %v722_v2 = vpop.f32.mrb[5].mxu0 }
  0xff   :  { %v723_v3 = vadd.f32 %v722_v2, %v721_v1  ;;  %v724_v4 = vpop.f32.mrb[6].mxu0 }
 0x100   :  { %v725_v5 = vpop.f32.mrb[7].mxu0 }
 0x101   :  { %v312_v6 = vadd.f32 %v723_v3, %v1084_v57  ;;  %v726_v7 = vadd.f32 %v725_v5, %v724_v4 }
 0x103   :  { %v315_v8 = vadd.f32 %v726_v7, %v1084_v57  ;;  %903 = vtanh.f32 %v312_v6 }
 0x105   :  { %905 = vtanh.f32 %v315_v8  ;;  %v727_v9 = vpop.f32.mrb[8].mxu0  ;;  %v900_v10 = vpop.eup %899 }
 0x106   :  { %v728_v11 = vpop.f32.mrb[9].mxu0 }
 0x107   :  { %v902_v12 = vpop.eup %901  ;;  %v729_v13 = vadd.f32 %v728_v11, %v727_v9  ;;  %v730_v14 = vpop.f32.mrb[10].mxu0 }
 0x108   :  { %v731_v15 = vpop.f32.mrb[11].mxu0  ;;  %v382_v16 = vpack.c.bf16 %v902_v12, %v900_v10 }
 0x109   :  { %v320_v17 = vadd.f32 %v729_v13, %v1084_v57  ;;  %v732_v18 = vadd.f32 %v731_v15, %v730_v14 }
 0x10a   :  { %795 = vmatprep.mubr.bf16.mxu1 %v382_v16 }
 0x10b   :  { %v323_v19 = vadd.f32 %v732_v18, %v1084_v57  ;;  %907 = vtanh.f32 %v320_v17  ;;  %v611_v18 = vld [vmem:[%s1157_s4] ss:$0 sm:$0xff] }
 0x10d   :  { %909 = vtanh.f32 %v323_v19  ;;  %v733_v20 = vpop.f32.mrb[12].mxu0  ;;  %v904_v21 = vpop.eup %903 }
 0x10e   :  { %v734_v22 = vpop.f32.mrb[13].mxu0 }
 0x10f   :  { %v906_v23 = vpop.eup %905  ;;  %v735_v24 = vadd.f32 %v734_v22, %v733_v20  ;;  %v736_v25 = vpop.f32.mrb[14].mxu0 }
 0x110   :  { %v737_v26 = vpop.f32.mrb[15].mxu0  ;;  %v383_v27 = vpack.c.bf16 %v906_v23, %v904_v21 }
 0x111   :  { %v328_v28 = vadd.f32 %v735_v24, %v1084_v57  ;;  %v738_v29 = vadd.f32 %v737_v26, %v736_v25 }
 0x112   :  { %796 = vmatmul.mubr.bf16.vlgmr.msra.gmra.mrb[0].mxu1 %v383_v27 }
 0x113   :  { %v331_v30 = vadd.f32 %v738_v29, %v1084_v57  ;;  %911 = vtanh.f32 %v328_v28 }
 0x115   :  { %913 = vtanh.f32 %v331_v30  ;;  %v739_v31 = vpop.f32.mrb[16].mxu0  ;;  %v908_v32 = vpop.eup %907 }
 0x116   :  { %v740_v33 = vpop.f32.mrb[17].mxu0 }
 0x117   :  { %v910_v34 = vpop.eup %909  ;;  %v741_v35 = vadd.f32 %v740_v33, %v739_v31  ;;  %v742_v36 = vpop.f32.mrb[18].mxu0 }
 0x118   :  { %v743_v37 = vpop.f32.mrb[19].mxu0  ;;  %v384_v38 = vpack.c.bf16 %v910_v34, %v908_v32 }
 0x119   :  { %v336_v39 = vadd.f32 %v741_v35, %v1084_v57  ;;  %v744_v40 = vadd.f32 %v743_v37, %v742_v36 }
 0x11a   :  { %799 = vmatprep.mubr.bf16.mxu1 %v384_v38 }
 0x11b   :  { %v339_v41 = vadd.f32 %v744_v40, %v1084_v57  ;;  %915 = vtanh.f32 %v336_v39 }
 0x11d   :  { %917 = vtanh.f32 %v339_v41  ;;  %v745_v42 = vpop.f32.mrb[20].mxu0  ;;  %v912_v43 = vpop.eup %911 }
 0x11e   :  { %v746_v44 = vpop.f32.mrb[21].mxu0 }
 0x11f   :  { %v914_v45 = vpop.eup %913  ;;  %v747_v46 = vadd.f32 %v746_v44, %v745_v42  ;;  %v748_v47 = vpop.f32.mrb[22].mxu0 }
 0x120   :  { %v749_v48 = vpop.f32.mrb[23].mxu0  ;;  %v385_v49 = vpack.c.bf16 %v914_v45, %v912_v43 }
 0x121   :  { %v344_v50 = vadd.f32 %v747_v46, %v1084_v57  ;;  %v750_v51 = vadd.f32 %v749_v48, %v748_v47 }
 0x122   :  { %800 = vmatmul.mubr.bf16.gmra.mrb[4].mxu1 %v385_v49 }
 0x123   :  { %v347_v52 = vadd.f32 %v750_v51, %v1084_v57  ;;  %919 = vtanh.f32 %v344_v50 }
 0x125   :  { %921 = vtanh.f32 %v347_v52  ;;  %v751_v53 = vpop.f32.mrb[24].mxu0  ;;  %v916_v54 = vpop.eup %915 }
 0x126   :  { %v752_v55 = vpop.f32.mrb[25].mxu0 }
 0x127   :  { %v918_v56 = vpop.eup %917  ;;  %v753_v58 = vadd.f32 %v752_v55, %v751_v53  ;;  %v754_v59 = vpop.f32.mrb[26].mxu0 }
 0x128   :  { %v755_v60 = vpop.f32.mrb[27].mxu0  ;;  %v386_v61 = vpack.c.bf16 %v918_v56, %v916_v54 }
 0x129   :  { %v352_v62 = vadd.f32 %v753_v58, %v1084_v57  ;;  %v756_v63 = vadd.f32 %v755_v60, %v754_v59 }
 0x12a   :  { %803 = vmatprep.mubr.bf16.mxu1 %v386_v61 }
 0x12b   :  { %v355_v0 = vadd.f32 %v756_v63, %v1084_v57  ;;  %923 = vtanh.f32 %v352_v62 }
 0x12d   :  { %925 = vtanh.f32 %v355_v0  ;;  %v757_v1 = vpop.f32.mrb[28].mxu0  ;;  %v920_v2 = vpop.eup %919 }
 0x12e   :  { %v758_v3 = vpop.f32.mrb[29].mxu0 }
 0x12f   :  { %v922_v4 = vpop.eup %921  ;;  %v759_v5 = vadd.f32 %v758_v3, %v757_v1  ;;  %v760_v6 = vpop.f32.mrb[30].mxu0 }
 0x130   :  { %v761_v7 = vpop.f32.mrb[31].mxu0  ;;  %v387_v8 = vpack.c.bf16 %v922_v4, %v920_v2 }
 0x131   :  { %v360_v9 = vadd.f32 %v759_v5, %v1084_v57  ;;  %v762_v10 = vadd.f32 %v761_v7, %v760_v6 }
 0x132   :  { %804 = vmatmul.mubr.bf16.gmra.mrb[8].mxu1 %v387_v8 }
 0x133   :  { %v363_v11 = vadd.f32 %v762_v10, %v1084_v57  ;;  %927 = vtanh.f32 %v360_v9 }
 0x135   :  { %929 = vtanh.f32 %v363_v11  ;;  %v924_v12 = vpop.eup %923 }
 0x137   :  { %v926_v13 = vpop.eup %925 }
 0x138   :  { %v388_v14 = vpack.c.bf16 %v926_v13, %v924_v12 }
 0x13a   :  { %807 = vmatprep.mubr.bf16.mxu1 %v388_v14 }
 0x13d   :  { %v928_v15 = vpop.eup %927 }
 0x13f   :  { %v930_v16 = vpop.eup %929 }
 0x140   :  { %v389_v17 = vpack.c.bf16 %v930_v16, %v928_v15 }
 0x142   :  { %808 = vmatmul.mubr.bf16.gmra.mrb[12].mxu1 %v389_v17 }
 0x1e5   :  { %v797_v19 = vpop.f32.mrb[0].mxu1 }
 0x1e6   :  { %v504_v20 = vadd.f32 %v797_v19, %v611_v18  ;;  %v495_v21 = vpop.f32.mrb[1].mxu1 }
 0x1e7   :  { %v496_v22 = vadd.f32 %v611_v18, %v495_v21  ;;  %v798_v23 = vpop.f32.mrb[2].mxu1 }
 0x1e8   :  { %560 = vst [vmem:[%s1158_s5 + $0x10] sm:$0xff] %v504_v20  ;;  %v507_v57 = vadd.f32 %v798_v23, %v611_v18  ;;  %v498_v24 = vpop.f32.mrb[3].mxu1 }
 0x1e9   :  { %558 = vst [vmem:[%s1158_s5] sm:$0xff] %v496_v22  ;;  %v499_v25 = vadd.f32 %v611_v18, %v498_v24 }
 0x1ea   :  { %561 = vst [vmem:[%s1158_s5 + $0x18] sm:$0xff] %v507_v57 }
 0x1eb   :  { %559 = vst [vmem:[%s1158_s5 + $0x8] sm:$0xff] %v499_v25 }
 0x1f5   :  { %v801_v26 = vpop.f32.mrb[4].mxu1 }
 0x1f6   :  { %v520_v27 = vadd.f32 %v801_v26, %v611_v18  ;;  %v511_v28 = vpop.f32.mrb[5].mxu1 }
 0x1f7   :  { %v512_v29 = vadd.f32 %v611_v18, %v511_v28  ;;  %v802_v30 = vpop.f32.mrb[6].mxu1 }
 0x1f8   :  { %564 = vst [vmem:[%s1158_s5 + $0x30] sm:$0xff] %v520_v27  ;;  %v523_v31 = vadd.f32 %v802_v30, %v611_v18  ;;  %v514_v32 = vpop.f32.mrb[7].mxu1 }
 0x1f9   :  { %562 = vst [vmem:[%s1158_s5 + $0x20] sm:$0xff] %v512_v29  ;;  %v515_v33 = vadd.f32 %v611_v18, %v514_v32 }
 0x1fa   :  { %565 = vst [vmem:[%s1158_s5 + $0x38] sm:$0xff] %v523_v31 }
 0x1fb   :  { %563 = vst [vmem:[%s1158_s5 + $0x28] sm:$0xff] %v515_v33 }
 0x205   :  { %v805_v34 = vpop.f32.mrb[8].mxu1 }
 0x206   :  { %v536_v35 = vadd.f32 %v805_v34, %v611_v18  ;;  %v527_v36 = vpop.f32.mrb[9].mxu1 }
 0x207   :  { %v528_v37 = vadd.f32 %v611_v18, %v527_v36  ;;  %v806_v38 = vpop.f32.mrb[10].mxu1 }
 0x208   :  { %568 = vst [vmem:[%s1158_s5 + $0x50] sm:$0xff] %v536_v35  ;;  %v539_v39 = vadd.f32 %v806_v38, %v611_v18  ;;  %v530_v40 = vpop.f32.mrb[11].mxu1 }
 0x209   :  { %566 = vst [vmem:[%s1158_s5 + $0x40] sm:$0xff] %v528_v37  ;;  %v531_v41 = vadd.f32 %v611_v18, %v530_v40 }
 0x20a   :  { %569 = vst [vmem:[%s1158_s5 + $0x58] sm:$0xff] %v539_v39 }
 0x20b   :  { %567 = vst [vmem:[%s1158_s5 + $0x48] sm:$0xff] %v531_v41 }
 0x215   :  { %v809_v42 = vpop.f32.mrb[12].mxu1 }
 0x216   :  { %v552_v43 = vadd.f32 %v809_v42, %v611_v18  ;;  %v543_v44 = vpop.f32.mrb[13].mxu1 }
 0x217   :  { %v544_v45 = vadd.f32 %v611_v18, %v543_v44  ;;  %v810_v46 = vpop.f32.mrb[14].mxu1 }
 0x218   :  { %572 = vst [vmem:[%s1158_s5 + $0x70] sm:$0xff] %v552_v43  ;;  %v555_v47 = vadd.f32 %v810_v46, %v611_v18  ;;  %v546_v48 = vpop.f32.mrb[15].mxu1 }
 0x219   :  { %570 = vst [vmem:[%s1158_s5 + $0x60] sm:$0xff] %v544_v45  ;;  %v547_v49 = vadd.f32 %v611_v18, %v546_v48 }
 0x21a   :  { %573 = vst [vmem:[%s1158_s5 + $0x78] sm:$0xff] %v555_v47 }
 0x21b   :  { %571 = vst [vmem:[%s1158_s5 + $0x68] sm:$0xff] %v547_v49 }

// kernel: bilstm_forward.4
= control target key start
LH: loop header
LB: loop body
LE: loop exit
PB: predicated region body
PF: predicated region fallthrough
CT: control target
= control target key end

     0   :  { %s3676_s15 = smov 0   ;;  %s3678_s16 = smov 0   ;;  %s4902_s0 = inlined_call_operand.vmem [shape: s32[8,1], index: 0, kind: input, shape index: {}]   ;;  %s4903_s1 = inlined_call_operand.vmem [shape: bf16[2,16,8,512], index: 1, kind: input, shape index: {}]   ;;  %s4904_s2 = inlined_call_operand.vmem [shape: bf16[2,128,512], index: 2, kind: input, shape index: {}]   ;;  %s4905_s3 = inlined_call_operand.vmem [shape: f32[2,1,512], index: 3, kind: input, shape index: {}]   ;;  %s4906_s4 = inlined_call_operand.vmem [shape: bf16[2,16,8,128], index: 4, kind: output, shape index: {}]  }
   0x1   :  { %s3680_s17 = smov 0  }
   0x2 LB: > { %s26_s18 = sadd.s32 1, %s3644_s16  ;;  %p3055_p0 = scmp.ge.s32.totalorder %s3648_s17, 1  ;;  %s3648_s17 = sphi %s3680_s17, %s14_s17   ;;  %s3644_s16 = sphi %s3678_s16, %s4910_s16   ;;  %s3640_s15 = sphi %s3676_s15, %s4909_s15  }
   0x3   : > { %p28_p1 = scmp.ge.s32.totalorder %s26_s18, 2  ;;  %p227_p2 = scmp.lt.s32.totalorder %s3648_s17, 3 }
   0x5   : > { %s4912_s18 = smov (%p28_p1, %s26_s18), 0  ;;  %p228_p3 = pnand %p3055_p0, %p227_p2 }
   0x6   : > { %p284_p4 = scmp.lt.s32.totalorder (!%p228_p3), %s3640_s15, 1  ;;  %s3063_s19 = sshll.u32 (!%p228_p3), %s3640_s15, 2  ;;  %v369_v0 = vld [vmem:[%s4902_s0] sm:$0xff] (!%p228_p3)  ;;  %v3650_v1 = vmov (!%p228_p3), 0   ;;  %v395_v35 = vlaneseq (!%p228_p3) }
   0x7   : > { %231 = sbr.rel (%p228_p3) target bundleno = 4228 (0x1084), region = 36  ;;  %611 = vmatprep.mubr.bf16.mxu0 (!%p228_p3), %v3650_v1  ;;  %652 = vmatprep.mubr.bf16.mxu1 (!%p228_p3), %v3650_v1  ;;  %s3708_s23 = scalar_lea.vmem (!%p228_p3), [#allocation2], %s3063_s19 }
   0x8   : > { %332 = vst [vmem:[%s3708_s23] sm:$0xf] (!%p228_p3), %v3650_v1  ;;  %3257 = vset.pattern.permute.xlu0 (!%p228_p3), %v3650_v1  ;;  %s3228_s28 = smul.u32 (!%p228_p3), 240, %s3640_s15  ;;  %v396_v36 = vshrl.u32 (!%p228_p3), %v395_v35, 7 }
   0x9   : > { %371 = vperm.xlu0 (!%p228_p3), %3257, %v369_v0   ;;  %s383_s11 = smul.u32 (!%p228_p3), 15, %s3640_s15 }
   0xa   : > { %v397_v37 = vsub.s32 (!%p228_p3), 0, %v396_v36  ;;  %v401_v40 = vsub.s32 (!%p228_p3), 1, %v396_v36  ;;  %v409_v45 = vsub.s32 (!%p228_p3), 3, %v396_v36  ;;  %v405_v52 = vsub.s32 (!%p228_p3), 2, %v396_v36  ;;  %s3229_s13 = smul.u32 (!%p228_p3), 60, %s3640_s15 }
   0xb   : > { %s704_s26 = smul.u32 (!%p228_p3), 13, %s3640_s15 }
   0xc   : > { %s3111_s29 = smul.u32 (!%p228_p3), 52, %s3640_s15 }
   0xd   : > { %s844_s8 = smul.u32 (!%p228_p3), 11, %s3640_s15 }
   0xe   : > { %s3704_s22 = scalar_select %p284_p4, %s3640_s15, 1 }
   0xf   : > { %v3844_v33 = vld [vmem:[%s3708_s23] sm:$0xf]  ;;  %s984_s14 = smul.u32 9, %s3640_s15 }
  0x10   : > { %s3225_s24 = sshll.u32 %s3704_s22, 8  ;;  %s3060_s6 = sshll.u32 %s3704_s22, 2 }
  0x11   : > { %s3719_s27 = scalar_lea.vmem %s4904_s2, %s3225_s24  ;;  %s3896_s5 = scalar_lea.vmem %s4903_s1, %s3225_s24 }
  0x12   : > { %v3722_v2 = vld [vmem:[%s3719_s27 + $0x4] ss:$16 sps:$4 sm:$0xff]   ;;  %v3725_v3 = vld [vmem:[%s3719_s27] ss:$16 sps:$4 sm:$0xff]   ;;  %v3740_v7 = vld [vmem:[%s3719_s27 + $0xc] ss:$16 sps:$4 sm:$0xff]   ;;  %s306_s9 = scalar_lea.vmem %s4905_s3, %s3060_s6  ;;  %s387_s10 = scalar_lea.vmem %s3896_s5, %s3228_s28 }
  0x13   : > { %579 = vmatprep.subr.bf16.mxu0 %v3722_v2  ;;  %v3729_v4 = vld [vmem:[%s3719_s27 + $0x24] ss:$16 sps:$4 sm:$0xff]   ;;  %v3733_v5 = vld [vmem:[%s3719_s27 + $0x20] ss:$16 sps:$4 sm:$0xff]   ;;  %v3743_v8 = vld [vmem:[%s3719_s27 + $0x8] ss:$16 sps:$4 sm:$0xff]   ;;  %620 = vmatprep.subr.bf16.mxu1 %v3740_v7 }
  0x14   : > { %580 = vmatpush1.bf16.msra.mxu0 %v3725_v3  ;;  %v3737_v6 = vld [vmem:[%s3719_s27 + $0x44] ss:$16 sps:$4 sm:$0xff]   ;;  %v3747_v9 = vld [vmem:[%s3719_s27 + $0x40] ss:$16 sps:$4 sm:$0xff]   ;;  %621 = vmatpush1.bf16.msra.mxu1 %v3743_v8  ;;  %v3756_v11 = vld [vmem:[%s3719_s27 + $0x2c] ss:$16 sps:$4 sm:$0xff]  }
  0x15   : > { %581 = vmatprep.subr.bf16.mxu0 %v3729_v4  ;;  %v3752_v10 = vld [vmem:[%s3719_s27 + $0x64] ss:$16 sps:$4 sm:$0xff]   ;;  %v3759_v12 = vld [vmem:[%s3719_s27 + $0x28] ss:$16 sps:$4 sm:$0xff]   ;;  %622 = vmatprep.subr.bf16.mxu1 %v3756_v11  ;;  %v3764_v13 = vld [vmem:[%s3719_s27 + $0x60] ss:$16 sps:$4 sm:$0xff]  }
  0x16   : > { %v3767_v14 = vld [vmem:[%s3719_s27 + $0x84] ss:$16 sps:$4 sm:$0xff]   ;;  %v3770_v15 = vld [vmem:[%s3719_s27 + $0x4c] ss:$16 sps:$4 sm:$0xff]   ;;  %v3775_v16 = vld [vmem:[%s3719_s27 + $0x48] ss:$16 sps:$4 sm:$0xff]  }
  0x17   : > { %v3779_v17 = vld [vmem:[%s3719_s27 + $0x6c] ss:$16 sps:$4 sm:$0xff]   ;;  %v3783_v18 = vld [vmem:[%s3719_s27 + $0x80] ss:$16 sps:$4 sm:$0xff]   ;;  %v3787_v19 = vld [vmem:[%s3719_s27 + $0xa4] ss:$16 sps:$4 sm:$0xff]  }
  0x18   : > { %582 = vmatpush1.bf16.msra.mxu0 %v3733_v5  ;;  %623 = vmatpush1.bf16.msra.mxu1 %v3759_v12  ;;  %v3791_v20 = vld [vmem:[%s3719_s27 + $0x68] ss:$16 sps:$4 sm:$0xff]   ;;  %v3795_v21 = vld [vmem:[%s3719_s27 + $0x8c] ss:$16 sps:$4 sm:$0xff]   ;;  %v3798_v22 = vld [vmem:[%s3719_s27 + $0xa0] ss:$16 sps:$4 sm:$0xff]  }
  0x19   : > { %583 = vmatprep.subr.bf16.mxu0 %v3737_v6  ;;  %624 = vmatprep.subr.bf16.mxu1 %v3770_v15  ;;  %v3802_v23 = vld [vmem:[%s3719_s27 + $0xc4] ss:$16 sps:$4 sm:$0xff]   ;;  %v3807_v24 = vld [vmem:[%s3719_s27 + $0x88] ss:$16 sps:$4 sm:$0xff]   ;;  %v3811_v25 = vld [vmem:[%s3719_s27 + $0xac] ss:$16 sps:$4 sm:$0xff]  }
  0x1a   : > { %v3815_v26 = vld [vmem:[%s3719_s27 + $0xc0] ss:$16 sps:$4 sm:$0xff]   ;;  %v3819_v27 = vld [vmem:[%s3719_s27 + $0xe4] ss:$16 sps:$4 sm:$0xff]   ;;  %v3823_v28 = vld [vmem:[%s3719_s27 + $0xa8] ss:$16 sps:$4 sm:$0xff]  }
  0x1b   : > { %v3827_v29 = vld [vmem:[%s3719_s27 + $0xcc] ss:$16 sps:$4 sm:$0xff]   ;;  %v3831_v30 = vld [vmem:[%s3719_s27 + $0xe0] ss:$16 sps:$4 sm:$0xff]   ;;  %v3836_v31 = vld [vmem:[%s3719_s27 + $0xc8] ss:$16 sps:$4 sm:$0xff]  }
  0x1c   : > { %584 = vmatpush1.bf16.msra.mxu0 %v3747_v9  ;;  %625 = vmatpush1.bf16.msra.mxu1 %v3775_v16  ;;  %v3840_v32 = vld [vmem:[%s3719_s27 + $0xec] ss:$16 sps:$4 sm:$0xff]   ;;  %v3848_v34 = vld [vmem:[%s3719_s27 + $0xe8] ss:$16 sps:$4 sm:$0xff]   ;;  %v368_v38 = vld [vmem:[%s306_s9] sm:$0xf] }
  0x1d   : > { %585 = vmatprep.subr.bf16.mxu0 %v3752_v10  ;;  %626 = vmatprep.subr.bf16.mxu1 %v3779_v17  ;;  %v388_v39 = vld [vmem:[%s387_s10] sm:$0xff]  ;;  %v3903_v42 = vrot.slane %v368_v38, %v397_v37  ;;  %v3905_v44 = vrot.slane %v368_v38, %v401_v40  ;;  %v389_v46 = vld [vmem:[%s387_s10 + $0x8] sm:$0xff]  ;;  %v3909_v50 = vrot.slane %v368_v38, %v409_v45  ;;  %s3227_s12 = sshll.u32 %s3704_s22, 6  ;;  %s3105_s22 = smul.u32 208, %s3640_s15 }
  0x1e   : > { %v390_v41 = vunpack.c.l.bf16 %v388_v39  ;;  %v391_v43 = vunpack.c.h.bf16 %v388_v39  ;;  %v393_v49 = vunpack.c.h.bf16 %v389_v46  ;;  %v392_v61 = vunpack.c.l.bf16 %v389_v46  ;;  %s3926_s21 = scalar_lea.vmem %s4906_s4, %s3227_s12  ;;  %s705_s28 = sadd.s32 1, %s704_s26 }
  0x1f   : > { %v3912_v62 = vrot.slane %v368_v38, %v405_v52  ;;  %s695_s24 = scalar_lea.vmem %s3926_s21, %s3229_s13  ;;  %s2890_s25 = scalar_lea.vmem %s3896_s5, %s3105_s22 }
  0x20   : > { %586 = vmatpush1.bf16.msra.mxu0 %v3764_v13  ;;  %627 = vmatpush1.bf16.msra.mxu1 %v3791_v20  ;;  %v415_v47 = vadd.f32 %v3903_v42, %v390_v41  ;;  %v416_v48 = vadd.f32 %v3905_v44, %v391_v43  ;;  %v418_v59 = vadd.f32 %v3909_v50, %v393_v49  ;;  %s2894_s30 = scalar_lea.vmem %s3926_s21, %s3111_s29  ;;  %s3113_s6 = smul.u32 176, %s3640_s15 }
  0x21   : > { %587 = vmatprep.subr.bf16.mxu0 %v3767_v14  ;;  %628 = vmatprep.subr.bf16.mxu1 %v3795_v21  ;;  %v417_v36 = vadd.f32 %v3912_v62, %v392_v61  ;;  %s845_s9 = sadd.s32 2, %s844_s8  ;;  %s3119_s10 = smul.u32 44, %s3640_s15 }
  0x22   : > { %s2898_s7 = scalar_lea.vmem %s3896_s5, %s3113_s6  ;;  %s3121_s12 = smul.u32 144, %s3640_s15 }
  0x23   : > { %s985_s20 = sadd.s32 3, %s984_s14 }
  0x24   : > { %588 = vmatpush1.bf16.msra.mxu0 %v3783_v18  ;;  %629 = vmatpush1.bf16.msra.mxu1 %v3807_v24  ;;  %s2906_s13 = scalar_lea.vmem %s3896_s5, %s3121_s12 }
  0x25   : > { %589 = vmatprep.subr.bf16.mxu0 %v3787_v19  ;;  %630 = vmatprep.subr.bf16.mxu1 %v3811_v25 }
  0x28   : > { %590 = vmatpush1.bf16.msra.mxu0 %v3798_v22  ;;  %631 = vmatpush1.bf16.msra.mxu1 %v3823_v28 }
  0x29   : > { %591 = vmatprep.subr.bf16.mxu0 %v3802_v23  ;;  %632 = vmatprep.subr.bf16.mxu1 %v3827_v29 }
  0x2c   : > { %592 = vmatpush1.bf16.msra.mxu0 %v3815_v26  ;;  %633 = vmatpush1.bf16.msra.mxu1 %v3836_v31 }
  0x2d   : > { %593 = vmatprep.subr.bf16.mxu0 %v3819_v27  ;;  %634 = vmatprep.subr.bf16.mxu1 %v3840_v32 }
  0x30   : > { %594 = vmatpush1.bf16.msra.mxu0 %v3831_v30  ;;  %635 = vmatpush1.bf16.msra.mxu1 %v3848_v34 }
  0x31   : > { %719 = vmatprep.subr.bf16.mxu0 %v3722_v2  ;;  %760 = vmatprep.subr.bf16.mxu1 %v3740_v7 }
  0x33   : > { %612 = vmatmul.mubr.bf16.vlgmr.msra.gmra.mrb[0].mxu0 %v3844_v33  ;;  %653 = vmatmul.mubr.bf16.vlgmr.msra.gmra.mrb[0].mxu1 %v3844_v33 }
  0x34   : > { %720 = vmatpush1.bf16.msra.mxu0 %v3725_v3  ;;  %751 = vmatprep.mubr.bf16.mxu0 %v3650_v1 }
  0x35   : > { %721 = vmatprep.subr.bf16.mxu0 %v3729_v4  ;;  %761 = vmatpush1.bf16.msra.mxu1 %v3743_v8 }
  0x36   : > { %762 = vmatprep.subr.bf16.mxu1 %v3756_v11  ;;  %792 = vmatprep.mubr.bf16.mxu1 %v3650_v1 }
  0x38   : > { %722 = vmatpush1.bf16.msra.mxu0 %v3733_v5 }
  0x39   : > { %723 = vmatprep.subr.bf16.mxu0 %v3737_v6  ;;  %763 = vmatpush1.bf16.msra.mxu1 %v3759_v12 }
  0x3a   : > { %764 = vmatprep.subr.bf16.mxu1 %v3770_v15 }
  0x3c   : > { %724 = vmatpush1.bf16.msra.mxu0 %v3747_v9 }
  0x3d   : > { %725 = vmatprep.subr.bf16.mxu0 %v3752_v10  ;;  %765 = vmatpush1.bf16.msra.mxu1 %v3775_v16 }
  0x3e   : > { %766 = vmatprep.subr.bf16.mxu1 %v3779_v17 }
  0x40   : > { %726 = vmatpush1.bf16.msra.mxu0 %v3764_v13 }
  0x41   : > { %727 = vmatprep.subr.bf16.mxu0 %v3767_v14  ;;  %767 = vmatpush1.bf16.msra.mxu1 %v3791_v20 }
  0x42   : > { %768 = vmatprep.subr.bf16.mxu1 %v3795_v21 }
  0x44   : > { %728 = vmatpush1.bf16.msra.mxu0 %v3783_v18 }
  0x45   : > { %729 = vmatprep.subr.bf16.mxu0 %v3787_v19  ;;  %769 = vmatpush1.bf16.msra.mxu1 %v3807_v24 }
  0x46   : > { %770 = vmatprep.subr.bf16.mxu1 %v3811_v25 }
  0x48   : > { %730 = vmatpush1.bf16.msra.mxu0 %v3798_v22 }
  0x49   : > { %731 = vmatprep.subr.bf16.mxu0 %v3802_v23  ;;  %771 = vmatpush1.bf16.msra.mxu1 %v3823_v28 }
  0x4a   : > { %772 = vmatprep.subr.bf16.mxu1 %v3827_v29 }
  0x4c   : > { %732 = vmatpush1.bf16.msra.mxu0 %v3815_v26 }
  0x4d   : > { %733 = vmatprep.subr.bf16.mxu0 %v3819_v27  ;;  %773 = vmatpush1.bf16.msra.mxu1 %v3836_v31 }
  0x4e   : > { %774 = vmatprep.subr.bf16.mxu1 %v3840_v32 }
  0x50   : > { %734 = vmatpush1.bf16.msra.mxu0 %v3831_v30 }
  0x51   : > { %859 = vmatprep.subr.bf16.mxu0 %v3722_v2  ;;  %775 = vmatpush1.bf16.msra.mxu1 %v3848_v34 }
  0x52   : > { %900 = vmatprep.subr.bf16.mxu1 %v3740_v7 }
  0x88   : > { %v3916_v52 = vpop.permute.xlu0 %371 }
 0x106   : > { %v613_v51 = vpop.f32.mrb[0].mxu0  ;;  %v654_v63 = vpop.f32.mrb[0].mxu1 }
 0x107   : > { %v661_v53 = vadd.f32 %v613_v51, %v415_v47  ;;  %v615_v54 = vpop.f32.mrb[1].mxu0  ;;  %v656_v0 = vpop.f32.mrb[1].mxu1  ;;  %v663_v41 = vadd.f32 %v654_v63, %v417_v36 }
 0x108   : > { %v662_v55 = vadd.f32 %v615_v54, %v416_v48  ;;  %v617_v56 = vpop.f32.mrb[2].mxu0  ;;  %v664_v35 = vadd.f32 %v656_v0, %v418_v59  ;;  %v658_v37 = vpop.f32.mrb[2].mxu1 }
 0x109   : > { %v3101_v57 = vmul.f32 -1.442695, %v661_v53  ;;  %v618_v58 = vpop.f32.mrb[3].mxu0  ;;  %v659_v39 = vpop.f32.mrb[3].mxu1  ;;  %v690_v53 = vstv %s383_s11  ;;  %s2902_s11 = scalar_lea.vmem %s3926_s21, %s3119_s10 }
 0x10a   : > { %v3102_v60 = vmul.f32 -1.442695, %v662_v55  ;;  %v3103_v40 = vmul.f32 -1.442695, %v664_v35  ;;  %vm691_vm0 = vcmp.gt.s32.totalorder %v3916_v52, %v690_v53 }
 0x10b   : > { %3306 = vpow2.f32 %v3101_v57  ;;  %vm692_vm1 = vmpackc.low %vm691_vm0, %vm691_vm0 }
 0x10c   : > { %3308 = vpow2.f32 %v3102_v60 }
 0x10d   : > { %3310 = vpow2.f32 %v3103_v40  ;;  %v3107_v40 = vld [vmem:[%s2890_s25 + $0x18] sm:$0xff] }
 0x10e   : > { %3312 = vtanh.f32 %v663_v41 }
 0x115   : > { %v3307_v43 = vpop.eup %3306 }
 0x116   : > { %v3309_v45 = vpop.eup %3308  ;;  %v668_v47 = vadd.f32 1.0, %v3307_v43 }
 0x117   : > { %v674_v46 = vadd.f32 1.0, %v3309_v45  ;;  %v3311_v38 = vpop.eup %3310 }
 0x118   : > { %3314 = vrcp.f32 %v668_v47  ;;  %v3313_v48 = vpop.eup %3312  ;;  %v681_v51 = vadd.f32 1.0, %v3311_v38  ;;  %v714_v47 = vunpack.c.h.bf16 %v3107_v40 }
 0x119   : > { %3316 = vrcp.f32 %v674_v46 }
 0x11a   : > { %3318 = vrcp.f32 %v681_v51 }
 0x122   : > { %v3315_v49 = vpop.eup %3314 }
 0x123   : > { %v3317_v54 = vpop.eup %3316  ;;  %v685_v55 = vmul.f32 %v3315_v49, %v3313_v48 }
 0x124   : > { %v684_v56 = vmul.f32 0.0, %v3317_v54  ;;  %v3319_v59 = vpop.eup %3318 }
 0x126   : > { %v686_v57 = vadd.f32 %v685_v55, %v684_v56 }
 0x128   : > { %3320 = vtanh.f32 %v686_v57  ;;  %v3919_v58 = vsel %vm691_vm0, %v686_v57, 0.0 }
 0x132   : > { %v3321_v60 = vpop.eup %3320 }
 0x133   : > { %v688_v61 = vmul.f32 %v3321_v60, %v3319_v59  ;;  %v718_v59 = vadd.f32 %v714_v47, %v3909_v50  ;;  %v713_v60 = vunpack.c.l.bf16 %v3107_v40 }
 0x135   : > { %v689_v63 = vpack.c.bf16 %v688_v61, %v688_v61 }
 0x137   : > { %v693_v0 = vsel %vm692_vm1, %v689_v63, 0  ;;  %v3930_v35 = vsel %vm692_vm1, %v689_v63, %v3844_v33  ;;  %v3106_v33 = vld [vmem:[%s2890_s25 + $0x10] sm:$0xff]  ;;  %v717_v63 = vadd.f32 %v713_v60, %v3912_v62  ;;  %s3129_s25 = smul.u32 112, %s3640_s15 }
 0x138   : > { %696 = vst [vmem:[%s695_s24] sm:$0xf] %v693_v0  ;;  %752 = vmatmul.mubr.bf16.vlgmr.msra.gmra.mrb[4].mxu0 %v3930_v35  ;;  %793 = vmatmul.mubr.bf16.vlgmr.msra.gmra.mrb[4].mxu1 %v3930_v35  ;;  %v711_v37 = vunpack.c.l.bf16 %v3106_v33  ;;  %v712_v36 = vunpack.c.h.bf16 %v3106_v33  ;;  %s3127_s24 = smul.u32 36, %s3640_s15 }
 0x139   : > { %860 = vmatpush1.bf16.msra.mxu0 %v3725_v3  ;;  %901 = vmatpush1.bf16.msra.mxu1 %v3743_v8  ;;  %s2914_s26 = scalar_lea.vmem %s3896_s5, %s3129_s25 }
 0x13a   : > { %861 = vmatprep.subr.bf16.mxu0 %v3729_v4  ;;  %902 = vmatprep.subr.bf16.mxu1 %v3756_v11  ;;  %v715_v39 = vadd.f32 %v711_v37, %v3903_v42  ;;  %v716_v41 = vadd.f32 %v712_v36, %v3905_v44  ;;  %s2910_s22 = scalar_lea.vmem %s3926_s21, %s3127_s24 }
 0x13b   : > { %891 = vmatprep.mubr.bf16.mxu0 %v3650_v1  ;;  %932 = vmatprep.mubr.bf16.mxu1 %v3650_v1 }
 0x13d   : > { %862 = vmatpush1.bf16.msra.mxu0 %v3733_v5  ;;  %903 = vmatpush1.bf16.msra.mxu1 %v3759_v12 }
 0x13e   : > { %863 = vmatprep.subr.bf16.mxu0 %v3737_v6  ;;  %904 = vmatprep.subr.bf16.mxu1 %v3770_v15 }
 0x141   : > { %864 = vmatpush1.bf16.msra.mxu0 %v3747_v9  ;;  %905 = vmatpush1.bf16.msra.mxu1 %v3775_v16 }
 0x142   : > { %865 = vmatprep.subr.bf16.mxu0 %v3752_v10  ;;  %906 = vmatprep.subr.bf16.mxu1 %v3779_v17 }
 0x145   : > { %866 = vmatpush1.bf16.msra.mxu0 %v3764_v13  ;;  %907 = vmatpush1.bf16.msra.mxu1 %v3791_v20 }
 0x146   : > { %867 = vmatprep.subr.bf16.mxu0 %v3767_v14  ;;  %908 = vmatprep.subr.bf16.mxu1 %v3795_v21 }
 0x149   : > { %868 = vmatpush1.bf16.msra.mxu0 %v3783_v18  ;;  %909 = vmatpush1.bf16.msra.mxu1 %v3807_v24 }
 0x14a   : > { %869 = vmatprep.subr.bf16.mxu0 %v3787_v19  ;;  %910 = vmatprep.subr.bf16.mxu1 %v3811_v25 }
 0x14d   : > { %870 = vmatpush1.bf16.msra.mxu0 %v3798_v22  ;;  %911 = vmatpush1.bf16.msra.mxu1 %v3823_v28 }
 0x14e   : > { %871 = vmatprep.subr.bf16.mxu0 %v3802_v23  ;;  %912 = vmatprep.subr.bf16.mxu1 %v3827_v29 }
 0x151   : > { %872 = vmatpush1.bf16.msra.mxu0 %v3815_v26  ;;  %913 = vmatpush1.bf16.msra.mxu1 %v3836_v31 }
 0x152   : > { %873 = vmatprep.subr.bf16.mxu0 %v3819_v27  ;;  %914 = vmatprep.subr.bf16.mxu1 %v3840_v32 }
 0x155   : > { %874 = vmatpush1.bf16.msra.mxu0 %v3831_v30  ;;  %915 = vmatpush1.bf16.msra.mxu1 %v3848_v34 }
 0x156   : > { %999 = vmatprep.subr.bf16.mxu0 %v3722_v2  ;;  %1040 = vmatprep.subr.bf16.mxu1 %v3740_v7 }
 0x20b   : > { %v753_v43 = vpop.f32.mrb[4].mxu0  ;;  %v794_v45 = vpop.f32.mrb[4].mxu1 }
 0x20c   : > { %v801_v46 = vadd.f32 %v753_v43, %v715_v39  ;;  %v755_v38 = vpop.f32.mrb[5].mxu0  ;;  %v796_v48 = vpop.f32.mrb[5].mxu1  ;;  %v803_v33 = vadd.f32 %v794_v45, %v717_v63 }
 0x20d   : > { %v802_v49 = vadd.f32 %v755_v38, %v716_v41  ;;  %v757_v51 = vpop.f32.mrb[6].mxu0  ;;  %v798_v53 = vpop.f32.mrb[6].mxu1  ;;  %v804_v61 = vadd.f32 %v796_v48, %v718_v59 }
 0x20e   : > { %v3108_v54 = vmul.f32 -1.442695, %v801_v46  ;;  %v758_v55 = vpop.f32.mrb[7].mxu0  ;;  %v799_v56 = vpop.f32.mrb[7].mxu1 }
 0x20f   : > { %v3109_v57 = vmul.f32 -1.442695, %v802_v49  ;;  %v3110_v0 = vmul.f32 -1.442695, %v804_v61  ;;  %v830_v49 = vstv %s705_s28  ;;  %s1124_s28 = smul.u32 7, %s3640_s15 }
 0x210   : > { %3322 = vpow2.f32 %v3108_v54  ;;  %vm831_vm2 = vcmp.gt.s32.totalorder %v3916_v52, %v830_v49 }
 0x211   : > { %3324 = vpow2.f32 %v3109_v57  ;;  %vm832_vm3 = vmpackc.low %vm831_vm2, %vm831_vm2  ;;  %s1125_s29 = sadd.s32 4, %s1124_s28 }
 0x212   : > { %3326 = vpow2.f32 %v3110_v0  ;;  %v3115_v0 = vld [vmem:[%s2898_s7 + $0x28] sm:$0xff] }
 0x213   : > { %3328 = vtanh.f32 %v803_v33 }
 0x21a   : > { %v3323_v37 = vpop.eup %3322 }
 0x21b   : > { %v3325_v36 = vpop.eup %3324  ;;  %v808_v39 = vadd.f32 1.0, %v3323_v37 }
 0x21c   : > { %v814_v41 = vadd.f32 1.0, %v3325_v36  ;;  %v3327_v43 = vpop.eup %3326 }
 0x21d   : > { %3330 = vrcp.f32 %v808_v39  ;;  %v3329_v47 = vpop.eup %3328  ;;  %v821_v48 = vadd.f32 1.0, %v3327_v43  ;;  %v854_v39 = vunpack.c.h.bf16 %v3115_v0 }
 0x21e   : > { %3332 = vrcp.f32 %v814_v41 }
 0x21f   : > { %3334 = vrcp.f32 %v821_v48 }
 0x227   : > { %v3331_v40 = vpop.eup %3330 }
 0x228   : > { %v3333_v46 = vpop.eup %3332  ;;  %v825_v38 = vmul.f32 %v3331_v40, %v3329_v47 }
 0x229   : > { %v824_v45 = vmul.f32 %v3333_v46, %v3919_v58  ;;  %v3335_v54 = vpop.eup %3334 }
 0x22b   : > { %v826_v51 = vadd.f32 %v825_v38, %v824_v45 }
 0x22d   : > { %3336 = vtanh.f32 %v826_v51  ;;  %v3978_v53 = vsel %vm831_vm2, %v826_v51, %v3919_v58  ;;  %v3114_v58 = vld [vmem:[%s2898_s7 + $0x20] sm:$0xff]  ;;  %s3137_s7 = smul.u32 80, %s3640_s15 }
 0x22e   : > { %v852_v61 = vunpack.c.h.bf16 %v3114_v58 }
 0x22f   : > { %s2922_s8 = scalar_lea.vmem %s3896_s5, %s3137_s7 }
 0x230   : > { %v856_v33 = vadd.f32 %v852_v61, %v3905_v44 }
 0x237   : > { %v3337_v55 = vpop.eup %3336 }
 0x238   : > { %v828_v56 = vmul.f32 %v3337_v55, %v3335_v54  ;;  %v858_v54 = vadd.f32 %v854_v39, %v3909_v50  ;;  %v853_v55 = vunpack.c.l.bf16 %v3115_v0 }
 0x23a   : > { %v829_v57 = vpack.c.bf16 %v828_v56, %v828_v56 }
 0x23c   : > { %v833_v59 = vsel %vm832_vm3, %v829_v57, 0  ;;  %v3983_v60 = vsel %vm832_vm3, %v829_v57, %v3930_v35  ;;  %v851_v35 = vunpack.c.l.bf16 %v3114_v58  ;;  %v857_v57 = vadd.f32 %v853_v55, %v3912_v62 }
 0x23d   : > { %3112 = vst [vmem:[%s2894_s30 + $0x4] sm:$0xf] %v833_v59  ;;  %892 = vmatmul.mubr.bf16.vlgmr.msra.gmra.mrb[8].mxu0 %v3983_v60  ;;  %933 = vmatmul.mubr.bf16.vlgmr.msra.gmra.mrb[8].mxu1 %v3983_v60  ;;  %s3135_s30 = smul.u32 28, %s3640_s15 }
 0x23e   : > { %1000 = vmatpush1.bf16.msra.mxu0 %v3725_v3  ;;  %1041 = vmatpush1.bf16.msra.mxu1 %v3743_v8  ;;  %v855_v63 = vadd.f32 %v851_v35, %v3903_v42 }
 0x23f   : > { %1001 = vmatprep.subr.bf16.mxu0 %v3729_v4  ;;  %1042 = vmatprep.subr.bf16.mxu1 %v3756_v11  ;;  %s2918_s6 = scalar_lea.vmem %s3926_s21, %s3135_s30  ;;  %s2940_s30 = scalar_lea.vmem %s3926_s21, %s3063_s19 }
 0x240   : > { %1031 = vmatprep.mubr.bf16.mxu0 %v3650_v1  ;;  %1072 = vmatprep.mubr.bf16.mxu1 %v3650_v1  ;;  %s1678_s19 = ssub.s32 8, %s3640_s15 }
 0x242   : > { %1002 = vmatpush1.bf16.msra.mxu0 %v3733_v5  ;;  %1043 = vmatpush1.bf16.msra.mxu1 %v3759_v12 }
 0x243   : > { %1003 = vmatprep.subr.bf16.mxu0 %v3737_v6  ;;  %1044 = vmatprep.subr.bf16.mxu1 %v3770_v15 }
 0x246   : > { %1004 = vmatpush1.bf16.msra.mxu0 %v3747_v9  ;;  %1045 = vmatpush1.bf16.msra.mxu1 %v3775_v16 }
 0x247   : > { %1005 = vmatprep.subr.bf16.mxu0 %v3752_v10  ;;  %1046 = vmatprep.subr.bf16.mxu1 %v3779_v17 }
 0x24a   : > { %1006 = vmatpush1.bf16.msra.mxu0 %v3764_v13  ;;  %1047 = vmatpush1.bf16.msra.mxu1 %v3791_v20 }
 0x24b   : > { %1007 = vmatprep.subr.bf16.mxu0 %v3767_v14  ;;  %1048 = vmatprep.subr.bf16.mxu1 %v3795_v21 }
 0x24e   : > { %1008 = vmatpush1.bf16.msra.mxu0 %v3783_v18  ;;  %1049 = vmatpush1.bf16.msra.mxu1 %v3807_v24 }
 0x24f   : > { %1009 = vmatprep.subr.bf16.mxu0 %v3787_v19  ;;  %1050 = vmatprep.subr.bf16.mxu1 %v3811_v25 }
 0x252   : > { %1010 = vmatpush1.bf16.msra.mxu0 %v3798_v22  ;;  %1051 = vmatpush1.bf16.msra.mxu1 %v3823_v28 }
 0x253   : > { %1011 = vmatprep.subr.bf16.mxu0 %v3802_v23  ;;  %1052 = vmatprep.subr.bf16.mxu1 %v3827_v29 }
 0x256   : > { %1012 = vmatpush1.bf16.msra.mxu0 %v3815_v26  ;;  %1053 = vmatpush1.bf16.msra.mxu1 %v3836_v31 }
 0x257   : > { %1013 = vmatprep.subr.bf16.mxu0 %v3819_v27  ;;  %1054 = vmatprep.subr.bf16.mxu1 %v3840_v32 }
 0x25a   : > { %1014 = vmatpush1.bf16.msra.mxu0 %v3831_v30  ;;  %1055 = vmatpush1.bf16.msra.mxu1 %v3848_v34 }
 0x25b   : > { %1139 = vmatprep.subr.bf16.mxu0 %v3722_v2  ;;  %1180 = vmatprep.subr.bf16.mxu1 %v3740_v7 }
 0x310   : > { %v893_v37 = vpop.f32.mrb[8].mxu0  ;;  %v934_v36 = vpop.f32.mrb[8].mxu1 }
 0x311   : > { %v941_v41 = vadd.f32 %v893_v37, %v855_v63  ;;  %v895_v43 = vpop.f32.mrb[9].mxu0  ;;  %v936_v47 = vpop.f32.mrb[9].mxu1  ;;  %v943_v58 = vadd.f32 %v934_v36, %v857_v57 }
 0x312   : > { %v942_v40 = vadd.f32 %v895_v43, %v856_v33  ;;  %v897_v46 = vpop.f32.mrb[10].mxu0  ;;  %v938_v38 = vpop.f32.mrb[10].mxu1  ;;  %v944_v56 = vadd.f32 %v936_v47, %v858_v54 }
 0x313   : > { %v3116_v48 = vmul.f32 -1.442695, %v941_v41  ;;  %v898_v45 = vpop.f32.mrb[11].mxu0  ;;  %v939_v49 = vpop.f32.mrb[11].mxu1 }
 0x314   : > { %v3117_v51 = vmul.f32 -1.442695, %v942_v40  ;;  %v3118_v59 = vmul.f32 -1.442695, %v944_v56  ;;  %v970_v40 = vstv %s845_s9  ;;  %s1264_s9 = smul.u32 5, %s3640_s15 }
 0x315   : > { %3338 = vpow2.f32 %v3116_v48  ;;  %vm971_vm4 = vcmp.gt.s32.totalorder %v3916_v52, %v970_v40 }
 0x316   : > { %3340 = vpow2.f32 %v3117_v51  ;;  %vm972_vm5 = vmpackc.low %vm971_vm4, %vm971_vm4  ;;  %s1265_s10 = sadd.s32 5, %s1264_s9 }
 0x317   : > { %3342 = vpow2.f32 %v3118_v59  ;;  %v3123_v59 = vld [vmem:[%s2906_s13 + $0x38] sm:$0xff] }
 0x318   : > { %3344 = vtanh.f32 %v943_v58 }
 0x31f   : > { %v3339_v35 = vpop.eup %3338 }
 0x320   : > { %v3341_v61 = vpop.eup %3340  ;;  %v948_v63 = vadd.f32 1.0, %v3339_v35 }
 0x321   : > { %v954_v33 = vadd.f32 1.0, %v3341_v61  ;;  %v3343_v37 = vpop.eup %3342 }
 0x322   : > { %3346 = vrcp.f32 %v948_v63  ;;  %v3345_v39 = vpop.eup %3344  ;;  %v961_v47 = vadd.f32 1.0, %v3343_v37  ;;  %v994_v63 = vunpack.c.h.bf16 %v3123_v59 }
 0x323   : > { %3348 = vrcp.f32 %v954_v33 }
 0x324   : > { %3350 = vrcp.f32 %v961_v47  ;;  %v998_v40 = vadd.f32 %v994_v63, %v3909_v50 }
 0x32c   : > { %v3347_v0 = vpop.eup %3346 }
 0x32d   : > { %v3349_v41 = vpop.eup %3348  ;;  %v965_v43 = vmul.f32 %v3347_v0, %v3345_v39 }
 0x32e   : > { %v964_v36 = vmul.f32 %v3349_v41, %v3978_v53  ;;  %v3351_v48 = vpop.eup %3350 }
 0x330   : > { %v966_v46 = vadd.f32 %v965_v43, %v964_v36 }
 0x332   : > { %3352 = vtanh.f32 %v966_v46  ;;  %v4031_v38 = vsel %vm971_vm4, %v966_v46, %v3978_v53  ;;  %v3122_v53 = vld [vmem:[%s2906_s13 + $0x30] sm:$0xff]  ;;  %v993_v46 = vunpack.c.l.bf16 %v3123_v59  ;;  %s3145_s13 = smul.u32 48, %s3640_s15 }
 0x333   : > { %v992_v56 = vunpack.c.h.bf16 %v3122_v53 }
 0x334   : > { %s2930_s14 = scalar_lea.vmem %s3896_s5, %s3145_s13 }
 0x335   : > { %v996_v58 = vadd.f32 %v992_v56, %v3905_v44 }
 0x33c   : > { %v3353_v45 = vpop.eup %3352 }
 0x33d   : > { %v968_v49 = vmul.f32 %v3353_v45, %v3351_v48  ;;  %v997_v45 = vadd.f32 %v993_v46, %v3912_v62 }
 0x33f   : > { %v969_v51 = vpack.c.bf16 %v968_v49, %v968_v49 }
 0x341   : > { %v973_v54 = vsel %vm972_vm5, %v969_v51, 0  ;;  %v4036_v55 = vsel %vm972_vm5, %v969_v51, %v3983_v60  ;;  %v991_v60 = vunpack.c.l.bf16 %v3122_v53 }
 0x342   : > { %3120 = vst [vmem:[%s2902_s11 + $0x8] sm:$0xf] %v973_v54  ;;  %1032 = vmatmul.mubr.bf16.vlgmr.msra.gmra.mrb[12].mxu0 %v4036_v55  ;;  %1073 = vmatmul.mubr.bf16.vlgmr.msra.gmra.mrb[12].mxu1 %v4036_v55  ;;  %s3143_s11 = smul.u32 20, %s3640_s15 }
 0x343   : > { %1140 = vmatpush1.bf16.msra.mxu0 %v3725_v3  ;;  %1181 = vmatpush1.bf16.msra.mxu1 %v3743_v8  ;;  %v995_v57 = vadd.f32 %v991_v60, %v3903_v42 }
 0x344   : > { %1141 = vmatprep.subr.bf16.mxu0 %v3729_v4  ;;  %1182 = vmatprep.subr.bf16.mxu1 %v3756_v11  ;;  %s2926_s12 = scalar_lea.vmem %s3926_s21, %s3143_s11 }
 0x345   : > { %1171 = vmatprep.mubr.bf16.mxu0 %v3650_v1  ;;  %1212 = vmatprep.mubr.bf16.mxu1 %v3650_v1 }
 0x347   : > { %1142 = vmatpush1.bf16.msra.mxu0 %v3733_v5  ;;  %1183 = vmatpush1.bf16.msra.mxu1 %v3759_v12 }
 0x348   : > { %1143 = vmatprep.subr.bf16.mxu0 %v3737_v6  ;;  %1184 = vmatprep.subr.bf16.mxu1 %v3770_v15 }
 0x34b   : > { %1144 = vmatpush1.bf16.msra.mxu0 %v3747_v9  ;;  %1185 = vmatpush1.bf16.msra.mxu1 %v3775_v16 }
 0x34c   : > { %1145 = vmatprep.subr.bf16.mxu0 %v3752_v10  ;;  %1186 = vmatprep.subr.bf16.mxu1 %v3779_v17 }
 0x34f   : > { %1146 = vmatpush1.bf16.msra.mxu0 %v3764_v13  ;;  %1187 = vmatpush1.bf16.msra.mxu1 %v3791_v20 }
 0x350   : > { %1147 = vmatprep.subr.bf16.mxu0 %v3767_v14  ;;  %1188 = vmatprep.subr.bf16.mxu1 %v3795_v21 }
 0x353   : > { %1148 = vmatpush1.bf16.msra.mxu0 %v3783_v18  ;;  %1189 = vmatpush1.bf16.msra.mxu1 %v3807_v24 }
 0x354   : > { %1149 = vmatprep.subr.bf16.mxu0 %v3787_v19  ;;  %1190 = vmatprep.subr.bf16.mxu1 %v3811_v25 }
 0x357   : > { %1150 = vmatpush1.bf16.msra.mxu0 %v3798_v22  ;;  %1191 = vmatpush1.bf16.msra.mxu1 %v3823_v28 }
 0x358   : > { %1151 = vmatprep.subr.bf16.mxu0 %v3802_v23  ;;  %1192 = vmatprep.subr.bf16.mxu1 %v3827_v29 }
 0x35b   : > { %1152 = vmatpush1.bf16.msra.mxu0 %v3815_v26  ;;  %1193 = vmatpush1.bf16.msra.mxu1 %v3836_v31 }
 0x35c   : > { %1153 = vmatprep.subr.bf16.mxu0 %v3819_v27  ;;  %1194 = vmatprep.subr.bf16.mxu1 %v3840_v32 }
 0x35f   : > { %1154 = vmatpush1.bf16.msra.mxu0 %v3831_v30  ;;  %1195 = vmatpush1.bf16.msra.mxu1 %v3848_v34 }
 0x360   : > { %1279 = vmatprep.subr.bf16.mxu0 %v3722_v2  ;;  %1320 = vmatprep.subr.bf16.mxu1 %v3740_v7 }
 0x415   : > { %v1033_v35 = vpop.f32.mrb[12].mxu0  ;;  %v1074_v61 = vpop.f32.mrb[12].mxu1 }
 0x416   : > { %v1081_v33 = vadd.f32 %v1033_v35, %v995_v57  ;;  %v1035_v37 = vpop.f32.mrb[13].mxu0  ;;  %v1076_v39 = vpop.f32.mrb[13].mxu1  ;;  %v1083_v51 = vadd.f32 %v1074_v61, %v997_v45 }
 0x417   : > { %v1082_v0 = vadd.f32 %v1035_v37, %v996_v58  ;;  %v1037_v2 = vpop.f32.mrb[14].mxu0  ;;  %v1078_v41 = vpop.f32.mrb[14].mxu1  ;;  %v1084_v48 = vadd.f32 %v1076_v39, %v998_v40  ;;  %v1110_v37 = vstv %s985_s20  ;;  %s1404_s20 = smul.u32 3, %s3640_s15 }
 0x418   : > { %v3124_v7 = vmul.f32 -1.442695, %v1081_v33  ;;  %v1038_v43 = vpop.f32.mrb[15].mxu0  ;;  %v1079_v47 = vpop.f32.mrb[15].mxu1  ;;  %vm1111_vm6 = vcmp.gt.s32.totalorder %v3916_v52, %v1110_v37  ;;  %v4161_v37 = vld [vmem:[%s3719_s27 + $0x24] ss:$16 sps:$4 sm:$0xff]  }
 0x419   : > { %v3125_v36 = vmul.f32 -1.442695, %v1082_v0  ;;  %v3126_v49 = vmul.f32 -1.442695, %v1084_v48  ;;  %vm1112_vm7 = vmpackc.low %vm1111_vm6, %vm1111_vm6  ;;  %s1405_s24 = sadd.s32 6, %s1404_s20 }
 0x41a   : > { %3354 = vpow2.f32 %v3124_v7 }
 0x41b   : > { %3356 = vpow2.f32 %v3125_v36 }
 0x41c   : > { %3358 = vpow2.f32 %v3126_v49 }
 0x41d   : > { %3360 = vtanh.f32 %v1083_v51 }
 0x424   : > { %v3355_v54 = vpop.eup %3354 }
 0x425   : > { %v3357_v53 = vpop.eup %3356  ;;  %v1088_v60 = vadd.f32 1.0, %v3355_v54  ;;  %v1250_v54 = vstv %s1125_s29  ;;  %s1544_s29 = sadd.s32 7, %s3640_s15 }
 0x426   : > { %v1094_v56 = vadd.f32 1.0, %v3357_v53  ;;  %v3359_v57 = vpop.eup %3358  ;;  %vm1251_vm8 = vcmp.gt.s32.totalorder %v3916_v52, %v1250_v54 }
 0x427   : > { %3362 = vrcp.f32 %v1088_v60  ;;  %v3361_v58 = vpop.eup %3360  ;;  %v1101_v33 = vadd.f32 1.0, %v3359_v57  ;;  %vm1252_vm9 = vmpackc.low %vm1251_vm8, %vm1251_vm8 }
 0x428   : > { %3364 = vrcp.f32 %v1094_v56 }
 0x429   : > { %3366 = vrcp.f32 %v1101_v33  ;;  %v4153_v33 = vld [vmem:[%s3719_s27] ss:$16 sps:$4 sm:$0xff]  }
 0x431   : > { %v3363_v59 = vpop.eup %3362 }
 0x432   : > { %v3365_v35 = vpop.eup %3364  ;;  %v1105_v63 = vmul.f32 %v3363_v59, %v3361_v58 }
 0x433   : > { %v1104_v61 = vmul.f32 %v3365_v35, %v4031_v38  ;;  %v3367_v2 = vpop.eup %3366 }
 0x435   : > { %v1106_v39 = vadd.f32 %v1105_v63, %v1104_v61  ;;  %v4157_v61 = vld [vmem:[%s3719_s27 + $0x8] ss:$16 sps:$4 sm:$0xff]  }
 0x437   : > { %3368 = vtanh.f32 %v1106_v39  ;;  %v4084_v0 = vsel %vm1111_vm6, %v1106_v39, %v4031_v38  ;;  %v4165_v39 = vld [vmem:[%s3719_s27 + $0x2c] ss:$16 sps:$4 sm:$0xff]  }
 0x441   : > { %v3369_v41 = vpop.eup %3368 }
 0x442   : > { %v1108_v7 = vmul.f32 %v3369_v41, %v3367_v2  ;;  %v4175_v2 = vld [vmem:[%s3719_s27 + $0x28] ss:$16 sps:$4 sm:$0xff]   ;;  %v4179_v41 = vld [vmem:[%s3719_s27 + $0x44] ss:$16 sps:$4 sm:$0xff]  }
 0x444   : > { %v1109_v43 = vpack.c.bf16 %v1108_v7, %v1108_v7  ;;  %v4183_v7 = vld [vmem:[%s3719_s27 + $0x4c] ss:$16 sps:$4 sm:$0xff]  }
 0x446   : > { %v1113_v47 = vsel %vm1112_vm7, %v1109_v43, 0  ;;  %v4089_v36 = vsel %vm1112_vm7, %v1109_v43, %v4036_v55  ;;  %v4187_v43 = vld [vmem:[%s3719_s27 + $0x40] ss:$16 sps:$4 sm:$0xff]  }
 0x447   : > { %3128 = vst [vmem:[%s2910_s22 + $0xc] sm:$0xf] %v1113_v47  ;;  %1172 = vmatmul.mubr.bf16.vlgmr.msra.gmra.mrb[16].mxu0 %v4089_v36  ;;  %1213 = vmatmul.mubr.bf16.vlgmr.msra.gmra.mrb[16].mxu1 %v4089_v36  ;;  %v4191_v47 = vld [vmem:[%s3719_s27 + $0x48] ss:$16 sps:$4 sm:$0xff]   ;;  %s3151_s22 = smul.u32 12, %s3640_s15 }
 0x448   : > { %1280 = vmatpush1.bf16.msra.mxu0 %v3725_v3  ;;  %1321 = vmatpush1.bf16.msra.mxu1 %v3743_v8  ;;  %v4126_v3 = vld [vmem:[%s3719_s27 + $0x4] ss:$16 sps:$4 sm:$0xff]  }
 0x449   : > { %1281 = vmatprep.subr.bf16.mxu0 %v3729_v4  ;;  %1322 = vmatprep.subr.bf16.mxu1 %v3756_v11  ;;  %v4130_v4 = vld [vmem:[%s3719_s27 + $0xc] ss:$16 sps:$4 sm:$0xff]   ;;  %s2934_s25 = scalar_lea.vmem %s3926_s21, %s3151_s22 }
 0x44a   : > { %1311 = vmatprep.mubr.bf16.mxu0 %v3650_v1  ;;  %1352 = vmatprep.mubr.bf16.mxu1 %v3650_v1 }
 0x44c   : > { %1282 = vmatpush1.bf16.msra.mxu0 %v3733_v5  ;;  %1323 = vmatpush1.bf16.msra.mxu1 %v3759_v12  ;;  %v3130_v5 = vld [vmem:[%s2914_s26 + $0x40] sm:$0xff] }
 0x44d   : > { %1283 = vmatprep.subr.bf16.mxu0 %v3737_v6  ;;  %1324 = vmatprep.subr.bf16.mxu1 %v3770_v15  ;;  %v1131_v6 = vunpack.c.l.bf16 %v3130_v5  ;;  %v1132_v8 = vunpack.c.h.bf16 %v3130_v5  ;;  %v4199_v5 = vld [vmem:[%s3719_s27 + $0x6c] ss:$16 sps:$4 sm:$0xff]  }
 0x44f   : > { %v1136_v11 = vadd.f32 %v1132_v8, %v3905_v44  ;;  %v4207_v8 = vld [vmem:[%s3719_s27 + $0x68] ss:$16 sps:$4 sm:$0xff]  }
 0x450   : > { %1284 = vmatpush1.bf16.msra.mxu0 %v3747_v9  ;;  %1325 = vmatpush1.bf16.msra.mxu1 %v3775_v16  ;;  %v1135_v9 = vadd.f32 %v1131_v6, %v3903_v42  ;;  %v4203_v6 = vld [vmem:[%s3719_s27 + $0x60] ss:$16 sps:$4 sm:$0xff]  }
 0x451   : > { %1285 = vmatprep.subr.bf16.mxu0 %v3752_v10  ;;  %1326 = vmatprep.subr.bf16.mxu1 %v3779_v17  ;;  %v3131_v10 = vld [vmem:[%s2914_s26 + $0x48] sm:$0xff]  ;;  %s3153_s26 = sshll.u32 %s3640_s15, 4 }
 0x452   : > { %s2937_s28 = scalar_lea.vmem %s3896_s5, %s3153_s26 }
 0x454   : > { %1286 = vmatpush1.bf16.msra.mxu0 %v3764_v13  ;;  %1327 = vmatpush1.bf16.msra.mxu1 %v3791_v20 }
 0x455   : > { %1287 = vmatprep.subr.bf16.mxu0 %v3767_v14  ;;  %1328 = vmatprep.subr.bf16.mxu1 %v3795_v21  ;;  %v1134_v14 = vunpack.c.h.bf16 %v3131_v10 }
 0x458   : > { %1288 = vmatpush1.bf16.msra.mxu0 %v3783_v18  ;;  %1329 = vmatpush1.bf16.msra.mxu1 %v3807_v24 }
 0x459   : > { %1289 = vmatprep.subr.bf16.mxu0 %v3787_v19  ;;  %1330 = vmatprep.subr.bf16.mxu1 %v3811_v25  ;;  %v1138_v25 = vadd.f32 %v1134_v14, %v3909_v50  ;;  %v4231_v14 = vld [vmem:[%s3719_s27 + $0xac] ss:$16 sps:$4 sm:$0xff]  }
 0x45c   : > { %1290 = vmatpush1.bf16.msra.mxu0 %v3798_v22  ;;  %1331 = vmatpush1.bf16.msra.mxu1 %v3823_v28 }
 0x45d   : > { %1291 = vmatprep.subr.bf16.mxu0 %v3802_v23  ;;  %1332 = vmatprep.subr.bf16.mxu1 %v3827_v29 }
 0x460   : > { %1292 = vmatpush1.bf16.msra.mxu0 %v3815_v26  ;;  %1333 = vmatpush1.bf16.msra.mxu1 %v3836_v31  ;;  %v1133_v26 = vunpack.c.l.bf16 %v3131_v10  ;;  %v4215_v10 = vld [vmem:[%s3719_s27 + $0x8c] ss:$16 sps:$4 sm:$0xff]  }
 0x461   : > { %1293 = vmatprep.subr.bf16.mxu0 %v3819_v27  ;;  %1334 = vmatprep.subr.bf16.mxu1 %v3840_v32 }
 0x462   : > { %v1137_v28 = vadd.f32 %v1133_v26, %v3912_v62 }
 0x464   : > { %1294 = vmatpush1.bf16.msra.mxu0 %v3831_v30  ;;  %1335 = vmatpush1.bf16.msra.mxu1 %v3848_v34 }
 0x465   : > { %1419 = vmatprep.subr.bf16.mxu0 %v4126_v3  ;;  %1460 = vmatprep.subr.bf16.mxu1 %v4130_v4 }
 0x51a   : > { %v1173_v12 = vpop.f32.mrb[16].mxu0  ;;  %v1214_v13 = vpop.f32.mrb[16].mxu1 }
 0x51b   : > { %v1221_v15 = vadd.f32 %v1173_v12, %v1135_v9  ;;  %v1175_v16 = vpop.f32.mrb[17].mxu0  ;;  %v1216_v17 = vpop.f32.mrb[17].mxu1  ;;  %v1223_v30 = vadd.f32 %v1214_v13, %v1137_v28  ;;  %v4211_v9 = vld [vmem:[%s3719_s27 + $0x84] ss:$16 sps:$4 sm:$0xff]   ;;  %v4223_v12 = vld [vmem:[%s3719_s27 + $0x88] ss:$16 sps:$4 sm:$0xff]  }
 0x51c   : > { %v1222_v18 = vadd.f32 %v1175_v16, %v1136_v11  ;;  %v1177_v19 = vpop.f32.mrb[18].mxu0  ;;  %v1218_v20 = vpop.f32.mrb[18].mxu1  ;;  %v1224_v27 = vadd.f32 %v1216_v17, %v1138_v25  ;;  %v4219_v11 = vld [vmem:[%s3719_s27 + $0x80] ss:$16 sps:$4 sm:$0xff]   ;;  %v4227_v13 = vld [vmem:[%s3719_s27 + $0xa4] ss:$16 sps:$4 sm:$0xff]  }
 0x51d   : > { %v3132_v21 = vmul.f32 -1.442695, %v1221_v15  ;;  %v1178_v22 = vpop.f32.mrb[19].mxu0  ;;  %v1219_v23 = vpop.f32.mrb[19].mxu1  ;;  %v4235_v15 = vld [vmem:[%s3719_s27 + $0xa0] ss:$16 sps:$4 sm:$0xff]  }
 0x51e   : > { %v3133_v24 = vmul.f32 -1.442695, %v1222_v18  ;;  %v3134_v29 = vmul.f32 -1.442695, %v1224_v27  ;;  %v4239_v16 = vld [vmem:[%s3719_s27 + $0xa8] ss:$16 sps:$4 sm:$0xff]  }
 0x51f   : > { %3370 = vpow2.f32 %v3132_v21  ;;  %v4243_v17 = vld [vmem:[%s3719_s27 + $0xc4] ss:$16 sps:$4 sm:$0xff]   ;;  %v4247_v18 = vld [vmem:[%s3719_s27 + $0xcc] ss:$16 sps:$4 sm:$0xff]   ;;  %v4251_v19 = vld [vmem:[%s3719_s27 + $0xc0] ss:$16 sps:$4 sm:$0xff]  }
 0x520   : > { %3372 = vpow2.f32 %v3133_v24  ;;  %v4255_v20 = vld [vmem:[%s3719_s27 + $0xc8] ss:$16 sps:$4 sm:$0xff]   ;;  %v4259_v21 = vld [vmem:[%s3719_s27 + $0xe4] ss:$16 sps:$4 sm:$0xff]   ;;  %v4263_v22 = vld [vmem:[%s3719_s27 + $0xec] ss:$16 sps:$4 sm:$0xff]  }
 0x521   : > { %3374 = vpow2.f32 %v3134_v29  ;;  %v4267_v23 = vld [vmem:[%s3719_s27 + $0xe0] ss:$16 sps:$4 sm:$0xff]   ;;  %v4271_v24 = vld [vmem:[%s3719_s27 + $0xe8] ss:$16 sps:$4 sm:$0xff]  }
 0x522   : > { %3376 = vtanh.f32 %v1223_v30  ;;  %v3138_v25 = vld [vmem:[%s2922_s8 + $0x50] sm:$0xff]  ;;  %v3139_v29 = vld [vmem:[%s2922_s8 + $0x58] sm:$0xff]  ;;  %s1682_s8 = smul.u32 4294967295, %s3640_s15 }
 0x523   : > { %v1271_v26 = vunpack.c.l.bf16 %v3138_v25  ;;  %v1272_v27 = vunpack.c.h.bf16 %v3138_v25 }
 0x524   : > { %s1683_s9 = sadd.s32 8, %s1682_s8 }
 0x525   : > { %v1275_v28 = vadd.f32 %v1271_v26, %v3903_v42  ;;  %v1276_v30 = vadd.f32 %v1272_v27, %v3905_v44 }
 0x529   : > { %v3371_v31 = vpop.eup %3370 }
 0x52a   : > { %v3373_v32 = vpop.eup %3372  ;;  %v1228_v34 = vadd.f32 1.0, %v3371_v31 }
 0x52b   : > { %v1234_v38 = vadd.f32 1.0, %v3373_v32  ;;  %v3375_v55 = vpop.eup %3374 }
 0x52c   : > { %3378 = vrcp.f32 %v1228_v34  ;;  %v3377_v40 = vpop.eup %3376  ;;  %v1241_v49 = vadd.f32 1.0, %v3375_v55  ;;  %v1274_v34 = vunpack.c.h.bf16 %v3139_v29 }
 0x52d   : > { %3380 = vrcp.f32 %v1234_v38 }
 0x52e   : > { %3382 = vrcp.f32 %v1241_v49 }
 0x536   : > { %v3379_v46 = vpop.eup %3378 }
 0x537   : > { %v3381_v48 = vpop.eup %3380  ;;  %v1245_v45 = vmul.f32 %v3379_v46, %v3377_v40 }
 0x538   : > { %v1244_v51 = vmul.f32 %v3381_v48, %v4084_v0  ;;  %v3383_v56 = vpop.eup %3382 }
 0x53a   : > { %v1246_v53 = vadd.f32 %v1245_v45, %v1244_v51 }
 0x53c   : > { %3384 = vtanh.f32 %v1246_v53  ;;  %v4143_v60 = vsel %vm1251_vm8, %v1246_v53, %v4084_v0  ;;  %v4171_v0 = vld [vmem:[%s3719_s27 + $0x20] ss:$16 sps:$4 sm:$0xff]  }
 0x546   : > { %v3385_v57 = vpop.eup %3384 }
 0x547   : > { %v1248_v58 = vmul.f32 %v3385_v57, %v3383_v56  ;;  %v1278_v56 = vadd.f32 %v1274_v34, %v3909_v50  ;;  %v1273_v57 = vunpack.c.l.bf16 %v3139_v29 }
 0x549   : > { %v1249_v59 = vpack.c.bf16 %v1248_v58, %v1248_v58 }
 0x54b   : > { %v1253_v35 = vsel %vm1252_vm9, %v1249_v59, 0  ;;  %v4148_v63 = vsel %vm1252_vm9, %v1249_v59, %v4089_v36  ;;  %v4195_v36 = vld [vmem:[%s3719_s27 + $0x64] ss:$16 sps:$4 sm:$0xff]   ;;  %v1277_v59 = vadd.f32 %v1273_v57, %v3912_v62 }
 0x54c   : > { %3136 = vst [vmem:[%s2918_s6 + $0x10] sm:$0xf] %v1253_v35  ;;  %1312 = vmatmul.mubr.bf16.vlgmr.msra.gmra.mrb[20].mxu0 %v4148_v63  ;;  %1353 = vmatmul.mubr.bf16.vlgmr.msra.gmra.mrb[20].mxu1 %v4148_v63  ;;  %s3230_s6 = sshll.u32 %s1678_s19, 4 }
 0x54d   : > { %1420 = vmatpush1.bf16.msra.mxu0 %v4153_v33  ;;  %1461 = vmatpush1.bf16.msra.mxu1 %v4157_v61  ;;  %s1686_s7 = scalar_lea.vmem %s3896_s5, %s3230_s6  ;;  %s3183_s6 = smul.u32 4294967184, %s3640_s15 }
 0x54e   : > { %1421 = vmatprep.subr.bf16.mxu0 %v4161_v37  ;;  %1462 = vmatprep.subr.bf16.mxu1 %v4165_v39 }
 0x54f   : > { %1451 = vmatprep.mubr.bf16.mxu0 %v3650_v1  ;;  %1492 = vmatprep.mubr.bf16.mxu1 %v3650_v1 }
 0x551   : > { %1422 = vmatpush1.bf16.msra.mxu0 %v4171_v0  ;;  %1463 = vmatpush1.bf16.msra.mxu1 %v4175_v2 }
 0x552   : > { %1423 = vmatprep.subr.bf16.mxu0 %v4179_v41  ;;  %1464 = vmatprep.subr.bf16.mxu1 %v4183_v7 }
 0x555   : > { %1424 = vmatpush1.bf16.msra.mxu0 %v4187_v43  ;;  %1465 = vmatpush1.bf16.msra.mxu1 %v4191_v47 }
 0x556   : > { %1425 = vmatprep.subr.bf16.mxu0 %v4195_v36  ;;  %1466 = vmatprep.subr.bf16.mxu1 %v4199_v5 }
 0x559   : > { %1426 = vmatpush1.bf16.msra.mxu0 %v4203_v6  ;;  %1467 = vmatpush1.bf16.msra.mxu1 %v4207_v8 }
 0x55a   : > { %1427 = vmatprep.subr.bf16.mxu0 %v4211_v9  ;;  %1468 = vmatprep.subr.bf16.mxu1 %v4215_v10 }
 0x55d   : > { %1428 = vmatpush1.bf16.msra.mxu0 %v4219_v11  ;;  %1469 = vmatpush1.bf16.msra.mxu1 %v4223_v12 }
 0x55e   : > { %1429 = vmatprep.subr.bf16.mxu0 %v4227_v13  ;;  %1470 = vmatprep.subr.bf16.mxu1 %v4231_v14 }
 0x561   : > { %1430 = vmatpush1.bf16.msra.mxu0 %v4235_v15  ;;  %1471 = vmatpush1.bf16.msra.mxu1 %v4239_v16 }
 0x562   : > { %1431 = vmatprep.subr.bf16.mxu0 %v4243_v17  ;;  %1472 = vmatprep.subr.bf16.mxu1 %v4247_v18 }
 0x565   : > { %1432 = vmatpush1.bf16.msra.mxu0 %v4251_v19  ;;  %1473 = vmatpush1.bf16.msra.mxu1 %v4255_v20 }
 0x566   : > { %1433 = vmatprep.subr.bf16.mxu0 %v4259_v21  ;;  %1474 = vmatprep.subr.bf16.mxu1 %v4263_v22 }
 0x569   : > { %1434 = vmatpush1.bf16.msra.mxu0 %v4267_v23  ;;  %1475 = vmatpush1.bf16.msra.mxu1 %v4271_v24 }
 0x56a   : > { %1558 = vmatprep.subr.bf16.mxu0 %v4126_v3  ;;  %1599 = vmatprep.subr.bf16.mxu1 %v4130_v4 }
 0x61f   : > { %v1313_v31 = vpop.f32.mrb[20].mxu0  ;;  %v1354_v32 = vpop.f32.mrb[20].mxu1 }
 0x620   : > { %v1361_v38 = vadd.f32 %v1313_v31, %v1275_v28  ;;  %v1315_v55 = vpop.f32.mrb[21].mxu0  ;;  %v1356_v40 = vpop.f32.mrb[21].mxu1  ;;  %v1363_v25 = vadd.f32 %v1354_v32, %v1277_v59 }
 0x621   : > { %v1362_v46 = vadd.f32 %v1315_v55, %v1276_v30  ;;  %v1317_v48 = vpop.f32.mrb[22].mxu0  ;;  %v1358_v45 = vpop.f32.mrb[22].mxu1  ;;  %v1364_v58 = vadd.f32 %v1356_v40, %v1278_v56 }
 0x622   : > { %v3140_v49 = vmul.f32 -1.442695, %v1361_v38  ;;  %v1318_v51 = vpop.f32.mrb[23].mxu0  ;;  %v1359_v54 = vpop.f32.mrb[23].mxu1 }
 0x623   : > { %v3141_v53 = vmul.f32 -1.442695, %v1362_v46  ;;  %v3142_v35 = vmul.f32 -1.442695, %v1364_v58  ;;  %v1390_v46 = vstv %s1265_s10  ;;  %s3166_s10 = sshll.u32 %s1678_s19, 2 }
 0x624   : > { %3386 = vpow2.f32 %v3140_v49  ;;  %vm1391_vm10 = vcmp.gt.s32.totalorder %v3916_v52, %v1390_v46  ;;  %s1813_s11 = scalar_lea.vmem %s3926_s21, %s3166_s10 }
 0x625   : > { %3388 = vpow2.f32 %v3141_v53  ;;  %vm1392_vm11 = vmpackc.low %vm1391_vm10, %vm1391_vm10 }
 0x626   : > { %3390 = vpow2.f32 %v3142_v35  ;;  %v3147_v35 = vld [vmem:[%s2930_s14 + $0x68] sm:$0xff] }
 0x627   : > { %3392 = vtanh.f32 %v1363_v25 }
 0x62e   : > { %v3387_v26 = vpop.eup %3386 }
 0x62f   : > { %v3389_v27 = vpop.eup %3388  ;;  %v1368_v28 = vadd.f32 1.0, %v3387_v26 }
 0x630   : > { %v1374_v30 = vadd.f32 1.0, %v3389_v27  ;;  %v3391_v31 = vpop.eup %3390 }
 0x631   : > { %3394 = vrcp.f32 %v1368_v28  ;;  %v3393_v34 = vpop.eup %3392  ;;  %v1381_v40 = vadd.f32 1.0, %v3391_v31  ;;  %v1414_v28 = vunpack.c.h.bf16 %v3147_v35 }
 0x632   : > { %3396 = vrcp.f32 %v1374_v30 }
 0x633   : > { %3398 = vrcp.f32 %v1381_v40 }
 0x63b   : > { %v3395_v29 = vpop.eup %3394 }
 0x63c   : > { %v3397_v38 = vpop.eup %3396  ;;  %v1385_v55 = vmul.f32 %v3395_v29, %v3393_v34 }
 0x63d   : > { %v1384_v32 = vmul.f32 %v3397_v38, %v4143_v60  ;;  %v3399_v49 = vpop.eup %3398 }
 0x63f   : > { %v1386_v48 = vadd.f32 %v1385_v55, %v1384_v32 }
 0x641   : > { %3400 = vtanh.f32 %v1386_v48  ;;  %v4286_v45 = vsel %vm1391_vm10, %v1386_v48, %v4143_v60  ;;  %v3146_v60 = vld [vmem:[%s2930_s14 + $0x60] sm:$0xff]  ;;  %s1822_s14 = smul.u32 4294967293, %s3640_s15 }
 0x642   : > { %v1412_v58 = vunpack.c.h.bf16 %v3146_v60 }
 0x643   : > { %s1823_s20 = sadd.s32 9, %s1822_s14 }
 0x644   : > { %v1416_v25 = vadd.f32 %v1412_v58, %v3905_v44 }
 0x64b   : > { %v3401_v51 = vpop.eup %3400 }
 0x64c   : > { %v1388_v54 = vmul.f32 %v3401_v51, %v3399_v49  ;;  %v1418_v49 = vadd.f32 %v1414_v28, %v3909_v50  ;;  %v1413_v51 = vunpack.c.l.bf16 %v3147_v35 }
 0x64e   : > { %v1389_v53 = vpack.c.bf16 %v1388_v54, %v1388_v54 }
 0x650   : > { %v1393_v56 = vsel %vm1392_vm11, %v1389_v53, 0  ;;  %v4291_v57 = vsel %vm1392_vm11, %v1389_v53, %v4148_v63  ;;  %v1411_v63 = vunpack.c.l.bf16 %v3146_v60  ;;  %v1417_v53 = vadd.f32 %v1413_v51, %v3912_v62 }
 0x651   : > { %3144 = vst [vmem:[%s2926_s12 + $0x14] sm:$0xf] %v1393_v56  ;;  %1452 = vmatmul.mubr.bf16.vlgmr.msra.gmra.mrb[24].mxu0 %v4291_v57  ;;  %1493 = vmatmul.mubr.bf16.vlgmr.msra.gmra.mrb[24].mxu1 %v4291_v57  ;;  %s3167_s12 = smul.u32 4294967248, %s3640_s15 }
 0x652   : > { %1559 = vmatpush1.bf16.msra.mxu0 %v4153_v33  ;;  %1600 = vmatpush1.bf16.msra.mxu1 %v4157_v61  ;;  %v1415_v59 = vadd.f32 %v1411_v63, %v3903_v42 }
 0x653   : > { %1560 = vmatprep.subr.bf16.mxu0 %v4161_v37  ;;  %1601 = vmatprep.subr.bf16.mxu1 %v4165_v39  ;;  %s2948_s13 = scalar_lea.vmem %s3896_s5, %s3167_s12 }
 0x654   : > { %1590 = vmatprep.mubr.bf16.mxu0 %v3650_v1  ;;  %1631 = vmatprep.mubr.bf16.mxu1 %v3650_v1 }
 0x656   : > { %1561 = vmatpush1.bf16.msra.mxu0 %v4171_v0  ;;  %1602 = vmatpush1.bf16.msra.mxu1 %v4175_v2 }
 0x657   : > { %1562 = vmatprep.subr.bf16.mxu0 %v4179_v41  ;;  %1603 = vmatprep.subr.bf16.mxu1 %v4183_v7 }
 0x65a   : > { %1563 = vmatpush1.bf16.msra.mxu0 %v4187_v43  ;;  %1604 = vmatpush1.bf16.msra.mxu1 %v4191_v47 }
 0x65b   : > { %1564 = vmatprep.subr.bf16.mxu0 %v4195_v36  ;;  %1605 = vmatprep.subr.bf16.mxu1 %v4199_v5 }
 0x65e   : > { %1565 = vmatpush1.bf16.msra.mxu0 %v4203_v6  ;;  %1606 = vmatpush1.bf16.msra.mxu1 %v4207_v8 }
 0x65f   : > { %1566 = vmatprep.subr.bf16.mxu0 %v4211_v9  ;;  %1607 = vmatprep.subr.bf16.mxu1 %v4215_v10 }
 0x662   : > { %1567 = vmatpush1.bf16.msra.mxu0 %v4219_v11  ;;  %1608 = vmatpush1.bf16.msra.mxu1 %v4223_v12 }
 0x663   : > { %1568 = vmatprep.subr.bf16.mxu0 %v4227_v13  ;;  %1609 = vmatprep.subr.bf16.mxu1 %v4231_v14 }
 0x666   : > { %1569 = vmatpush1.bf16.msra.mxu0 %v4235_v15  ;;  %1610 = vmatpush1.bf16.msra.mxu1 %v4239_v16 }
 0x667   : > { %1570 = vmatprep.subr.bf16.mxu0 %v4243_v17  ;;  %1611 = vmatprep.subr.bf16.mxu1 %v4247_v18 }
 0x66a   : > { %1571 = vmatpush1.bf16.msra.mxu0 %v4251_v19  ;;  %1612 = vmatpush1.bf16.msra.mxu1 %v4255_v20 }
 0x66b   : > { %1572 = vmatprep.subr.bf16.mxu0 %v4259_v21  ;;  %1613 = vmatprep.subr.bf16.mxu1 %v4263_v22 }
 0x66e   : > { %1573 = vmatpush1.bf16.msra.mxu0 %v4267_v23  ;;  %1614 = vmatpush1.bf16.msra.mxu1 %v4271_v24 }
 0x66f   : > { %1697 = vmatprep.subr.bf16.mxu0 %v4126_v3  ;;  %1738 = vmatprep.subr.bf16.mxu1 %v4130_v4 }
 0x724   : > { %v1453_v26 = vpop.f32.mrb[24].mxu0  ;;  %v1494_v27 = vpop.f32.mrb[24].mxu1 }
 0x725   : > { %v1501_v30 = vadd.f32 %v1453_v26, %v1415_v59  ;;  %v1455_v31 = vpop.f32.mrb[25].mxu0  ;;  %v1496_v34 = vpop.f32.mrb[25].mxu1  ;;  %v1503_v60 = vadd.f32 %v1494_v27, %v1417_v53 }
 0x726   : > { %v1502_v29 = vadd.f32 %v1455_v31, %v1416_v25  ;;  %v1457_v38 = vpop.f32.mrb[26].mxu0  ;;  %v1498_v55 = vpop.f32.mrb[26].mxu1  ;;  %v1504_v54 = vadd.f32 %v1496_v34, %v1418_v49 }
 0x727   : > { %v3148_v40 = vmul.f32 -1.442695, %v1501_v30  ;;  %v1458_v32 = vpop.f32.mrb[27].mxu0  ;;  %v1499_v46 = vpop.f32.mrb[27].mxu1 }
 0x728   : > { %v3149_v48 = vmul.f32 -1.442695, %v1502_v29  ;;  %v3150_v56 = vmul.f32 -1.442695, %v1504_v54  ;;  %v1530_v29 = vstv %s1405_s24  ;;  %s3173_s24 = smul.u32 4294967284, %s3640_s15 }
 0x729   : > { %3402 = vpow2.f32 %v3148_v40  ;;  %vm1531_vm12 = vcmp.gt.s32.totalorder %v3916_v52, %v1530_v29 }
 0x72a   : > { %3404 = vpow2.f32 %v3149_v48  ;;  %vm1532_vm13 = vmpackc.low %vm1531_vm12, %vm1531_vm12  ;;  %s2952_s22 = scalar_lea.vmem %s3926_s21, %s3173_s24 }
 0x72b   : > { %3406 = vpow2.f32 %v3150_v56  ;;  %v3155_v56 = vld [vmem:[%s2937_s28 + $0x78] sm:$0xff] }
 0x72c   : > { %3408 = vtanh.f32 %v1503_v60 }
 0x733   : > { %v3403_v63 = vpop.eup %3402 }
 0x734   : > { %v3405_v58 = vpop.eup %3404  ;;  %v1508_v59 = vadd.f32 1.0, %v3403_v63 }
 0x735   : > { %v1514_v25 = vadd.f32 1.0, %v3405_v58  ;;  %v3407_v26 = vpop.eup %3406 }
 0x736   : > { %3410 = vrcp.f32 %v1508_v59  ;;  %v3409_v28 = vpop.eup %3408  ;;  %v1521_v34 = vadd.f32 1.0, %v3407_v26  ;;  %v1553_v59 = vunpack.c.h.bf16 %v3155_v56 }
 0x737   : > { %3412 = vrcp.f32 %v1514_v25 }
 0x738   : > { %3414 = vrcp.f32 %v1521_v34 }
 0x740   : > { %v3411_v35 = vpop.eup %3410 }
 0x741   : > { %v3413_v30 = vpop.eup %3412  ;;  %v1525_v31 = vmul.f32 %v3411_v35, %v3409_v28 }
 0x742   : > { %v1524_v27 = vmul.f32 %v3413_v30, %v4286_v45  ;;  %v3415_v40 = vpop.eup %3414 }
 0x744   : > { %v1526_v38 = vadd.f32 %v1525_v31, %v1524_v27 }
 0x746   : > { %3416 = vtanh.f32 %v1526_v38  ;;  %v4339_v55 = vsel %vm1531_vm12, %v1526_v38, %v4286_v45  ;;  %v3154_v45 = vld [vmem:[%s2937_s28 + $0x70] sm:$0xff]  ;;  %s1962_s28 = smul.u32 4294967291, %s3640_s15 }
 0x747   : > { %v1551_v54 = vunpack.c.h.bf16 %v3154_v45 }
 0x749   : > { %v1555_v60 = vadd.f32 %v1551_v54, %v3905_v44 }
 0x750   : > { %v3417_v32 = vpop.eup %3416 }
 0x751   : > { %v1528_v46 = vmul.f32 %v3417_v32, %v3415_v40  ;;  %v1557_v40 = vadd.f32 %v1553_v59, %v3909_v50  ;;  %v1552_v32 = vunpack.c.l.bf16 %v3155_v56 }
 0x753   : > { %v1529_v48 = vpack.c.bf16 %v1528_v46, %v1528_v46 }
 0x755   : > { %v1533_v49 = vsel %vm1532_vm13, %v1529_v48, 0  ;;  %v4344_v51 = vsel %vm1532_vm13, %v1529_v48, %v4291_v57  ;;  %v1550_v57 = vunpack.c.l.bf16 %v3154_v45  ;;  %v1556_v48 = vadd.f32 %v1552_v32, %v3912_v62 }
 0x756   : > { %3152 = vst [vmem:[%s2934_s25 + $0x18] sm:$0xf] %v1533_v49  ;;  %1591 = vmatmul.mubr.bf16.vlgmr.msra.gmra.mrb[28].mxu0 %v4344_v51  ;;  %1632 = vmatmul.mubr.bf16.vlgmr.msra.gmra.mrb[28].mxu1 %v4344_v51  ;;  %s3175_s25 = smul.u32 4294967216, %s3640_s15 }
 0x757   : > { %1698 = vmatpush1.bf16.msra.mxu0 %v4153_v33  ;;  %1739 = vmatpush1.bf16.msra.mxu1 %v4157_v61  ;;  %v1554_v53 = vadd.f32 %v1550_v57, %v3903_v42 }
 0x758   : > { %1699 = vmatprep.subr.bf16.mxu0 %v4161_v37  ;;  %1740 = vmatprep.subr.bf16.mxu1 %v4165_v39  ;;  %s2956_s26 = scalar_lea.vmem %s3896_s5, %s3175_s25 }
 0x759   : > { %1729 = vmatprep.mubr.bf16.mxu0 %v3650_v1  ;;  %1770 = vmatprep.mubr.bf16.mxu1 %v3650_v1 }
 0x75b   : > { %1700 = vmatpush1.bf16.msra.mxu0 %v4171_v0  ;;  %1741 = vmatpush1.bf16.msra.mxu1 %v4175_v2 }
 0x75c   : > { %1701 = vmatprep.subr.bf16.mxu0 %v4179_v41  ;;  %1742 = vmatprep.subr.bf16.mxu1 %v4183_v7 }
 0x75f   : > { %1702 = vmatpush1.bf16.msra.mxu0 %v4187_v43  ;;  %1743 = vmatpush1.bf16.msra.mxu1 %v4191_v47 }
 0x760   : > { %1703 = vmatprep.subr.bf16.mxu0 %v4195_v36  ;;  %1744 = vmatprep.subr.bf16.mxu1 %v4199_v5 }
 0x763   : > { %1704 = vmatpush1.bf16.msra.mxu0 %v4203_v6  ;;  %1745 = vmatpush1.bf16.msra.mxu1 %v4207_v8 }
 0x764   : > { %1705 = vmatprep.subr.bf16.mxu0 %v4211_v9  ;;  %1746 = vmatprep.subr.bf16.mxu1 %v4215_v10 }
 0x767   : > { %1706 = vmatpush1.bf16.msra.mxu0 %v4219_v11  ;;  %1747 = vmatpush1.bf16.msra.mxu1 %v4223_v12 }
 0x768   : > { %1707 = vmatprep.subr.bf16.mxu0 %v4227_v13  ;;  %1748 = vmatprep.subr.bf16.mxu1 %v4231_v14 }
 0x76b   : > { %1708 = vmatpush1.bf16.msra.mxu0 %v4235_v15  ;;  %1749 = vmatpush1.bf16.msra.mxu1 %v4239_v16 }
 0x76c   : > { %1709 = vmatprep.subr.bf16.mxu0 %v4243_v17  ;;  %1750 = vmatprep.subr.bf16.mxu1 %v4247_v18 }
 0x76f   : > { %1710 = vmatpush1.bf16.msra.mxu0 %v4251_v19  ;;  %1751 = vmatpush1.bf16.msra.mxu1 %v4255_v20 }
 0x770   : > { %1711 = vmatprep.subr.bf16.mxu0 %v4259_v21  ;;  %1752 = vmatprep.subr.bf16.mxu1 %v4263_v22 }
 0x773   : > { %1712 = vmatpush1.bf16.msra.mxu0 %v4267_v23  ;;  %1753 = vmatpush1.bf16.msra.mxu1 %v4271_v24 }
 0x774   : > { %1837 = vmatprep.subr.bf16.mxu0 %v4126_v3  ;;  %1878 = vmatprep.subr.bf16.mxu1 %v4130_v4 }
 0x829   : > { %v1592_v63 = vpop.f32.mrb[28].mxu0  ;;  %v1633_v58 = vpop.f32.mrb[28].mxu1 }
 0x82a   : > { %v1640_v25 = vadd.f32 %v1592_v63, %v1554_v53  ;;  %v1594_v26 = vpop.f32.mrb[29].mxu0  ;;  %v1635_v28 = vpop.f32.mrb[29].mxu1  ;;  %v1642_v45 = vadd.f32 %v1633_v58, %v1556_v48  ;;  %v1669_v58 = vstv %s1544_s29  ;;  %s1963_s29 = sadd.s32 10, %s1962_s28 }
 0x82b   : > { %v1641_v35 = vadd.f32 %v1594_v26, %v1555_v60  ;;  %v1596_v30 = vpop.f32.mrb[30].mxu0  ;;  %v1637_v31 = vpop.f32.mrb[30].mxu1  ;;  %v1643_v46 = vadd.f32 %v1635_v28, %v1557_v40  ;;  %vm1670_vm14 = vcmp.gt.s32.totalorder %v3916_v52, %v1669_v58 }
 0x82c   : > { %v3156_v34 = vmul.f32 -1.442695, %v1640_v25  ;;  %v1597_v27 = vpop.f32.mrb[31].mxu0  ;;  %v1638_v29 = vpop.f32.mrb[31].mxu1  ;;  %vm1671_vm15 = vmpackc.low %vm1670_vm14, %vm1670_vm14 }
 0x82d   : > { %v3157_v38 = vmul.f32 -1.442695, %v1641_v35  ;;  %v3158_v49 = vmul.f32 -1.442695, %v1643_v46 }
 0x82e   : > { %3418 = vpow2.f32 %v3156_v34 }
 0x82f   : > { %3420 = vpow2.f32 %v3157_v38 }
 0x830   : > { %3422 = vpow2.f32 %v3158_v49  ;;  %v1688_v49 = vld [vmem:[%s1686_s7 + $0x8] sm:$0xff] }
 0x831   : > { %3424 = vtanh.f32 %v1642_v45 }
 0x838   : > { %v3419_v57 = vpop.eup %3418 }
 0x839   : > { %v3421_v54 = vpop.eup %3420  ;;  %v1647_v53 = vadd.f32 1.0, %v3419_v57 }
 0x83a   : > { %v1653_v60 = vadd.f32 1.0, %v3421_v54  ;;  %v3423_v63 = vpop.eup %3422 }
 0x83b   : > { %3426 = vrcp.f32 %v1647_v53  ;;  %v3425_v25 = vpop.eup %3424  ;;  %v1660_v28 = vadd.f32 1.0, %v3423_v63  ;;  %v1692_v53 = vunpack.c.h.bf16 %v1688_v49 }
 0x83c   : > { %3428 = vrcp.f32 %v1653_v60 }
 0x83d   : > { %3430 = vrcp.f32 %v1660_v28 }
 0x845   : > { %v3427_v56 = vpop.eup %3426 }
 0x846   : > { %v3429_v59 = vpop.eup %3428  ;;  %v1664_v26 = vmul.f32 %v3427_v56, %v3425_v25 }
 0x847   : > { %v1663_v35 = vmul.f32 %v3429_v59, %v4339_v55  ;;  %v3431_v34 = vpop.eup %3430 }
 0x849   : > { %v1665_v30 = vadd.f32 %v1664_v26, %v1663_v35 }
 0x84b   : > { %3432 = vtanh.f32 %v1665_v30  ;;  %v4392_v31 = vsel %vm1670_vm14, %v1665_v30, %v4339_v55  ;;  %v1687_v55 = vld [vmem:[%s1686_s7] sm:$0xff]  ;;  %s2964_s7 = scalar_lea.vmem %s3896_s5, %s3183_s6 }
 0x84c   : > { %v1690_v46 = vunpack.c.h.bf16 %v1687_v55 }
 0x84e   : > { %v1694_v45 = vadd.f32 %v1690_v46, %v3905_v44 }
 0x855   : > { %v3433_v27 = vpop.eup %3432 }
 0x856   : > { %v1667_v29 = vmul.f32 %v3433_v27, %v3431_v34  ;;  %v1696_v34 = vadd.f32 %v1692_v53, %v3909_v50  ;;  %v1691_v27 = vunpack.c.l.bf16 %v1688_v49 }
 0x858   : > { %v1668_v38 = vpack.c.bf16 %v1667_v29, %v1667_v29 }
 0x85a   : > { %v1672_v40 = vsel %vm1671_vm15, %v1668_v38, 0  ;;  %v4398_v32 = vsel %vm1671_vm15, %v1668_v38, %v4344_v51  ;;  %v1689_v51 = vunpack.c.l.bf16 %v1687_v55  ;;  %v1695_v38 = vadd.f32 %v1691_v27, %v3912_v62 }
 0x85b   : > { %3160 = vst [vmem:[%s2940_s30 + $0x1c] sm:$0xf] %v1672_v40  ;;  %1730 = vmatmul.mubr.bf16.vlgmr.msra.gmra.mrb[32].mxu0 %v4398_v32  ;;  %1771 = vmatmul.mubr.bf16.vlgmr.msra.gmra.mrb[32].mxu1 %v4398_v32  ;;  %s3181_s30 = smul.u32 4294967276, %s3640_s15 }
 0x85c   : > { %1838 = vmatpush1.bf16.msra.mxu0 %v4153_v33  ;;  %1879 = vmatpush1.bf16.msra.mxu1 %v4157_v61  ;;  %v1693_v48 = vadd.f32 %v1689_v51, %v3903_v42 }
 0x85d   : > { %1839 = vmatprep.subr.bf16.mxu0 %v4161_v37  ;;  %1880 = vmatprep.subr.bf16.mxu1 %v4165_v39  ;;  %s2960_s19 = scalar_lea.vmem %s3926_s21, %s3181_s30 }
 0x85e   : > { %1869 = vmatprep.mubr.bf16.mxu0 %v3650_v1  ;;  %1910 = vmatprep.mubr.bf16.mxu1 %v3650_v1 }
 0x860   : > { %1840 = vmatpush1.bf16.msra.mxu0 %v4171_v0  ;;  %1881 = vmatpush1.bf16.msra.mxu1 %v4175_v2 }
 0x861   : > { %1841 = vmatprep.subr.bf16.mxu0 %v4179_v41  ;;  %1882 = vmatprep.subr.bf16.mxu1 %v4183_v7 }
 0x864   : > { %1842 = vmatpush1.bf16.msra.mxu0 %v4187_v43  ;;  %1883 = vmatpush1.bf16.msra.mxu1 %v4191_v47 }
 0x865   : > { %1843 = vmatprep.subr.bf16.mxu0 %v4195_v36  ;;  %1884 = vmatprep.subr.bf16.mxu1 %v4199_v5 }
 0x868   : > { %1844 = vmatpush1.bf16.msra.mxu0 %v4203_v6  ;;  %1885 = vmatpush1.bf16.msra.mxu1 %v4207_v8 }
 0x869   : > { %1845 = vmatprep.subr.bf16.mxu0 %v4211_v9  ;;  %1886 = vmatprep.subr.bf16.mxu1 %v4215_v10 }
 0x86c   : > { %1846 = vmatpush1.bf16.msra.mxu0 %v4219_v11  ;;  %1887 = vmatpush1.bf16.msra.mxu1 %v4223_v12 }
 0x86d   : > { %1847 = vmatprep.subr.bf16.mxu0 %v4227_v13  ;;  %1888 = vmatprep.subr.bf16.mxu1 %v4231_v14 }
 0x870   : > { %1848 = vmatpush1.bf16.msra.mxu0 %v4235_v15  ;;  %1889 = vmatpush1.bf16.msra.mxu1 %v4239_v16 }
 0x871   : > { %1849 = vmatprep.subr.bf16.mxu0 %v4243_v17  ;;  %1890 = vmatprep.subr.bf16.mxu1 %v4247_v18 }
 0x874   : > { %1850 = vmatpush1.bf16.msra.mxu0 %v4251_v19  ;;  %1891 = vmatpush1.bf16.msra.mxu1 %v4255_v20 }
 0x875   : > { %1851 = vmatprep.subr.bf16.mxu0 %v4259_v21  ;;  %1892 = vmatprep.subr.bf16.mxu1 %v4263_v22 }
 0x878   : > { %1852 = vmatpush1.bf16.msra.mxu0 %v4267_v23  ;;  %1893 = vmatpush1.bf16.msra.mxu1 %v4271_v24 }
 0x879   : > { %1977 = vmatprep.subr.bf16.mxu0 %v4126_v3  ;;  %2018 = vmatprep.subr.bf16.mxu1 %v4130_v4 }
 0x92e   : > { %v1731_v57 = vpop.f32.mrb[32].mxu0  ;;  %v1772_v54 = vpop.f32.mrb[32].mxu1 }
 0x92f   : > { %v1779_v60 = vadd.f32 %v1731_v57, %v1693_v48  ;;  %v1733_v63 = vpop.f32.mrb[33].mxu0  ;;  %v1774_v25 = vpop.f32.mrb[33].mxu1  ;;  %v1781_v55 = vadd.f32 %v1772_v54, %v1695_v38 }
 0x930   : > { %v1780_v56 = vadd.f32 %v1733_v63, %v1694_v45  ;;  %v1735_v59 = vpop.f32.mrb[34].mxu0  ;;  %v1776_v26 = vpop.f32.mrb[34].mxu1  ;;  %v1782_v29 = vadd.f32 %v1774_v25, %v1696_v34 }
 0x931   : > { %v3163_v28 = vmul.f32 -1.442695, %v1779_v60  ;;  %v1736_v35 = vpop.f32.mrb[35].mxu0  ;;  %v1777_v58 = vpop.f32.mrb[35].mxu1 }
 0x932   : > { %v3164_v30 = vmul.f32 -1.442695, %v1780_v56  ;;  %v3165_v40 = vmul.f32 -1.442695, %v1782_v29  ;;  %v1808_v56 = vstv %s1683_s9  ;;  %s3189_s9 = smul.u32 4294967268, %s3640_s15 }
 0x933   : > { %3434 = vpow2.f32 %v3163_v28  ;;  %vm1809_vm0 = vcmp.gt.s32.totalorder %v3916_v52, %v1808_v56 }
 0x934   : > { %3436 = vpow2.f32 %v3164_v30  ;;  %vm1810_vm1 = vmpackc.low %vm1809_vm0, %vm1809_vm0  ;;  %s2968_s10 = scalar_lea.vmem %s3926_s21, %s3189_s9 }
 0x935   : > { %3438 = vpow2.f32 %v3165_v40  ;;  %v3169_v40 = vld [vmem:[%s2948_s13 + $0x98] sm:$0xff] }
 0x936   : > { %3440 = vtanh.f32 %v1781_v55 }
 0x93d   : > { %v3435_v51 = vpop.eup %3434 }
 0x93e   : > { %v3437_v46 = vpop.eup %3436  ;;  %v1786_v48 = vadd.f32 1.0, %v3435_v51 }
 0x93f   : > { %v1792_v45 = vadd.f32 1.0, %v3437_v46  ;;  %v3439_v57 = vpop.eup %3438 }
 0x940   : > { %3442 = vrcp.f32 %v1786_v48  ;;  %v3441_v53 = vpop.eup %3440  ;;  %v1799_v25 = vadd.f32 1.0, %v3439_v57  ;;  %v1832_v48 = vunpack.c.h.bf16 %v3169_v40 }
 0x941   : > { %3444 = vrcp.f32 %v1792_v45 }
 0x942   : > { %3446 = vrcp.f32 %v1799_v25  ;;  %v1836_v56 = vadd.f32 %v1832_v48, %v3909_v50 }
 0x94a   : > { %v3443_v49 = vpop.eup %3442 }
 0x94b   : > { %v3445_v60 = vpop.eup %3444  ;;  %v1803_v63 = vmul.f32 %v3443_v49, %v3441_v53 }
 0x94c   : > { %v1802_v54 = vmul.f32 %v3445_v60, %v4392_v31  ;;  %v3447_v28 = vpop.eup %3446 }
 0x94e   : > { %v1804_v59 = vadd.f32 %v1803_v63, %v1802_v54 }
 0x950   : > { %3448 = vtanh.f32 %v1804_v59  ;;  %v4448_v26 = vsel %vm1809_vm0, %v1804_v59, %v4392_v31  ;;  %v3168_v31 = vld [vmem:[%s2948_s13 + $0x90] sm:$0xff]  ;;  %v1831_v59 = vunpack.c.l.bf16 %v3169_v40  ;;  %s2242_s13 = smul.u32 4294967287, %s3640_s15 }
 0x951   : > { %v1830_v29 = vunpack.c.h.bf16 %v3168_v31 }
 0x952   : > { %s2243_s14 = sadd.s32 12, %s2242_s13  ;;  %s3221_s13 = smul.u32 4294967236, %s3640_s15 }
 0x953   : > { %v1834_v55 = vadd.f32 %v1830_v29, %v3905_v44 }
 0x95a   : > { %v3449_v35 = vpop.eup %3448 }
 0x95b   : > { %v1806_v58 = vmul.f32 %v3449_v35, %v3447_v28  ;;  %v1835_v35 = vadd.f32 %v1831_v59, %v3912_v62 }
 0x95d   : > { %v1807_v30 = vpack.c.bf16 %v1806_v58, %v1806_v58 }
 0x95f   : > { %v1811_v34 = vsel %vm1810_vm1, %v1807_v30, 0  ;;  %v4454_v27 = vsel %vm1810_vm1, %v1807_v30, %v4398_v32  ;;  %v1829_v32 = vunpack.c.l.bf16 %v3168_v31 }
 0x960   : > { %1814 = vst [vmem:[%s1813_s11] sm:$0xf] %v1811_v34  ;;  %1870 = vmatmul.mubr.bf16.vlgmr.msra.gmra.mrb[36].mxu0 %v4454_v27  ;;  %1911 = vmatmul.mubr.bf16.vlgmr.msra.gmra.mrb[36].mxu1 %v4454_v27  ;;  %s3191_s11 = smul.u32 4294967152, %s3640_s15 }
 0x961   : > { %1978 = vmatpush1.bf16.msra.mxu0 %v4153_v33  ;;  %2019 = vmatpush1.bf16.msra.mxu1 %v4157_v61  ;;  %v1833_v38 = vadd.f32 %v1829_v32, %v3903_v42 }
 0x962   : > { %1979 = vmatprep.subr.bf16.mxu0 %v4161_v37  ;;  %2020 = vmatprep.subr.bf16.mxu1 %v4165_v39  ;;  %s2972_s12 = scalar_lea.vmem %s3896_s5, %s3191_s11 }
 0x963   : > { %2009 = vmatprep.mubr.bf16.mxu0 %v3650_v1  ;;  %2050 = vmatprep.mubr.bf16.mxu1 %v3650_v1 }
 0x965   : > { %1980 = vmatpush1.bf16.msra.mxu0 %v4171_v0  ;;  %2021 = vmatpush1.bf16.msra.mxu1 %v4175_v2 }
 0x966   : > { %1981 = vmatprep.subr.bf16.mxu0 %v4179_v41  ;;  %2022 = vmatprep.subr.bf16.mxu1 %v4183_v7 }
 0x969   : > { %1982 = vmatpush1.bf16.msra.mxu0 %v4187_v43  ;;  %2023 = vmatpush1.bf16.msra.mxu1 %v4191_v47 }
 0x96a   : > { %1983 = vmatprep.subr.bf16.mxu0 %v4195_v36  ;;  %2024 = vmatprep.subr.bf16.mxu1 %v4199_v5 }
 0x96d   : > { %1984 = vmatpush1.bf16.msra.mxu0 %v4203_v6  ;;  %2025 = vmatpush1.bf16.msra.mxu1 %v4207_v8 }
 0x96e   : > { %1985 = vmatprep.subr.bf16.mxu0 %v4211_v9  ;;  %2026 = vmatprep.subr.bf16.mxu1 %v4215_v10 }
 0x971   : > { %1986 = vmatpush1.bf16.msra.mxu0 %v4219_v11  ;;  %2027 = vmatpush1.bf16.msra.mxu1 %v4223_v12 }
 0x972   : > { %1987 = vmatprep.subr.bf16.mxu0 %v4227_v13  ;;  %2028 = vmatprep.subr.bf16.mxu1 %v4231_v14 }
 0x975   : > { %1988 = vmatpush1.bf16.msra.mxu0 %v4235_v15  ;;  %2029 = vmatpush1.bf16.msra.mxu1 %v4239_v16 }
 0x976   : > { %1989 = vmatprep.subr.bf16.mxu0 %v4243_v17  ;;  %2030 = vmatprep.subr.bf16.mxu1 %v4247_v18 }
 0x979   : > { %1990 = vmatpush1.bf16.msra.mxu0 %v4251_v19  ;;  %2031 = vmatpush1.bf16.msra.mxu1 %v4255_v20 }
 0x97a   : > { %1991 = vmatprep.subr.bf16.mxu0 %v4259_v21  ;;  %2032 = vmatprep.subr.bf16.mxu1 %v4263_v22 }
 0x97d   : > { %1992 = vmatpush1.bf16.msra.mxu0 %v4267_v23  ;;  %2033 = vmatpush1.bf16.msra.mxu1 %v4271_v24 }
 0x97e   : > { %2117 = vmatprep.subr.bf16.mxu0 %v4126_v3  ;;  %2158 = vmatprep.subr.bf16.mxu1 %v4130_v4 }
 0xa33   : > { %v1871_v51 = vpop.f32.mrb[36].mxu0  ;;  %v1912_v46 = vpop.f32.mrb[36].mxu1 }
 0xa34   : > { %v1919_v45 = vadd.f32 %v1871_v51, %v1833_v38  ;;  %v1873_v57 = vpop.f32.mrb[37].mxu0  ;;  %v1914_v53 = vpop.f32.mrb[37].mxu1  ;;  %v1921_v30 = vadd.f32 %v1912_v46, %v1835_v35 }
 0xa35   : > { %v1920_v49 = vadd.f32 %v1873_v57, %v1834_v55  ;;  %v1875_v3 = vpop.f32.mrb[38].mxu0  ;;  %v1916_v60 = vpop.f32.mrb[38].mxu1  ;;  %v1922_v28 = vadd.f32 %v1914_v53, %v1836_v56  ;;  %v1948_v57 = vstv %s1823_s20  ;;  %s3197_s20 = smul.u32 4294967260, %s3640_s15 }
 0xa36   : > { %v3170_v4 = vmul.f32 -1.442695, %v1919_v45  ;;  %v1876_v63 = vpop.f32.mrb[39].mxu0  ;;  %v1917_v25 = vpop.f32.mrb[39].mxu1  ;;  %vm1949_vm2 = vcmp.gt.s32.totalorder %v3916_v52, %v1948_v57  ;;  %v4579_v57 = vld [vmem:[%s3719_s27 + $0x24] ss:$16 sps:$4 sm:$0xff]  }
 0xa37   : > { %v3171_v54 = vmul.f32 -1.442695, %v1920_v49  ;;  %v3172_v58 = vmul.f32 -1.442695, %v1922_v28  ;;  %vm1950_vm3 = vmpackc.low %vm1949_vm2, %vm1949_vm2  ;;  %s2976_s24 = scalar_lea.vmem %s3926_s21, %s3197_s20 }
 0xa38   : > { %3450 = vpow2.f32 %v3170_v4 }
 0xa39   : > { %3452 = vpow2.f32 %v3171_v54 }
 0xa3a   : > { %3454 = vpow2.f32 %v3172_v58 }
 0xa3b   : > { %3456 = vtanh.f32 %v1921_v30 }
 0xa42   : > { %v3451_v34 = vpop.eup %3450 }
 0xa43   : > { %v3453_v31 = vpop.eup %3452  ;;  %v1926_v32 = vadd.f32 1.0, %v3451_v34  ;;  %v2088_v34 = vstv %s1963_s29  ;;  %s3205_s29 = smul.u32 4294967252, %s3640_s15 }
 0xa44   : > { %v1932_v29 = vadd.f32 1.0, %v3453_v31  ;;  %v3455_v38 = vpop.eup %3454  ;;  %vm2089_vm4 = vcmp.gt.s32.totalorder %v3916_v52, %v2088_v34 }
 0xa45   : > { %3458 = vrcp.f32 %v1926_v32  ;;  %v3457_v55 = vpop.eup %3456  ;;  %v1939_v45 = vadd.f32 1.0, %v3455_v38  ;;  %vm2090_vm5 = vmpackc.low %vm2089_vm4, %vm2089_vm4  ;;  %s2984_s30 = scalar_lea.vmem %s3926_s21, %s3205_s29 }
 0xa46   : > { %3460 = vrcp.f32 %v1932_v29 }
 0xa47   : > { %3462 = vrcp.f32 %v1939_v45  ;;  %v4571_v45 = vld [vmem:[%s3719_s27] ss:$16 sps:$4 sm:$0xff]  }
 0xa4f   : > { %v3459_v40 = vpop.eup %3458 }
 0xa50   : > { %v3461_v51 = vpop.eup %3460  ;;  %v1943_v48 = vmul.f32 %v3459_v40, %v3457_v55 }
 0xa51   : > { %v1942_v46 = vmul.f32 %v3461_v51, %v4448_v26  ;;  %v3463_v3 = vpop.eup %3462 }
 0xa53   : > { %v1944_v53 = vadd.f32 %v1943_v48, %v1942_v46  ;;  %v4575_v46 = vld [vmem:[%s3719_s27 + $0x8] ss:$16 sps:$4 sm:$0xff]  }
 0xa55   : > { %3464 = vtanh.f32 %v1944_v53  ;;  %v4502_v49 = vsel %vm1949_vm2, %v1944_v53, %v4448_v26  ;;  %v4583_v53 = vld [vmem:[%s3719_s27 + $0x2c] ss:$16 sps:$4 sm:$0xff]  }
 0xa5f   : > { %v3465_v60 = vpop.eup %3464 }
 0xa60   : > { %v1946_v4 = vmul.f32 %v3465_v60, %v3463_v3  ;;  %v4593_v3 = vld [vmem:[%s3719_s27 + $0x28] ss:$16 sps:$4 sm:$0xff]   ;;  %v4597_v60 = vld [vmem:[%s3719_s27 + $0x44] ss:$16 sps:$4 sm:$0xff]  }
 0xa62   : > { %v1947_v63 = vpack.c.bf16 %v1946_v4, %v1946_v4  ;;  %v4601_v4 = vld [vmem:[%s3719_s27 + $0x4c] ss:$16 sps:$4 sm:$0xff]  }
 0xa64   : > { %v1951_v25 = vsel %vm1950_vm3, %v1947_v63, 0  ;;  %v4507_v54 = vsel %vm1950_vm3, %v1947_v63, %v4454_v27  ;;  %v4605_v63 = vld [vmem:[%s3719_s27 + $0x40] ss:$16 sps:$4 sm:$0xff]  }
 0xa65   : > { %3174 = vst [vmem:[%s2952_s22 + $0x24] sm:$0xf] %v1951_v25  ;;  %2010 = vmatmul.mubr.bf16.vlgmr.msra.gmra.mrb[40].mxu0 %v4507_v54  ;;  %2051 = vmatmul.mubr.bf16.vlgmr.msra.gmra.mrb[40].mxu1 %v4507_v54  ;;  %v4609_v25 = vld [vmem:[%s3719_s27 + $0x48] ss:$16 sps:$4 sm:$0xff]   ;;  %s3199_s22 = smul.u32 4294967120, %s3640_s15 }
 0xa66   : > { %2118 = vmatpush1.bf16.msra.mxu0 %v4153_v33  ;;  %2159 = vmatpush1.bf16.msra.mxu1 %v4157_v61  ;;  %v4544_v33 = vld [vmem:[%s3719_s27 + $0x4] ss:$16 sps:$4 sm:$0xff]   ;;  %v4548_v61 = vld [vmem:[%s3719_s27 + $0xc] ss:$16 sps:$4 sm:$0xff]  }
 0xa67   : > { %2119 = vmatprep.subr.bf16.mxu0 %v4161_v37  ;;  %2160 = vmatprep.subr.bf16.mxu1 %v4165_v39  ;;  %v3176_v37 = vld [vmem:[%s2956_s26 + $0xa0] sm:$0xff]  ;;  %s2980_s25 = scalar_lea.vmem %s3896_s5, %s3199_s22 }
 0xa68   : > { %2149 = vmatprep.mubr.bf16.mxu0 %v3650_v1  ;;  %2190 = vmatprep.mubr.bf16.mxu1 %v3650_v1  ;;  %v1969_v39 = vunpack.c.l.bf16 %v3176_v37 }
 0xa6a   : > { %2120 = vmatpush1.bf16.msra.mxu0 %v4171_v0  ;;  %2161 = vmatpush1.bf16.msra.mxu1 %v4175_v2  ;;  %v1970_v0 = vunpack.c.h.bf16 %v3176_v37  ;;  %v1973_v2 = vadd.f32 %v1969_v39, %v3903_v42  ;;  %v4617_v37 = vld [vmem:[%s3719_s27 + $0x6c] ss:$16 sps:$4 sm:$0xff]   ;;  %v4621_v39 = vld [vmem:[%s3719_s27 + $0x60] ss:$16 sps:$4 sm:$0xff]  }
 0xa6b   : > { %2121 = vmatprep.subr.bf16.mxu0 %v4179_v41  ;;  %2162 = vmatprep.subr.bf16.mxu1 %v4183_v7  ;;  %v3177_v41 = vld [vmem:[%s2956_s26 + $0xa8] sm:$0xff]  ;;  %s2382_s26 = smul.u32 4294967285, %s3640_s15 }
 0xa6c   : > { %v1974_v7 = vadd.f32 %v1970_v0, %v3905_v44  ;;  %v4625_v0 = vld [vmem:[%s3719_s27 + $0x68] ss:$16 sps:$4 sm:$0xff]  }
 0xa6d   : > { %s2383_s28 = sadd.s32 13, %s2382_s26 }
 0xa6e   : > { %2122 = vmatpush1.bf16.msra.mxu0 %v4187_v43  ;;  %2163 = vmatpush1.bf16.msra.mxu1 %v4191_v47 }
 0xa6f   : > { %2123 = vmatprep.subr.bf16.mxu0 %v4195_v36  ;;  %2164 = vmatprep.subr.bf16.mxu1 %v4199_v5  ;;  %v1972_v36 = vunpack.c.h.bf16 %v3177_v41 }
 0xa72   : > { %2124 = vmatpush1.bf16.msra.mxu0 %v4203_v6  ;;  %2165 = vmatpush1.bf16.msra.mxu1 %v4207_v8 }
 0xa73   : > { %2125 = vmatprep.subr.bf16.mxu0 %v4211_v9  ;;  %2166 = vmatprep.subr.bf16.mxu1 %v4215_v10 }
 0xa76   : > { %2126 = vmatpush1.bf16.msra.mxu0 %v4219_v11  ;;  %2167 = vmatpush1.bf16.msra.mxu1 %v4223_v12 }
 0xa77   : > { %2127 = vmatprep.subr.bf16.mxu0 %v4227_v13  ;;  %2168 = vmatprep.subr.bf16.mxu1 %v4231_v14 }
 0xa7a   : > { %2128 = vmatpush1.bf16.msra.mxu0 %v4235_v15  ;;  %2169 = vmatpush1.bf16.msra.mxu1 %v4239_v16  ;;  %v1976_v16 = vadd.f32 %v1972_v36, %v3909_v50  ;;  %v4649_v36 = vld [vmem:[%s3719_s27 + $0xac] ss:$16 sps:$4 sm:$0xff]  }
 0xa7b   : > { %2129 = vmatprep.subr.bf16.mxu0 %v4243_v17  ;;  %2170 = vmatprep.subr.bf16.mxu1 %v4247_v18  ;;  %v1971_v17 = vunpack.c.l.bf16 %v3177_v41  ;;  %v4633_v41 = vld [vmem:[%s3719_s27 + $0x8c] ss:$16 sps:$4 sm:$0xff]  }
 0xa7e   : > { %2130 = vmatpush1.bf16.msra.mxu0 %v4251_v19  ;;  %2171 = vmatpush1.bf16.msra.mxu1 %v4255_v20  ;;  %v1975_v19 = vadd.f32 %v1971_v17, %v3912_v62 }
 0xa7f   : > { %2131 = vmatprep.subr.bf16.mxu0 %v4259_v21  ;;  %2172 = vmatprep.subr.bf16.mxu1 %v4263_v22 }
 0xa82   : > { %2132 = vmatpush1.bf16.msra.mxu0 %v4267_v23  ;;  %2173 = vmatpush1.bf16.msra.mxu1 %v4271_v24 }
 0xa83   : > { %2257 = vmatprep.subr.bf16.mxu0 %v4544_v33  ;;  %2298 = vmatprep.subr.bf16.mxu1 %v4548_v61 }
 0xb38   : > { %v2011_v43 = vpop.f32.mrb[40].mxu0  ;;  %v2052_v47 = vpop.f32.mrb[40].mxu1 }
 0xb39   : > { %v2059_v5 = vadd.f32 %v2011_v43, %v1973_v2  ;;  %v2013_v6 = vpop.f32.mrb[41].mxu0  ;;  %v2054_v8 = vpop.f32.mrb[41].mxu1  ;;  %v2061_v21 = vadd.f32 %v2052_v47, %v1975_v19  ;;  %v4629_v2 = vld [vmem:[%s3719_s27 + $0x84] ss:$16 sps:$4 sm:$0xff]   ;;  %v4641_v43 = vld [vmem:[%s3719_s27 + $0x88] ss:$16 sps:$4 sm:$0xff]  }
 0xb3a   : > { %v2060_v9 = vadd.f32 %v2013_v6, %v1974_v7  ;;  %v2015_v10 = vpop.f32.mrb[42].mxu0  ;;  %v2056_v11 = vpop.f32.mrb[42].mxu1  ;;  %v2062_v18 = vadd.f32 %v2054_v8, %v1976_v16  ;;  %v4637_v7 = vld [vmem:[%s3719_s27 + $0x80] ss:$16 sps:$4 sm:$0xff]   ;;  %v4645_v47 = vld [vmem:[%s3719_s27 + $0xa4] ss:$16 sps:$4 sm:$0xff]  }
 0xb3b   : > { %v3178_v12 = vmul.f32 -1.442695, %v2059_v5  ;;  %v2016_v13 = vpop.f32.mrb[43].mxu0  ;;  %v2057_v14 = vpop.f32.mrb[43].mxu1  ;;  %v4653_v5 = vld [vmem:[%s3719_s27 + $0xa0] ss:$16 sps:$4 sm:$0xff]  }
 0xb3c   : > { %v3179_v15 = vmul.f32 -1.442695, %v2060_v9  ;;  %v3180_v20 = vmul.f32 -1.442695, %v2062_v18  ;;  %v4657_v6 = vld [vmem:[%s3719_s27 + $0xa8] ss:$16 sps:$4 sm:$0xff]  }
 0xb3d   : > { %3466 = vpow2.f32 %v3178_v12  ;;  %v4661_v8 = vld [vmem:[%s3719_s27 + $0xc4] ss:$16 sps:$4 sm:$0xff]   ;;  %v4665_v9 = vld [vmem:[%s3719_s27 + $0xcc] ss:$16 sps:$4 sm:$0xff]   ;;  %v4669_v10 = vld [vmem:[%s3719_s27 + $0xc0] ss:$16 sps:$4 sm:$0xff]  }
 0xb3e   : > { %3468 = vpow2.f32 %v3179_v15  ;;  %v4673_v11 = vld [vmem:[%s3719_s27 + $0xc8] ss:$16 sps:$4 sm:$0xff]   ;;  %v4677_v12 = vld [vmem:[%s3719_s27 + $0xe4] ss:$16 sps:$4 sm:$0xff]   ;;  %v4681_v13 = vld [vmem:[%s3719_s27 + $0xec] ss:$16 sps:$4 sm:$0xff]  }
 0xb3f   : > { %3470 = vpow2.f32 %v3180_v20  ;;  %v4685_v14 = vld [vmem:[%s3719_s27 + $0xe0] ss:$16 sps:$4 sm:$0xff]   ;;  %v4689_v15 = vld [vmem:[%s3719_s27 + $0xe8] ss:$16 sps:$4 sm:$0xff]  }
 0xb40   : > { %3472 = vtanh.f32 %v2061_v21  ;;  %v3184_v16 = vld [vmem:[%s2964_s7 + $0xb0] sm:$0xff]  ;;  %v3185_v20 = vld [vmem:[%s2964_s7 + $0xb8] sm:$0xff]  ;;  %s2522_s7 = smul.u32 4294967283, %s3640_s15 }
 0xb41   : > { %v2109_v17 = vunpack.c.l.bf16 %v3184_v16  ;;  %v2110_v18 = vunpack.c.h.bf16 %v3184_v16 }
 0xb43   : > { %v2113_v19 = vadd.f32 %v2109_v17, %v3903_v42  ;;  %v2114_v21 = vadd.f32 %v2110_v18, %v3905_v44 }
 0xb47   : > { %v3467_v22 = vpop.eup %3466 }
 0xb48   : > { %v3469_v23 = vpop.eup %3468  ;;  %v2066_v24 = vadd.f32 1.0, %v3467_v22 }
 0xb49   : > { %v2072_v26 = vadd.f32 1.0, %v3469_v23  ;;  %v3471_v27 = vpop.eup %3470 }
 0xb4a   : > { %3474 = vrcp.f32 %v2066_v24  ;;  %v3473_v56 = vpop.eup %3472  ;;  %v2079_v58 = vadd.f32 1.0, %v3471_v27  ;;  %v2112_v24 = vunpack.c.h.bf16 %v3185_v20 }
 0xb4b   : > { %3476 = vrcp.f32 %v2072_v26 }
 0xb4c   : > { %3478 = vrcp.f32 %v2079_v58 }
 0xb54   : > { %v3475_v59 = vpop.eup %3474 }
 0xb55   : > { %v3477_v28 = vpop.eup %3476  ;;  %v2083_v35 = vmul.f32 %v3475_v59, %v3473_v56 }
 0xb56   : > { %v2082_v30 = vmul.f32 %v3477_v28, %v4502_v49  ;;  %v3479_v29 = vpop.eup %3478 }
 0xb58   : > { %v2084_v31 = vadd.f32 %v2083_v35, %v2082_v30 }
 0xb5a   : > { %3480 = vtanh.f32 %v2084_v31  ;;  %v4561_v32 = vsel %vm2089_vm4, %v2084_v31, %v4502_v49  ;;  %v4589_v49 = vld [vmem:[%s3719_s27 + $0x20] ss:$16 sps:$4 sm:$0xff]  }
 0xb64   : > { %v3481_v38 = vpop.eup %3480 }
 0xb65   : > { %v2086_v55 = vmul.f32 %v3481_v38, %v3479_v29  ;;  %v2116_v29 = vadd.f32 %v2112_v24, %v3909_v50  ;;  %v2111_v38 = vunpack.c.l.bf16 %v3185_v20 }
 0xb67   : > { %v2087_v40 = vpack.c.bf16 %v2086_v55, %v2086_v55 }
 0xb69   : > { %v2091_v51 = vsel %vm2090_vm5, %v2087_v40, 0  ;;  %v4566_v48 = vsel %vm2090_vm5, %v2087_v40, %v4507_v54  ;;  %v4613_v54 = vld [vmem:[%s3719_s27 + $0x64] ss:$16 sps:$4 sm:$0xff]   ;;  %v2115_v40 = vadd.f32 %v2111_v38, %v3912_v62  ;;  %s2102_s27 = smul.u32 4294967289, %s3640_s15 }
 0xb6a   : > { %3182 = vst [vmem:[%s2960_s19 + $0x28] sm:$0xf] %v2091_v51  ;;  %2150 = vmatmul.mubr.bf16.vlgmr.msra.gmra.mrb[44].mxu0 %v4566_v48  ;;  %2191 = vmatmul.mubr.bf16.vlgmr.msra.gmra.mrb[44].mxu1 %v4566_v48  ;;  %s3207_s19 = smul.u32 4294967088, %s3640_s15 }
 0xb6b   : > { %2258 = vmatpush1.bf16.msra.mxu0 %v4571_v45  ;;  %2299 = vmatpush1.bf16.msra.mxu1 %v4575_v46  ;;  %s2103_s8 = sadd.s32 11, %s2102_s27  ;;  %s2523_s27 = sadd.s32 14, %s2522_s7 }
 0xb6c   : > { %2259 = vmatprep.subr.bf16.mxu0 %v4579_v57  ;;  %2300 = vmatprep.subr.bf16.mxu1 %v4583_v53  ;;  %s2988_s6 = scalar_lea.vmem %s3896_s5, %s3207_s19 }
 0xb6d   : > { %2289 = vmatprep.mubr.bf16.mxu0 %v3650_v1  ;;  %2330 = vmatprep.mubr.bf16.mxu1 %v3650_v1 }
 0xb6f   : > { %2260 = vmatpush1.bf16.msra.mxu0 %v4589_v49  ;;  %2301 = vmatpush1.bf16.msra.mxu1 %v4593_v3 }
 0xb70   : > { %2261 = vmatprep.subr.bf16.mxu0 %v4597_v60  ;;  %2302 = vmatprep.subr.bf16.mxu1 %v4601_v4 }
 0xb73   : > { %2262 = vmatpush1.bf16.msra.mxu0 %v4605_v63  ;;  %2303 = vmatpush1.bf16.msra.mxu1 %v4609_v25 }
 0xb74   : > { %2263 = vmatprep.subr.bf16.mxu0 %v4613_v54  ;;  %2304 = vmatprep.subr.bf16.mxu1 %v4617_v37 }
 0xb77   : > { %2264 = vmatpush1.bf16.msra.mxu0 %v4621_v39  ;;  %2305 = vmatpush1.bf16.msra.mxu1 %v4625_v0 }
 0xb78   : > { %2265 = vmatprep.subr.bf16.mxu0 %v4629_v2  ;;  %2306 = vmatprep.subr.bf16.mxu1 %v4633_v41 }
 0xb7b   : > { %2266 = vmatpush1.bf16.msra.mxu0 %v4637_v7  ;;  %2307 = vmatpush1.bf16.msra.mxu1 %v4641_v43 }
 0xb7c   : > { %2267 = vmatprep.subr.bf16.mxu0 %v4645_v47  ;;  %2308 = vmatprep.subr.bf16.mxu1 %v4649_v36 }
 0xb7f   : > { %2268 = vmatpush1.bf16.msra.mxu0 %v4653_v5  ;;  %2309 = vmatpush1.bf16.msra.mxu1 %v4657_v6 }
 0xb80   : > { %2269 = vmatprep.subr.bf16.mxu0 %v4661_v8  ;;  %2310 = vmatprep.subr.bf16.mxu1 %v4665_v9 }
 0xb83   : > { %2270 = vmatpush1.bf16.msra.mxu0 %v4669_v10  ;;  %2311 = vmatpush1.bf16.msra.mxu1 %v4673_v11 }
 0xb84   : > { %2271 = vmatprep.subr.bf16.mxu0 %v4677_v12  ;;  %2312 = vmatprep.subr.bf16.mxu1 %v4681_v13 }
 0xb87   : > { %2272 = vmatpush1.bf16.msra.mxu0 %v4685_v14  ;;  %2313 = vmatpush1.bf16.msra.mxu1 %v4689_v15 }
 0xb88   : > { %2397 = vmatprep.subr.bf16.mxu0 %v4544_v33  ;;  %2438 = vmatprep.subr.bf16.mxu1 %v4548_v61 }
 0xc3d   : > { %v2151_v22 = vpop.f32.mrb[44].mxu0  ;;  %v2192_v23 = vpop.f32.mrb[44].mxu1 }
 0xc3e   : > { %v2199_v26 = vadd.f32 %v2151_v22, %v2113_v19  ;;  %v2153_v27 = vpop.f32.mrb[45].mxu0  ;;  %v2194_v56 = vpop.f32.mrb[45].mxu1  ;;  %v2201_v16 = vadd.f32 %v2192_v23, %v2115_v40 }
 0xc3f   : > { %v2200_v59 = vadd.f32 %v2153_v27, %v2114_v21  ;;  %v2155_v28 = vpop.f32.mrb[46].mxu0  ;;  %v2196_v35 = vpop.f32.mrb[46].mxu1  ;;  %v2202_v55 = vadd.f32 %v2194_v56, %v2116_v29 }
 0xc40   : > { %v3186_v58 = vmul.f32 -1.442695, %v2199_v26  ;;  %v2156_v30 = vpop.f32.mrb[47].mxu0  ;;  %v2197_v34 = vpop.f32.mrb[47].mxu1 }
 0xc41   : > { %v3187_v31 = vmul.f32 -1.442695, %v2200_v59  ;;  %v3188_v51 = vmul.f32 -1.442695, %v2202_v55  ;;  %v2228_v59 = vstv %s2103_s8  ;;  %s3213_s8 = smul.u32 4294967244, %s3640_s15 }
 0xc42   : > { %3482 = vpow2.f32 %v3186_v58  ;;  %vm2229_vm6 = vcmp.gt.s32.totalorder %v3916_v52, %v2228_v59 }
 0xc43   : > { %3484 = vpow2.f32 %v3187_v31  ;;  %vm2230_vm7 = vmpackc.low %vm2229_vm6, %vm2229_vm6  ;;  %s2992_s9 = scalar_lea.vmem %s3926_s21, %s3213_s8 }
 0xc44   : > { %3486 = vpow2.f32 %v3188_v51  ;;  %v3193_v51 = vld [vmem:[%s2972_s12 + $0xc8] sm:$0xff] }
 0xc45   : > { %3488 = vtanh.f32 %v2201_v16 }
 0xc4c   : > { %v3483_v17 = vpop.eup %3482 }
 0xc4d   : > { %v3485_v18 = vpop.eup %3484  ;;  %v2206_v19 = vadd.f32 1.0, %v3483_v17 }
 0xc4e   : > { %v2212_v21 = vadd.f32 1.0, %v3485_v18  ;;  %v3487_v22 = vpop.eup %3486 }
 0xc4f   : > { %3490 = vrcp.f32 %v2206_v19  ;;  %v3489_v24 = vpop.eup %3488  ;;  %v2219_v56 = vadd.f32 1.0, %v3487_v22  ;;  %v2252_v19 = vunpack.c.h.bf16 %v3193_v51 }
 0xc50   : > { %3492 = vrcp.f32 %v2212_v21 }
 0xc51   : > { %3494 = vrcp.f32 %v2219_v56 }
 0xc59   : > { %v3491_v20 = vpop.eup %3490 }
 0xc5a   : > { %v3493_v26 = vpop.eup %3492  ;;  %v2223_v27 = vmul.f32 %v3491_v20, %v3489_v24 }
 0xc5b   : > { %v2222_v23 = vmul.f32 %v3493_v26, %v4561_v32  ;;  %v3495_v58 = vpop.eup %3494 }
 0xc5d   : > { %v2224_v28 = vadd.f32 %v2223_v27, %v2222_v23 }
 0xc5f   : > { %3496 = vtanh.f32 %v2224_v28  ;;  %v4704_v35 = vsel %vm2229_vm6, %v2224_v28, %v4561_v32  ;;  %v3192_v32 = vld [vmem:[%s2972_s12 + $0xc0] sm:$0xff] }
 0xc60   : > { %v2250_v55 = vunpack.c.h.bf16 %v3192_v32 }
 0xc62   : > { %v2254_v16 = vadd.f32 %v2250_v55, %v3905_v44 }
 0xc69   : > { %v3497_v30 = vpop.eup %3496 }
 0xc6a   : > { %v2226_v34 = vmul.f32 %v3497_v30, %v3495_v58  ;;  %v2256_v58 = vadd.f32 %v2252_v19, %v3909_v50  ;;  %v2251_v30 = vunpack.c.l.bf16 %v3193_v51 }
 0xc6c   : > { %v2227_v31 = vpack.c.bf16 %v2226_v34, %v2226_v34 }
 0xc6e   : > { %v2231_v29 = vsel %vm2230_vm7, %v2227_v31, 0  ;;  %v4709_v38 = vsel %vm2230_vm7, %v2227_v31, %v4566_v48  ;;  %v2249_v48 = vunpack.c.l.bf16 %v3192_v32  ;;  %v2255_v31 = vadd.f32 %v2251_v30, %v3912_v62 }
 0xc6f   : > { %3190 = vst [vmem:[%s2968_s10 + $0x2c] sm:$0xf] %v2231_v29  ;;  %2290 = vmatmul.mubr.bf16.vlgmr.msra.gmra.mrb[48].mxu0 %v4709_v38  ;;  %2331 = vmatmul.mubr.bf16.vlgmr.msra.gmra.mrb[48].mxu1 %v4709_v38  ;;  %s3215_s10 = smul.u32 4294967056, %s3640_s15 }
 0xc70   : > { %2398 = vmatpush1.bf16.msra.mxu0 %v4571_v45  ;;  %2439 = vmatpush1.bf16.msra.mxu1 %v4575_v46  ;;  %v2253_v40 = vadd.f32 %v2249_v48, %v3903_v42 }
 0xc71   : > { %2399 = vmatprep.subr.bf16.mxu0 %v4579_v57  ;;  %2440 = vmatprep.subr.bf16.mxu1 %v4583_v53  ;;  %s2996_s11 = scalar_lea.vmem %s3896_s5, %s3215_s10  ;;  %s2662_s5 = smul.u32 4294967281, %s3640_s15 }
 0xc72   : > { %2429 = vmatprep.mubr.bf16.mxu0 %v3650_v1  ;;  %2470 = vmatprep.mubr.bf16.mxu1 %v3650_v1 }
 0xc73   : > { %s2663_s12 = sadd.s32 15, %s2662_s5 }
 0xc74   : > { %2400 = vmatpush1.bf16.msra.mxu0 %v4589_v49  ;;  %2441 = vmatpush1.bf16.msra.mxu1 %v4593_v3 }
 0xc75   : > { %2401 = vmatprep.subr.bf16.mxu0 %v4597_v60  ;;  %2442 = vmatprep.subr.bf16.mxu1 %v4601_v4 }
 0xc78   : > { %2402 = vmatpush1.bf16.msra.mxu0 %v4605_v63  ;;  %2443 = vmatpush1.bf16.msra.mxu1 %v4609_v25 }
 0xc79   : > { %2403 = vmatprep.subr.bf16.mxu0 %v4613_v54  ;;  %2444 = vmatprep.subr.bf16.mxu1 %v4617_v37 }
 0xc7c   : > { %2404 = vmatpush1.bf16.msra.mxu0 %v4621_v39  ;;  %2445 = vmatpush1.bf16.msra.mxu1 %v4625_v0 }
 0xc7d   : > { %2405 = vmatprep.subr.bf16.mxu0 %v4629_v2  ;;  %2446 = vmatprep.subr.bf16.mxu1 %v4633_v41 }
 0xc80   : > { %2406 = vmatpush1.bf16.msra.mxu0 %v4637_v7  ;;  %2447 = vmatpush1.bf16.msra.mxu1 %v4641_v43 }
 0xc81   : > { %2407 = vmatprep.subr.bf16.mxu0 %v4645_v47  ;;  %2448 = vmatprep.subr.bf16.mxu1 %v4649_v36 }
 0xc84   : > { %2408 = vmatpush1.bf16.msra.mxu0 %v4653_v5  ;;  %2449 = vmatpush1.bf16.msra.mxu1 %v4657_v6 }
 0xc85   : > { %2409 = vmatprep.subr.bf16.mxu0 %v4661_v8  ;;  %2450 = vmatprep.subr.bf16.mxu1 %v4665_v9 }
 0xc88   : > { %2410 = vmatpush1.bf16.msra.mxu0 %v4669_v10  ;;  %2451 = vmatpush1.bf16.msra.mxu1 %v4673_v11 }
 0xc89   : > { %2411 = vmatprep.subr.bf16.mxu0 %v4677_v12  ;;  %2452 = vmatprep.subr.bf16.mxu1 %v4681_v13 }
 0xc8c   : > { %2412 = vmatpush1.bf16.msra.mxu0 %v4685_v14  ;;  %2453 = vmatpush1.bf16.msra.mxu1 %v4689_v15 }
 0xc8d   : > { %2537 = vmatprep.subr.bf16.mxu0 %v4544_v33  ;;  %2578 = vmatprep.subr.bf16.mxu1 %v4548_v61 }
 0xd42   : > { %v2291_v17 = vpop.f32.mrb[48].mxu0  ;;  %v2332_v18 = vpop.f32.mrb[48].mxu1 }
 0xd43   : > { %v2339_v21 = vadd.f32 %v2291_v17, %v2253_v40  ;;  %v2293_v22 = vpop.f32.mrb[49].mxu0  ;;  %v2334_v24 = vpop.f32.mrb[49].mxu1  ;;  %v2341_v32 = vadd.f32 %v2332_v18, %v2255_v31 }
 0xd44   : > { %v2340_v20 = vadd.f32 %v2293_v22, %v2254_v16  ;;  %v2295_v26 = vpop.f32.mrb[50].mxu0  ;;  %v2336_v27 = vpop.f32.mrb[50].mxu1  ;;  %v2342_v34 = vadd.f32 %v2334_v24, %v2256_v58 }
 0xd45   : > { %v3194_v56 = vmul.f32 -1.442695, %v2339_v21  ;;  %v2296_v23 = vpop.f32.mrb[51].mxu0  ;;  %v2337_v59 = vpop.f32.mrb[51].mxu1 }
 0xd46   : > { %v3195_v28 = vmul.f32 -1.442695, %v2340_v20  ;;  %v3196_v29 = vmul.f32 -1.442695, %v2342_v34  ;;  %v2368_v20 = vstv %s2243_s14  ;;  %s3000_s14 = scalar_lea.vmem %s3926_s21, %s3221_s13 }
 0xd47   : > { %3498 = vpow2.f32 %v3194_v56  ;;  %vm2369_vm8 = vcmp.gt.s32.totalorder %v3916_v52, %v2368_v20 }
 0xd48   : > { %3500 = vpow2.f32 %v3195_v28  ;;  %vm2370_vm9 = vmpackc.low %vm2369_vm8, %vm2369_vm8 }
 0xd49   : > { %3502 = vpow2.f32 %v3196_v29  ;;  %v3201_v29 = vld [vmem:[%s2980_s25 + $0xd8] sm:$0xff] }
 0xd4a   : > { %3504 = vtanh.f32 %v2341_v32 }
 0xd51   : > { %v3499_v48 = vpop.eup %3498 }
 0xd52   : > { %v3501_v55 = vpop.eup %3500  ;;  %v2346_v40 = vadd.f32 1.0, %v3499_v48 }
 0xd53   : > { %v2352_v16 = vadd.f32 1.0, %v3501_v55  ;;  %v3503_v17 = vpop.eup %3502 }
 0xd54   : > { %3506 = vrcp.f32 %v2346_v40  ;;  %v3505_v19 = vpop.eup %3504  ;;  %v2359_v24 = vadd.f32 1.0, %v3503_v17  ;;  %v2392_v40 = vunpack.c.h.bf16 %v3201_v29 }
 0xd55   : > { %3508 = vrcp.f32 %v2352_v16 }
 0xd56   : > { %3510 = vrcp.f32 %v2359_v24  ;;  %v2396_v20 = vadd.f32 %v2392_v40, %v3909_v50 }
 0xd5e   : > { %v3507_v51 = vpop.eup %3506 }
 0xd5f   : > { %v3509_v21 = vpop.eup %3508  ;;  %v2363_v22 = vmul.f32 %v3507_v51, %v3505_v19 }
 0xd60   : > { %v2362_v18 = vmul.f32 %v3509_v21, %v4704_v35  ;;  %v3511_v56 = vpop.eup %3510 }
 0xd62   : > { %v2364_v26 = vadd.f32 %v2363_v22, %v2362_v18 }
 0xd64   : > { %3512 = vtanh.f32 %v2364_v26  ;;  %v4757_v27 = vsel %vm2369_vm8, %v2364_v26, %v4704_v35  ;;  %v3200_v35 = vld [vmem:[%s2980_s25 + $0xd0] sm:$0xff]  ;;  %v2391_v26 = vunpack.c.l.bf16 %v3201_v29 }
 0xd65   : > { %v2390_v34 = vunpack.c.h.bf16 %v3200_v35 }
 0xd67   : > { %v2394_v32 = vadd.f32 %v2390_v34, %v3905_v44 }
 0xd6e   : > { %v3513_v23 = vpop.eup %3512 }
 0xd6f   : > { %v2366_v59 = vmul.f32 %v3513_v23, %v3511_v56  ;;  %v2395_v23 = vadd.f32 %v2391_v26, %v3912_v62 }
 0xd71   : > { %v2367_v28 = vpack.c.bf16 %v2366_v59, %v2366_v59 }
 0xd73   : > { %v2371_v58 = vsel %vm2370_vm9, %v2367_v28, 0  ;;  %v4762_v30 = vsel %vm2370_vm9, %v2367_v28, %v4709_v38  ;;  %v2389_v38 = vunpack.c.l.bf16 %v3200_v35 }
 0xd74   : > { %3198 = vst [vmem:[%s2976_s24 + $0x30] sm:$0xf] %v2371_v58  ;;  %2430 = vmatmul.mubr.bf16.vlgmr.msra.gmra.mrb[52].mxu0 %v4762_v30  ;;  %2471 = vmatmul.mubr.bf16.vlgmr.msra.gmra.mrb[52].mxu1 %v4762_v30 }
 0xd75   : > { %2538 = vmatpush1.bf16.msra.mxu0 %v4571_v45  ;;  %2579 = vmatpush1.bf16.msra.mxu1 %v4575_v46  ;;  %v2393_v31 = vadd.f32 %v2389_v38, %v3903_v42 }
 0xd76   : > { %2539 = vmatprep.subr.bf16.mxu0 %v4579_v57  ;;  %2580 = vmatprep.subr.bf16.mxu1 %v4583_v53 }
 0xd77   : > { %2569 = vmatprep.mubr.bf16.mxu0 %v3650_v1  ;;  %2610 = vmatprep.mubr.bf16.mxu1 %v3650_v1 }
 0xd79   : > { %2540 = vmatpush1.bf16.msra.mxu0 %v4589_v49  ;;  %2581 = vmatpush1.bf16.msra.mxu1 %v4593_v3 }
 0xd7a   : > { %2541 = vmatprep.subr.bf16.mxu0 %v4597_v60  ;;  %2582 = vmatprep.subr.bf16.mxu1 %v4601_v4 }
 0xd7d   : > { %2542 = vmatpush1.bf16.msra.mxu0 %v4605_v63  ;;  %2583 = vmatpush1.bf16.msra.mxu1 %v4609_v25 }
 0xd7e   : > { %2543 = vmatprep.subr.bf16.mxu0 %v4613_v54  ;;  %2584 = vmatprep.subr.bf16.mxu1 %v4617_v37 }
 0xd81   : > { %2544 = vmatpush1.bf16.msra.mxu0 %v4621_v39  ;;  %2585 = vmatpush1.bf16.msra.mxu1 %v4625_v0 }
 0xd82   : > { %2545 = vmatprep.subr.bf16.mxu0 %v4629_v2  ;;  %2586 = vmatprep.subr.bf16.mxu1 %v4633_v41 }
 0xd85   : > { %2546 = vmatpush1.bf16.msra.mxu0 %v4637_v7  ;;  %2587 = vmatpush1.bf16.msra.mxu1 %v4641_v43 }
 0xd86   : > { %2547 = vmatprep.subr.bf16.mxu0 %v4645_v47  ;;  %2588 = vmatprep.subr.bf16.mxu1 %v4649_v36 }
 0xd89   : > { %2548 = vmatpush1.bf16.msra.mxu0 %v4653_v5  ;;  %2589 = vmatpush1.bf16.msra.mxu1 %v4657_v6 }
 0xd8a   : > { %2549 = vmatprep.subr.bf16.mxu0 %v4661_v8  ;;  %2590 = vmatprep.subr.bf16.mxu1 %v4665_v9 }
 0xd8d   : > { %2550 = vmatpush1.bf16.msra.mxu0 %v4669_v10  ;;  %2591 = vmatpush1.bf16.msra.mxu1 %v4673_v11 }
 0xd8e   : > { %2551 = vmatprep.subr.bf16.mxu0 %v4677_v12  ;;  %2592 = vmatprep.subr.bf16.mxu1 %v4681_v13 }
 0xd91   : > { %2552 = vmatpush1.bf16.msra.mxu0 %v4685_v14  ;;  %2593 = vmatpush1.bf16.msra.mxu1 %v4689_v15 }
 0xd92   : > { %2677 = vmatprep.subr.bf16.mxu0 %v4544_v33  ;;  %2718 = vmatprep.subr.bf16.mxu1 %v4548_v61 }
 0xe47   : > { %v2431_v48 = vpop.f32.mrb[52].mxu0  ;;  %v2472_v55 = vpop.f32.mrb[52].mxu1 }
 0xe48   : > { %v2479_v16 = vadd.f32 %v2431_v48, %v2393_v31  ;;  %v2433_v17 = vpop.f32.mrb[53].mxu0  ;;  %v2474_v19 = vpop.f32.mrb[53].mxu1  ;;  %v2481_v28 = vadd.f32 %v2472_v55, %v2395_v23  ;;  %v2648_v23 = vstv %s2523_s27 }
 0xe49   : > { %v2480_v51 = vadd.f32 %v2433_v17, %v2394_v32  ;;  %v2435_v33 = vpop.f32.mrb[54].mxu0  ;;  %v2476_v21 = vpop.f32.mrb[54].mxu1  ;;  %v2482_v56 = vadd.f32 %v2474_v19, %v2396_v20  ;;  %v2508_v17 = vstv %s2383_s28  ;;  %vm4862_vm12 = vcmp.gt.s32.totalorder %v3916_v52, %v2648_v23 }
 0xe4a   : > { %v3202_v61 = vmul.f32 -1.442695, %v2479_v16  ;;  %v2436_v22 = vpop.f32.mrb[55].mxu0  ;;  %v2477_v24 = vpop.f32.mrb[55].mxu1  ;;  %vm2509_vm10 = vcmp.gt.s32.totalorder %v3916_v52, %v2508_v17  ;;  %vm2650_vm13 = vmpackc.low %vm4862_vm12, %vm4862_vm12  ;;  %v3217_v17 = vld [vmem:[%s2996_s11 + $0xf8] sm:$0xff] }
 0xe4b   : > { %v3203_v18 = vmul.f32 -1.442695, %v2480_v51  ;;  %v3204_v59 = vmul.f32 -1.442695, %v2482_v56  ;;  %vm2510_vm11 = vmpackc.low %vm2509_vm10, %vm2509_vm10 }
 0xe4c   : > { %3514 = vpow2.f32 %v3202_v61 }
 0xe4d   : > { %3516 = vpow2.f32 %v3203_v18 }
 0xe4e   : > { %3518 = vpow2.f32 %v3204_v59 }
 0xe4f   : > { %3520 = vtanh.f32 %v2481_v28 }
 0xe56   : > { %v3515_v58 = vpop.eup %3514 }
 0xe57   : > { %v3517_v35 = vpop.eup %3516  ;;  %v2486_v38 = vadd.f32 1.0, %v3515_v58 }
 0xe58   : > { %v2492_v34 = vadd.f32 1.0, %v3517_v35  ;;  %v3519_v31 = vpop.eup %3518 }
 0xe59   : > { %3522 = vrcp.f32 %v2486_v38  ;;  %v3521_v32 = vpop.eup %3520  ;;  %v2499_v16 = vadd.f32 1.0, %v3519_v31 }
 0xe5a   : > { %3524 = vrcp.f32 %v2492_v34 }
 0xe5b   : > { %3526 = vrcp.f32 %v2499_v16 }
 0xe63   : > { %v3523_v29 = vpop.eup %3522 }
 0xe64   : > { %v3525_v48 = vpop.eup %3524  ;;  %v2503_v40 = vmul.f32 %v3523_v29, %v3521_v32 }
 0xe65   : > { %v2502_v55 = vmul.f32 %v3525_v48, %v4757_v27  ;;  %v3527_v33 = vpop.eup %3526  ;;  %v3216_v48 = vld [vmem:[%s2996_s11 + $0xf0] sm:$0xff] }
 0xe66   : > { %v2670_v16 = vunpack.c.h.bf16 %v3216_v48 }
 0xe67   : > { %v2504_v19 = vadd.f32 %v2503_v40, %v2502_v55  ;;  %v2669_v40 = vunpack.c.l.bf16 %v3216_v48 }
 0xe69   : > { %3528 = vtanh.f32 %v2504_v19  ;;  %v4810_v51 = vsel %vm2509_vm10, %v2504_v19, %v4757_v27  ;;  %v2673_v55 = vadd.f32 %v2669_v40, %v3903_v42  ;;  %v2674_v19 = vadd.f32 %v2670_v16, %v3905_v44 }
 0xe73   : > { %v3529_v21 = vpop.eup %3528 }
 0xe74   : > { %v2506_v61 = vmul.f32 %v3529_v21, %v3527_v33  ;;  %v2672_v21 = vunpack.c.h.bf16 %v3217_v17 }
 0xe76   : > { %v2507_v22 = vpack.c.bf16 %v2506_v61, %v2506_v61 }
 0xe78   : > { %v2511_v24 = vsel %vm2510_vm11, %v2507_v22, 0  ;;  %v4815_v18 = vsel %vm2510_vm11, %v2507_v22, %v4762_v30 }
 0xe79   : > { %3206 = vst [vmem:[%s2984_s30 + $0x34] sm:$0xf] %v2511_v24  ;;  %2570 = vmatmul.mubr.bf16.vlgmr.msra.gmra.mrb[56].mxu0 %v4815_v18  ;;  %2611 = vmatmul.mubr.bf16.vlgmr.msra.gmra.mrb[56].mxu1 %v4815_v18 }
 0xe7a   : > { %2678 = vmatpush1.bf16.msra.mxu0 %v4571_v45  ;;  %2719 = vmatpush1.bf16.msra.mxu1 %v4575_v46 }
 0xe7b   : > { %2679 = vmatprep.subr.bf16.mxu0 %v4579_v57  ;;  %2720 = vmatprep.subr.bf16.mxu1 %v4583_v53  ;;  %v3209_v53 = vld [vmem:[%s2988_s6 + $0xe8] sm:$0xff] }
 0xe7c   : > { %2709 = vmatprep.mubr.bf16.mxu0 %v3650_v1  ;;  %2750 = vmatprep.mubr.bf16.mxu1 %v3650_v1  ;;  %v3208_v1 = vld [vmem:[%s2988_s6 + $0xe0] sm:$0xff] }
 0xe7d   : > { %v2529_v45 = vunpack.c.l.bf16 %v3208_v1  ;;  %v2530_v46 = vunpack.c.h.bf16 %v3208_v1 }
 0xe7e   : > { %2680 = vmatpush1.bf16.msra.mxu0 %v4589_v49  ;;  %2721 = vmatpush1.bf16.msra.mxu1 %v4593_v3 }
 0xe7f   : > { %2681 = vmatprep.subr.bf16.mxu0 %v4597_v60  ;;  %2722 = vmatprep.subr.bf16.mxu1 %v4601_v4  ;;  %v2533_v57 = vadd.f32 %v2529_v45, %v3903_v42  ;;  %v2534_v49 = vadd.f32 %v2530_v46, %v3905_v44  ;;  %v2532_v4 = vunpack.c.h.bf16 %v3209_v53  ;;  %v2671_v42 = vunpack.c.l.bf16 %v3217_v17 }
 0xe82   : > { %2682 = vmatpush1.bf16.msra.mxu0 %v4605_v63  ;;  %2723 = vmatpush1.bf16.msra.mxu1 %v4609_v25 }
 0xe83   : > { %2683 = vmatprep.subr.bf16.mxu0 %v4613_v54  ;;  %2724 = vmatprep.subr.bf16.mxu1 %v4617_v37 }
 0xe86   : > { %2684 = vmatpush1.bf16.msra.mxu0 %v4621_v39  ;;  %2725 = vmatpush1.bf16.msra.mxu1 %v4625_v0 }
 0xe87   : > { %2685 = vmatprep.subr.bf16.mxu0 %v4629_v2  ;;  %2726 = vmatprep.subr.bf16.mxu1 %v4633_v41 }
 0xe8a   : > { %2686 = vmatpush1.bf16.msra.mxu0 %v4637_v7  ;;  %2727 = vmatpush1.bf16.msra.mxu1 %v4641_v43 }
 0xe8b   : > { %2687 = vmatprep.subr.bf16.mxu0 %v4645_v47  ;;  %2728 = vmatprep.subr.bf16.mxu1 %v4649_v36  ;;  %v2536_v47 = vadd.f32 %v2532_v4, %v3909_v50  ;;  %v2531_v36 = vunpack.c.l.bf16 %v3209_v53 }
 0xe8e   : > { %2688 = vmatpush1.bf16.msra.mxu0 %v4653_v5  ;;  %2729 = vmatpush1.bf16.msra.mxu1 %v4657_v6  ;;  %v2535_v6 = vadd.f32 %v2531_v36, %v3912_v62 }
 0xe8f   : > { %2689 = vmatprep.subr.bf16.mxu0 %v4661_v8  ;;  %2730 = vmatprep.subr.bf16.mxu1 %v4665_v9 }
 0xe92   : > { %2690 = vmatpush1.bf16.msra.mxu0 %v4669_v10  ;;  %2731 = vmatpush1.bf16.msra.mxu1 %v4673_v11 }
 0xe93   : > { %2691 = vmatprep.subr.bf16.mxu0 %v4677_v12  ;;  %2732 = vmatprep.subr.bf16.mxu1 %v4681_v13 }
 0xe96   : > { %2692 = vmatpush1.bf16.msra.mxu0 %v4685_v14  ;;  %2733 = vmatpush1.bf16.msra.mxu1 %v4689_v15 }
 0xf4c   : > { %v2571_v3 = vpop.f32.mrb[56].mxu0  ;;  %v2612_v60 = vpop.f32.mrb[56].mxu1 }
 0xf4d   : > { %v2619_v63 = vadd.f32 %v2571_v3, %v2533_v57  ;;  %v2573_v25 = vpop.f32.mrb[57].mxu0  ;;  %v2614_v54 = vpop.f32.mrb[57].mxu1  ;;  %v2621_v9 = vadd.f32 %v2612_v60, %v2535_v6  ;;  %v2676_v3 = vadd.f32 %v2672_v21, %v3909_v50  ;;  %v2675_v60 = vadd.f32 %v2671_v42, %v3912_v62 }
 0xf4e   : > { %v2620_v37 = vadd.f32 %v2573_v25, %v2534_v49  ;;  %v2575_v39 = vpop.f32.mrb[58].mxu0  ;;  %v2616_v0 = vpop.f32.mrb[58].mxu1  ;;  %v2622_v5 = vadd.f32 %v2614_v54, %v2536_v47  ;;  %v2788_v47 = vstv %s2663_s12 }
 0xf4f   : > { %v3210_v2 = vmul.f32 -1.442695, %v2619_v63  ;;  %v2576_v41 = vpop.f32.mrb[59].mxu0  ;;  %v2617_v7 = vpop.f32.mrb[59].mxu1  ;;  %vm2789_vm14 = vcmp.gt.s32.totalorder %v3916_v52, %v2788_v47 }
 0xf50   : > { %v3211_v43 = vmul.f32 -1.442695, %v2620_v37  ;;  %v3212_v8 = vmul.f32 -1.442695, %v2622_v5  ;;  %vm2790_vm15 = vmpackc.low %vm2789_vm14, %vm2789_vm14 }
 0xf51   : > { %3530 = vpow2.f32 %v3210_v2 }
 0xf52   : > { %3532 = vpow2.f32 %v3211_v43 }
 0xf53   : > { %3534 = vpow2.f32 %v3212_v8 }
 0xf54   : > { %3536 = vtanh.f32 %v2621_v9 }
 0xf5b   : > { %v3531_v10 = vpop.eup %3530 }
 0xf5c   : > { %v3533_v11 = vpop.eup %3532  ;;  %v2626_v12 = vadd.f32 1.0, %v3531_v10 }
 0xf5d   : > { %v2632_v13 = vadd.f32 1.0, %v3533_v11  ;;  %v3535_v14 = vpop.eup %3534 }
 0xf5e   : > { %3538 = vrcp.f32 %v2626_v12  ;;  %v3537_v15 = vpop.eup %3536  ;;  %v2639_v26 = vadd.f32 1.0, %v3535_v14 }
 0xf5f   : > { %3540 = vrcp.f32 %v2632_v13 }
 0xf60   : > { %3542 = vrcp.f32 %v2639_v26 }
 0xf68   : > { %v3539_v27 = vpop.eup %3538 }
 0xf69   : > { %v3541_v30 = vpop.eup %3540  ;;  %v2643_v20 = vmul.f32 %v3539_v27, %v3537_v15 }
 0xf6a   : > { %v2642_v56 = vmul.f32 %v3541_v30, %v4810_v51  ;;  %v3543_v35 = vpop.eup %3542 }
 0xf6c   : > { %v4859_v59 = vadd.f32 %v2643_v20, %v2642_v56 }
 0xf6e   : > { %3544 = vtanh.f32 %v4859_v59  ;;  %v2656_v58 = vsel %vm4862_vm12, %v4859_v59, %v4810_v51 }
 0xf78   : > { %v3545_v38 = vpop.eup %3544 }
 0xf79   : > { %v2646_v34 = vmul.f32 %v3545_v38, %v3543_v35 }
 0xf7b   : > { %v2647_v31 = vpack.c.bf16 %v2646_v34, %v2646_v34 }
 0xf7d   : > { %v2651_v32 = vsel %vm2650_vm13, %v2647_v31, 0  ;;  %v4877_v29 = vsel %vm2650_vm13, %v2647_v31, %v4815_v18 }
 0xf7e   : > { %3214 = vst [vmem:[%s2992_s9 + $0x38] sm:$0xf] %v2651_v32  ;;  %2710 = vmatmul.mubr.bf16.vlgmr.msra.gmra.mrb[60].mxu0 %v4877_v29  ;;  %2751 = vmatmul.mubr.bf16.vlgmr.msra.gmra.mrb[60].mxu1 %v4877_v29 }
0x1051   : > { %v2711_v51 = vpop.f32.mrb[60].mxu0  ;;  %v2752_v33 = vpop.f32.mrb[60].mxu1 }
0x1052   : > { %v2759_v61 = vadd.f32 %v2711_v51, %v2673_v55  ;;  %v2713_v22 = vpop.f32.mrb[61].mxu0  ;;  %v2754_v24 = vpop.f32.mrb[61].mxu1  ;;  %v2761_v63 = vadd.f32 %v2752_v33, %v2675_v60 }
0x1053   : > { %v2760_v18 = vadd.f32 %v2713_v22, %v2674_v19  ;;  %v2715_v1 = vpop.f32.mrb[62].mxu0  ;;  %v2756_v45 = vpop.f32.mrb[62].mxu1  ;;  %v2762_v44 = vadd.f32 %v2754_v24, %v2676_v3 }
0x1054   : > { %v3218_v46 = vmul.f32 -1.442695, %v2759_v61  ;;  %v2716_v57 = vpop.f32.mrb[63].mxu0  ;;  %v2757_v53 = vpop.f32.mrb[63].mxu1 }
0x1055   : > { %v3219_v49 = vmul.f32 -1.442695, %v2760_v18  ;;  %v3220_v4 = vmul.f32 -1.442695, %v2762_v44 }
0x1056   : > { %3546 = vpow2.f32 %v3218_v46 }
0x1057   : > { %3548 = vpow2.f32 %v3219_v49 }
0x1058   : > { %3550 = vpow2.f32 %v3220_v4 }
0x1059   : > { %3552 = vtanh.f32 %v2761_v63 }
0x1060   : > { %v3547_v25 = vpop.eup %3546 }
0x1061   : > { %v3549_v54 = vpop.eup %3548  ;;  %v2766_v37 = vadd.f32 1.0, %v3547_v25 }
0x1062   : > { %v2772_v39 = vadd.f32 1.0, %v3549_v54  ;;  %v3551_v50 = vpop.eup %3550 }
0x1063   : > { %3554 = vrcp.f32 %v2766_v37  ;;  %v3553_v0 = vpop.eup %3552  ;;  %v2779_v62 = vadd.f32 1.0, %v3551_v50 }
0x1064   : > { %3556 = vrcp.f32 %v2772_v39 }
0x1065   : > { %3558 = vrcp.f32 %v2779_v62 }
0x106d   : > { %v3555_v2 = vpop.eup %3554 }
0x106e   : > { %v3557_v41 = vpop.eup %3556  ;;  %v2783_v7 = vmul.f32 %v3555_v2, %v3553_v0 }
0x106f   : > { %v2782_v43 = vmul.f32 %v3557_v41, %v2656_v58  ;;  %v3559_v5 = vpop.eup %3558 }
0x1071   : > { %v2784_v36 = vadd.f32 %v2783_v7, %v2782_v43 }
0x1073   : > { %3560 = vtanh.f32 %v2784_v36 }
0x107d   : > { %v3561_v6 = vpop.eup %3560 }
0x107e   : > { %v2786_v8 = vmul.f32 %v3561_v6, %v3559_v5 }
0x1080   : > { %v2787_v9 = vpack.c.bf16 %v2786_v8, %v2786_v8 }
0x1082   : > { %v2791_v10 = vsel %vm2790_vm15, %v2787_v9, 0  ;;  %v2795_v11 = vsel %vm2790_vm15, %v2787_v9, %v4877_v29 }
0x1083   : > { %3222 = vst [vmem:[%s3000_s14 + $0x3c] sm:$0xf] %v2791_v10  ;;  %2797 = vst [vmem:[%s3708_s23] sm:$0xf] %v2795_v11 }
0x1084 PF: > { %s14_s17 = sadd.s32 1, %s3648_s17   ;;  %s4909_s15 = smov %s3644_s16 }
0x1085   : > { %p11_p5 = scmp.ge.s32.totalorder %s14_s17, 4   ;;  %s4910_s16 = smov %s4912_s18 }
0x1087   :  { %13 = sbr.rel (!%p11_p5) target bundleno = 2 (0x2), region = 112 }

</bundles_post_ra>
